<compile_context>
chip_gen: v6e
topology: v6e:2x2x1
jax: 0.10.0
libtpu: 0.0.40
codegen_flags: <defaults>
</compile_context>

<pallas_src>
import math
import jax
import jax.numpy as jnp
from jax.experimental import pallas as pl
from jax.experimental.pallas import tpu as pltpu

NUM_HEADS = 8
D_Q_IN = 32
D_KV_IN = 64
D_PROJ = 128
D_OUT = 32
LN_EPS = 1e-5


def _mha_kernel(
    x1_ref, x2_ref, x3_ref,
    wq_ref, bq_ref,
    wk_ref, bk_ref,
    wv_ref, bv_ref,
    wo_ref, bo_ref,
    lnw_ref, lnb_ref,
    out_ref,
):
    x1 = x1_ref[...].astype(jnp.float32)          # (Nq, 32)
    x2 = x2_ref[...].astype(jnp.float32)          # (128, 64)
    x3 = x3_ref[...].astype(jnp.float32)          # (128, 64)

    # Fused projections over all heads (heads concatenated along the lane axis).
    # Weights are pre-transposed to contraction-dim-first (K, 1024) lane-dense
    # layout, so these are plain MXU matmuls with no in-kernel relayout.
    q_all = jnp.dot(x1, wq_ref[...], preferred_element_type=jnp.float32) + bq_ref[...]  # (Nq,1024)
    k_all = jnp.dot(x3, wk_ref[...], preferred_element_type=jnp.float32) + bk_ref[...]  # (128,1024)
    v_all = jnp.dot(x2, wv_ref[...], preferred_element_type=jnp.float32) + bv_ref[...]  # (128,1024)

    # Per-head whole-tensor softmax on K and the chained q@k@v matmuls.
    # The 1/sqrt(128) scales on q and v and the softmax 1/denom are folded into
    # a single per-head scalar applied to the 1-vreg `qk` (exact: the chain is
    # linear in q, v and the scalar).
    inv_dproj = 1.0 / float(D_PROJ)               # = 1/sqrt(128) * 1/sqrt(128)
    ov_heads = []
    for h in range(NUM_HEADS):
        sl = slice(h * D_PROJ, (h + 1) * D_PROJ)
        k_h = k_all[:, sl]                        # (128, 128)
        e = jnp.exp(k_h - jnp.max(k_h))
        denom = jnp.sum(e, axis=(0, 1), keepdims=True)          # (1, 1)
        scale_h = inv_dproj / denom                              # exact divide, (1,1)

        qk = jnp.dot(q_all[:, sl], e, preferred_element_type=jnp.float32)     # (Nq, 128)
        qk = qk * scale_h
        ov_heads.append(
            jnp.dot(qk, v_all[:, sl], preferred_element_type=jnp.float32)     # (Nq, 128)
        )

    ov = jnp.concatenate(ov_heads, axis=-1)                      # (Nq, 1024)

    # Fused per-head output projection + head sum: one (Nq,1024)@(1024,32) matmul.
    acc = jnp.dot(ov, wo_ref[...], preferred_element_type=jnp.float32) + bo_ref[...]

    # LayerNorm(32)
    mean = jnp.mean(acc, axis=-1, keepdims=True)
    var = jnp.mean((acc - mean) ** 2, axis=-1, keepdims=True)
    norm = (acc - mean) * jax.lax.rsqrt(var + LN_EPS)
    out_ref[...] = (norm * lnw_ref[...] + lnb_ref[...]).astype(out_ref.dtype)


def model_forward(params, x1, x2, x3, x4=None, x5=None, x6=None):
    nq = x1.shape[0]
    # Guard: the q@k@v chain requires the projected K rows (= x2/x3 rows) to be
    # D_PROJ, otherwise (q@k) @ v is shape-invalid (same constraint as torch).
    assert x2.shape == (D_PROJ, D_KV_IN) and x3.shape == (D_PROJ, D_KV_IN), (
        "x2/x3 must be (128, 64) for the q@k@v chain to be well-formed"
    )

    # Fuse the head axis into the weights and pre-transpose to lane-dense
    # contraction-dim-first layout (done once, outside the kernel).
    wq_t = params["wq"].reshape(NUM_HEADS * D_PROJ, D_Q_IN).T          # (32, 1024)
    bq_all = params["bq"].reshape(1, NUM_HEADS * D_PROJ)               # (1, 1024)
    wk_t = params["wk"].reshape(NUM_HEADS * D_PROJ, D_KV_IN).T         # (64, 1024)
    bk_all = params["bk"].reshape(1, NUM_HEADS * D_PROJ)
    wv_t = params["wv"].reshape(NUM_HEADS * D_PROJ, D_KV_IN).T         # (64, 1024)
    bv_all = params["bv"].reshape(1, NUM_HEADS * D_PROJ)
    # wo_all[h*128 + d, j] = wo[h, j, d]  so  ov_flat @ wo_all == sum_h ov_h @ wo_h^T
    wo_all = params["wo"].transpose(0, 2, 1).reshape(NUM_HEADS * D_PROJ, D_OUT)
    bo_sum = params["bo"].sum(axis=0).reshape(1, D_OUT)
    lnw2 = params["ln_w"].reshape(1, D_OUT)
    lnb2 = params["ln_b"].reshape(1, D_OUT)

    vmem = pl.BlockSpec(memory_space=pltpu.MemorySpace.VMEM)

    return pl.pallas_call(
        _mha_kernel,
        out_shape=jax.ShapeDtypeStruct((nq, D_OUT), jnp.float32),
        in_specs=[vmem] * 13,
        out_specs=vmem,
    )(x1, x2, x3, wq_t, bq_all, wk_t, bk_all, wv_t, bv_all,
      wo_all, bo_sum, lnw2, lnb2)


def reference_forward(params, x1, x2, x3):
    # Pure-JAX reference mirroring the torch semantics.
    acc = jnp.zeros((x1.shape[0], D_OUT), jnp.float32)
    for h in range(NUM_HEADS):
        q = (x1 @ params["wq"][h].T + params["bq"][h]) / math.sqrt(D_PROJ)
        kraw = x3 @ params["wk"][h].T + params["bk"][h]
        k = jnp.exp(kraw - jnp.max(kraw))
        k = k / jnp.sum(k)
        v = (x2 @ params["wv"][h].T + params["bv"][h]) / math.sqrt(D_PROJ)
        out = (q @ k) @ v
        acc = acc + (out @ params["wo"][h].T + params["bo"][h])
    mean = jnp.mean(acc, -1, keepdims=True)
    var = jnp.mean((acc - mean) ** 2, -1, keepdims=True)
    return (acc - mean) / jnp.sqrt(var + LN_EPS) * params["ln_w"] + params["ln_b"]


def init_params(key):
    keys = jax.random.split(key, 8)
    return {
        "wq": jax.random.normal(keys[0], (NUM_HEADS, D_PROJ, D_Q_IN), jnp.float32) * 0.05,
        "bq": jax.random.normal(keys[1], (NUM_HEADS, D_PROJ), jnp.float32) * 0.02,
        "wk": jax.random.normal(keys[2], (NUM_HEADS, D_PROJ, D_KV_IN), jnp.float32) * 0.05,
        "bk": jax.random.normal(keys[3], (NUM_HEADS, D_PROJ), jnp.float32) * 0.02,
        "wv": jax.random.normal(keys[4], (NUM_HEADS, D_PROJ, D_KV_IN), jnp.float32) * 0.05,
        "bv": jax.random.normal(keys[5], (NUM_HEADS, D_PROJ), jnp.float32) * 0.02,
        "wo": jax.random.normal(keys[6], (NUM_HEADS, D_OUT, D_PROJ), jnp.float32) * 0.05,
        "bo": jax.random.normal(keys[7], (NUM_HEADS, D_OUT), jnp.float32) * 0.02,
        "ln_w": jnp.ones((D_OUT,), jnp.float32),
        "ln_b": jnp.zeros((D_OUT,), jnp.float32),
    }


if __name__ == "__main__":
    key = jax.random.PRNGKey(0)
    kp, k1, k2, k3 = jax.random.split(key, 4)
    params = init_params(kp)

    NQ = 8  # query rows; x2/x3 first dim must be 128 for q@k@v to be well-formed
    x1 = jax.random.normal(k1, (NQ, D_Q_IN), jnp.float32)
    x2 = jax.random.normal(k2, (D_PROJ, D_KV_IN), jnp.float32)
    x3 = jax.random.normal(k3, (D_PROJ, D_KV_IN), jnp.float32)
    x4 = x5 = x6 = jnp.zeros((1,), jnp.float32)  # unused by the torch forward

    out = model_forward(params, x1, x2, x3, x4, x5, x6)
    out = jax.block_until_ready(out)

    ref = reference_forward(params, x1, x2, x3)
    assert out.shape == (NQ, D_OUT)
    # Exact reciprocal + exact scalar folding: tight tolerance again (only
    # f32 summation-order differences remain).
    assert jnp.allclose(out, ref, rtol=1e-4, atol=1e-5), (
        f"max abs err {float(jnp.max(jnp.abs(out - ref)))}"
    )
    print("KERNEL_OK")
</pallas_src>

<mosaic_0001>
module attributes {stable_mosaic.version = 11 : i64} {
  func.func @_mha_kernel(%arg0: memref<8x32xf32, #tpu.memory_space<vmem>>, %arg1: memref<128x64xf32, #tpu.memory_space<vmem>>, %arg2: memref<128x64xf32, #tpu.memory_space<vmem>>, %arg3: memref<32x1024xf32, #tpu.memory_space<vmem>>, %arg4: memref<1x1024xf32, #tpu.memory_space<vmem>>, %arg5: memref<64x1024xf32, #tpu.memory_space<vmem>>, %arg6: memref<1x1024xf32, #tpu.memory_space<vmem>>, %arg7: memref<64x1024xf32, #tpu.memory_space<vmem>>, %arg8: memref<1x1024xf32, #tpu.memory_space<vmem>>, %arg9: memref<1024x32xf32, #tpu.memory_space<vmem>>, %arg10: memref<1x32xf32, #tpu.memory_space<vmem>>, %arg11: memref<1x32xf32, #tpu.memory_space<vmem>>, %arg12: memref<1x32xf32, #tpu.memory_space<vmem>>, %arg13: memref<8x32xf32, #tpu.memory_space<vmem>>) attributes {dimension_semantics = [], scalar_prefetch = 0 : i64, scratch_operands = 0 : i64, tpu.core_type = #tpu.core_type<tc>} {
    %c0 = arith.constant 0 : index
    %c0_0 = arith.constant 0 : index
    %0 = vector.load %arg0[%c0, %c0_0] : memref<8x32xf32, #tpu.memory_space<vmem>>, vector<8x32xf32>
    %c0_1 = arith.constant 0 : index
    %c0_2 = arith.constant 0 : index
    %1 = vector.load %arg1[%c0_1, %c0_2] : memref<128x64xf32, #tpu.memory_space<vmem>>, vector<128x64xf32>
    %c0_3 = arith.constant 0 : index
    %c0_4 = arith.constant 0 : index
    %2 = vector.load %arg2[%c0_3, %c0_4] : memref<128x64xf32, #tpu.memory_space<vmem>>, vector<128x64xf32>
    %c0_5 = arith.constant 0 : index
    %c0_6 = arith.constant 0 : index
    %3 = vector.load %arg3[%c0_5, %c0_6] : memref<32x1024xf32, #tpu.memory_space<vmem>>, vector<32x1024xf32>
    %cst = arith.constant dense<0.000000e+00> : vector<8x1024xf32>
    %4 = tpu.matmul %0, %3, %cst {dimension_numbers = #tpu.dot_dimension_numbers<[1], [0], [0], [1], [0, 0, 1, 1], [], []>} : vector<8x32xf32>, vector<32x1024xf32>, vector<8x1024xf32> -> vector<8x1024xf32>
    %c0_7 = arith.constant 0 : index
    %c0_8 = arith.constant 0 : index
    %5 = vector.load %arg4[%c0_7, %c0_8] : memref<1x1024xf32, #tpu.memory_space<vmem>>, vector<1x1024xf32>
    %6 = vector.broadcast %5 : vector<1x1024xf32> to vector<8x1024xf32>
    %7 = arith.addf %4, %6 : vector<8x1024xf32>
    %c0_9 = arith.constant 0 : index
    %c0_10 = arith.constant 0 : index
    %8 = vector.load %arg5[%c0_9, %c0_10] : memref<64x1024xf32, #tpu.memory_space<vmem>>, vector<64x1024xf32>
    %cst_11 = arith.constant dense<0.000000e+00> : vector<128x1024xf32>
    %9 = tpu.matmul %2, %8, %cst_11 {dimension_numbers = #tpu.dot_dimension_numbers<[1], [0], [0], [1], [0, 0, 1, 1], [], []>} : vector<128x64xf32>, vector<64x1024xf32>, vector<128x1024xf32> -> vector<128x1024xf32>
    %c0_12 = arith.constant 0 : index
    %c0_13 = arith.constant 0 : index
    %10 = vector.load %arg6[%c0_12, %c0_13] : memref<1x1024xf32, #tpu.memory_space<vmem>>, vector<1x1024xf32>
    %11 = vector.broadcast %10 : vector<1x1024xf32> to vector<128x1024xf32>
    %12 = arith.addf %9, %11 : vector<128x1024xf32>
    %c0_14 = arith.constant 0 : index
    %c0_15 = arith.constant 0 : index
    %13 = vector.load %arg7[%c0_14, %c0_15] : memref<64x1024xf32, #tpu.memory_space<vmem>>, vector<64x1024xf32>
    %cst_16 = arith.constant dense<0.000000e+00> : vector<128x1024xf32>
    %14 = tpu.matmul %1, %13, %cst_16 {dimension_numbers = #tpu.dot_dimension_numbers<[1], [0], [0], [1], [0, 0, 1, 1], [], []>} : vector<128x64xf32>, vector<64x1024xf32>, vector<128x1024xf32> -> vector<128x1024xf32>
    %c0_17 = arith.constant 0 : index
    %c0_18 = arith.constant 0 : index
    %15 = vector.load %arg8[%c0_17, %c0_18] : memref<1x1024xf32, #tpu.memory_space<vmem>>, vector<1x1024xf32>
    %16 = vector.broadcast %15 : vector<1x1024xf32> to vector<128x1024xf32>
    %17 = arith.addf %14, %16 : vector<128x1024xf32>
    %18 = vector.extract_strided_slice %12 {offsets = [0, 0], sizes = [128, 128], strides = [1, 1]} : vector<128x1024xf32> to vector<128x128xf32>
    %19 = vector.shape_cast %18 : vector<128x128xf32> to vector<1x128x128xf32>
    %cst_19 = arith.constant dense<0xFF800000> : vector<1xf32>
    %20 = vector.multi_reduction <maximumf>, %19, %cst_19 [1, 2] : vector<1x128x128xf32> to vector<1xf32>
    %21 = vector.shape_cast %20 : vector<1xf32> to vector<1x1x1xf32>
    %22 = vector.extract %21[0, 0, 0] : f32 from vector<1x1x1xf32>
    %23 = vector.broadcast %22 : f32 to vector<128x128xf32>
    %24 = arith.subf %18, %23 : vector<128x128xf32>
    %25 = math.exp %24 : vector<128x128xf32>
    %26 = vector.shape_cast %25 : vector<128x128xf32> to vector<1x128x128xf32>
    %cst_20 = arith.constant dense<0.000000e+00> : vector<1xf32>
    %27 = vector.multi_reduction <add>, %26, %cst_20 [1, 2] : vector<1x128x128xf32> to vector<1xf32>
    %28 = vector.shape_cast %27 : vector<1xf32> to vector<1x1x1xf32>
    %29 = vector.extract %28[0, 0, 0] : f32 from vector<1x1x1xf32>
    %30 = vector.broadcast %29 : f32 to vector<1x1xf32>
    %cst_21 = arith.constant 7.812500e-03 : f32
    %31 = vector.broadcast %cst_21 : f32 to vector<1x1xf32>
    %32 = arith.divf %31, %30 : vector<1x1xf32>
    %33 = vector.extract_strided_slice %7 {offsets = [0, 0], sizes = [8, 128], strides = [1, 1]} : vector<8x1024xf32> to vector<8x128xf32>
    %cst_22 = arith.constant dense<0.000000e+00> : vector<8x128xf32>
    %34 = tpu.matmul %33, %25, %cst_22 {dimension_numbers = #tpu.dot_dimension_numbers<[1], [0], [0], [1], [0, 0, 1, 1], [], []>} : vector<8x128xf32>, vector<128x128xf32>, vector<8x128xf32> -> vector<8x128xf32>
    %35 = vector.broadcast %32 : vector<1x1xf32> to vector<8x128xf32>
    %36 = arith.mulf %34, %35 : vector<8x128xf32>
    %37 = vector.extract_strided_slice %17 {offsets = [0, 0], sizes = [128, 128], strides = [1, 1]} : vector<128x1024xf32> to vector<128x128xf32>
    %cst_23 = arith.constant dense<0.000000e+00> : vector<8x128xf32>
    %38 = tpu.matmul %36, %37, %cst_23 {dimension_numbers = #tpu.dot_dimension_numbers<[1], [0], [0], [1], [0, 0, 1, 1], [], []>} : vector<8x128xf32>, vector<128x128xf32>, vector<8x128xf32> -> vector<8x128xf32>
    %39 = vector.extract_strided_slice %12 {offsets = [0, 128], sizes = [128, 128], strides = [1, 1]} : vector<128x1024xf32> to vector<128x128xf32>
    %40 = vector.shape_cast %39 : vector<128x128xf32> to vector<1x128x128xf32>
    %cst_24 = arith.constant dense<0xFF800000> : vector<1xf32>
    %41 = vector.multi_reduction <maximumf>, %40, %cst_24 [1, 2] : vector<1x128x128xf32> to vector<1xf32>
    %42 = vector.shape_cast %41 : vector<1xf32> to vector<1x1x1xf32>
    %43 = vector.extract %42[0, 0, 0] : f32 from vector<1x1x1xf32>
    %44 = vector.broadcast %43 : f32 to vector<128x128xf32>
    %45 = arith.subf %39, %44 : vector<128x128xf32>
    %46 = math.exp %45 : vector<128x128xf32>
    %47 = vector.shape_cast %46 : vector<128x128xf32> to vector<1x128x128xf32>
    %cst_25 = arith.constant dense<0.000000e+00> : vector<1xf32>
    %48 = vector.multi_reduction <add>, %47, %cst_25 [1, 2] : vector<1x128x128xf32> to vector<1xf32>
    %49 = vector.shape_cast %48 : vector<1xf32> to vector<1x1x1xf32>
    %50 = vector.extract %49[0, 0, 0] : f32 from vector<1x1x1xf32>
    %51 = vector.broadcast %50 : f32 to vector<1x1xf32>
    %cst_26 = arith.constant 7.812500e-03 : f32
    %52 = vector.broadcast %cst_26 : f32 to vector<1x1xf32>
    %53 = arith.divf %52, %51 : vector<1x1xf32>
    %54 = vector.extract_strided_slice %7 {offsets = [0, 128], sizes = [8, 128], strides = [1, 1]} : vector<8x1024xf32> to vector<8x128xf32>
    %cst_27 = arith.constant dense<0.000000e+00> : vector<8x128xf32>
    %55 = tpu.matmul %54, %46, %cst_27 {dimension_numbers = #tpu.dot_dimension_numbers<[1], [0], [0], [1], [0, 0, 1, 1], [], []>} : vector<8x128xf32>, vector<128x128xf32>, vector<8x128xf32> -> vector<8x128xf32>
    %56 = vector.broadcast %53 : vector<1x1xf32> to vector<8x128xf32>
    %57 = arith.mulf %55, %56 : vector<8x128xf32>
    %58 = vector.extract_strided_slice %17 {offsets = [0, 128], sizes = [128, 128], strides = [1, 1]} : vector<128x1024xf32> to vector<128x128xf32>
    %cst_28 = arith.constant dense<0.000000e+00> : vector<8x128xf32>
    %59 = tpu.matmul %57, %58, %cst_28 {dimension_numbers = #tpu.dot_dimension_numbers<[1], [0], [0], [1], [0, 0, 1, 1], [], []>} : vector<8x128xf32>, vector<128x128xf32>, vector<8x128xf32> -> vector<8x128xf32>
    %60 = vector.extract_strided_slice %12 {offsets = [0, 256], sizes = [128, 128], strides = [1, 1]} : vector<128x1024xf32> to vector<128x128xf32>
    %61 = vector.shape_cast %60 : vector<128x128xf32> to vector<1x128x128xf32>
    %cst_29 = arith.constant dense<0xFF800000> : vector<1xf32>
    %62 = vector.multi_reduction <maximumf>, %61, %cst_29 [1, 2] : vector<1x128x128xf32> to vector<1xf32>
    %63 = vector.shape_cast %62 : vector<1xf32> to vector<1x1x1xf32>
    %64 = vector.extract %63[0, 0, 0] : f32 from vector<1x1x1xf32>
    %65 = vector.broadcast %64 : f32 to vector<128x128xf32>
    %66 = arith.subf %60, %65 : vector<128x128xf32>
    %67 = math.exp %66 : vector<128x128xf32>
    %68 = vector.shape_cast %67 : vector<128x128xf32> to vector<1x128x128xf32>
    %cst_30 = arith.constant dense<0.000000e+00> : vector<1xf32>
    %69 = vector.multi_reduction <add>, %68, %cst_30 [1, 2] : vector<1x128x128xf32> to vector<1xf32>
    %70 = vector.shape_cast %69 : vector<1xf32> to vector<1x1x1xf32>
    %71 = vector.extract %70[0, 0, 0] : f32 from vector<1x1x1xf32>
    %72 = vector.broadcast %71 : f32 to vector<1x1xf32>
    %cst_31 = arith.constant 7.812500e-03 : f32
    %73 = vector.broadcast %cst_31 : f32 to vector<1x1xf32>
    %74 = arith.divf %73, %72 : vector<1x1xf32>
    %75 = vector.extract_strided_slice %7 {offsets = [0, 256], sizes = [8, 128], strides = [1, 1]} : vector<8x1024xf32> to vector<8x128xf32>
    %cst_32 = arith.constant dense<0.000000e+00> : vector<8x128xf32>
    %76 = tpu.matmul %75, %67, %cst_32 {dimension_numbers = #tpu.dot_dimension_numbers<[1], [0], [0], [1], [0, 0, 1, 1], [], []>} : vector<8x128xf32>, vector<128x128xf32>, vector<8x128xf32> -> vector<8x128xf32>
    %77 = vector.broadcast %74 : vector<1x1xf32> to vector<8x128xf32>
    %78 = arith.mulf %76, %77 : vector<8x128xf32>
    %79 = vector.extract_strided_slice %17 {offsets = [0, 256], sizes = [128, 128], strides = [1, 1]} : vector<128x1024xf32> to vector<128x128xf32>
    %cst_33 = arith.constant dense<0.000000e+00> : vector<8x128xf32>
    %80 = tpu.matmul %78, %79, %cst_33 {dimension_numbers = #tpu.dot_dimension_numbers<[1], [0], [0], [1], [0, 0, 1, 1], [], []>} : vector<8x128xf32>, vector<128x128xf32>, vector<8x128xf32> -> vector<8x128xf32>
    %81 = vector.extract_strided_slice %12 {offsets = [0, 384], sizes = [128, 128], strides = [1, 1]} : vector<128x1024xf32> to vector<128x128xf32>
    %82 = vector.shape_cast %81 : vector<128x128xf32> to vector<1x128x128xf32>
    %cst_34 = arith.constant dense<0xFF800000> : vector<1xf32>
    %83 = vector.multi_reduction <maximumf>, %82, %cst_34 [1, 2] : vector<1x128x128xf32> to vector<1xf32>
    %84 = vector.shape_cast %83 : vector<1xf32> to vector<1x1x1xf32>
    %85 = vector.extract %84[0, 0, 0] : f32 from vector<1x1x1xf32>
    %86 = vector.broadcast %85 : f32 to vector<128x128xf32>
    %87 = arith.subf %81, %86 : vector<128x128xf32>
    %88 = math.exp %87 : vector<128x128xf32>
    %89 = vector.shape_cast %88 : vector<128x128xf32> to vector<1x128x128xf32>
    %cst_35 = arith.constant dense<0.000000e+00> : vector<1xf32>
    %90 = vector.multi_reduction <add>, %89, %cst_35 [1, 2] : vector<1x128x128xf32> to vector<1xf32>
    %91 = vector.shape_cast %90 : vector<1xf32> to vector<1x1x1xf32>
    %92 = vector.extract %91[0, 0, 0] : f32 from vector<1x1x1xf32>
    %93 = vector.broadcast %92 : f32 to vector<1x1xf32>
    %cst_36 = arith.constant 7.812500e-03 : f32
    %94 = vector.broadcast %cst_36 : f32 to vector<1x1xf32>
    %95 = arith.divf %94, %93 : vector<1x1xf32>
    %96 = vector.extract_strided_slice %7 {offsets = [0, 384], sizes = [8, 128], strides = [1, 1]} : vector<8x1024xf32> to vector<8x128xf32>
    %cst_37 = arith.constant dense<0.000000e+00> : vector<8x128xf32>
    %97 = tpu.matmul %96, %88, %cst_37 {dimension_numbers = #tpu.dot_dimension_numbers<[1], [0], [0], [1], [0, 0, 1, 1], [], []>} : vector<8x128xf32>, vector<128x128xf32>, vector<8x128xf32> -> vector<8x128xf32>
    %98 = vector.broadcast %95 : vector<1x1xf32> to vector<8x128xf32>
    %99 = arith.mulf %97, %98 : vector<8x128xf32>
    %100 = vector.extract_strided_slice %17 {offsets = [0, 384], sizes = [128, 128], strides = [1, 1]} : vector<128x1024xf32> to vector<128x128xf32>
    %cst_38 = arith.constant dense<0.000000e+00> : vector<8x128xf32>
    %101 = tpu.matmul %99, %100, %cst_38 {dimension_numbers = #tpu.dot_dimension_numbers<[1], [0], [0], [1], [0, 0, 1, 1], [], []>} : vector<8x128xf32>, vector<128x128xf32>, vector<8x128xf32> -> vector<8x128xf32>
    %102 = vector.extract_strided_slice %12 {offsets = [0, 512], sizes = [128, 128], strides = [1, 1]} : vector<128x1024xf32> to vector<128x128xf32>
    %103 = vector.shape_cast %102 : vector<128x128xf32> to vector<1x128x128xf32>
    %cst_39 = arith.constant dense<0xFF800000> : vector<1xf32>
    %104 = vector.multi_reduction <maximumf>, %103, %cst_39 [1, 2] : vector<1x128x128xf32> to vector<1xf32>
    %105 = vector.shape_cast %104 : vector<1xf32> to vector<1x1x1xf32>
    %106 = vector.extract %105[0, 0, 0] : f32 from vector<1x1x1xf32>
    %107 = vector.broadcast %106 : f32 to vector<128x128xf32>
    %108 = arith.subf %102, %107 : vector<128x128xf32>
    %109 = math.exp %108 : vector<128x128xf32>
    %110 = vector.shape_cast %109 : vector<128x128xf32> to vector<1x128x128xf32>
    %cst_40 = arith.constant dense<0.000000e+00> : vector<1xf32>
    %111 = vector.multi_reduction <add>, %110, %cst_40 [1, 2] : vector<1x128x128xf32> to vector<1xf32>
    %112 = vector.shape_cast %111 : vector<1xf32> to vector<1x1x1xf32>
    %113 = vector.extract %112[0, 0, 0] : f32 from vector<1x1x1xf32>
    %114 = vector.broadcast %113 : f32 to vector<1x1xf32>
    %cst_41 = arith.constant 7.812500e-03 : f32
    %115 = vector.broadcast %cst_41 : f32 to vector<1x1xf32>
    %116 = arith.divf %115, %114 : vector<1x1xf32>
    %117 = vector.extract_strided_slice %7 {offsets = [0, 512], sizes = [8, 128], strides = [1, 1]} : vector<8x1024xf32> to vector<8x128xf32>
    %cst_42 = arith.constant dense<0.000000e+00> : vector<8x128xf32>
    %118 = tpu.matmul %117, %109, %cst_42 {dimension_numbers = #tpu.dot_dimension_numbers<[1], [0], [0], [1], [0, 0, 1, 1], [], []>} : vector<8x128xf32>, vector<128x128xf32>, vector<8x128xf32> -> vector<8x128xf32>
    %119 = vector.broadcast %116 : vector<1x1xf32> to vector<8x128xf32>
    %120 = arith.mulf %118, %119 : vector<8x128xf32>
    %121 = vector.extract_strided_slice %17 {offsets = [0, 512], sizes = [128, 128], strides = [1, 1]} : vector<128x1024xf32> to vector<128x128xf32>
    %cst_43 = arith.constant dense<0.000000e+00> : vector<8x128xf32>
    %122 = tpu.matmul %120, %121, %cst_43 {dimension_numbers = #tpu.dot_dimension_numbers<[1], [0], [0], [1], [0, 0, 1, 1], [], []>} : vector<8x128xf32>, vector<128x128xf32>, vector<8x128xf32> -> vector<8x128xf32>
    %123 = vector.extract_strided_slice %12 {offsets = [0, 640], sizes = [128, 128], strides = [1, 1]} : vector<128x1024xf32> to vector<128x128xf32>
    %124 = vector.shape_cast %123 : vector<128x128xf32> to vector<1x128x128xf32>
    %cst_44 = arith.constant dense<0xFF800000> : vector<1xf32>
    %125 = vector.multi_reduction <maximumf>, %124, %cst_44 [1, 2] : vector<1x128x128xf32> to vector<1xf32>
    %126 = vector.shape_cast %125 : vector<1xf32> to vector<1x1x1xf32>
    %127 = vector.extract %126[0, 0, 0] : f32 from vector<1x1x1xf32>
    %128 = vector.broadcast %127 : f32 to vector<128x128xf32>
    %129 = arith.subf %123, %128 : vector<128x128xf32>
    %130 = math.exp %129 : vector<128x128xf32>
    %131 = vector.shape_cast %130 : vector<128x128xf32> to vector<1x128x128xf32>
    %cst_45 = arith.constant dense<0.000000e+00> : vector<1xf32>
    %132 = vector.multi_reduction <add>, %131, %cst_45 [1, 2] : vector<1x128x128xf32> to vector<1xf32>
    %133 = vector.shape_cast %132 : vector<1xf32> to vector<1x1x1xf32>
    %134 = vector.extract %133[0, 0, 0] : f32 from vector<1x1x1xf32>
    %135 = vector.broadcast %134 : f32 to vector<1x1xf32>
    %cst_46 = arith.constant 7.812500e-03 : f32
    %136 = vector.broadcast %cst_46 : f32 to vector<1x1xf32>
    %137 = arith.divf %136, %135 : vector<1x1xf32>
    %138 = vector.extract_strided_slice %7 {offsets = [0, 640], sizes = [8, 128], strides = [1, 1]} : vector<8x1024xf32> to vector<8x128xf32>
    %cst_47 = arith.constant dense<0.000000e+00> : vector<8x128xf32>
    %139 = tpu.matmul %138, %130, %cst_47 {dimension_numbers = #tpu.dot_dimension_numbers<[1], [0], [0], [1], [0, 0, 1, 1], [], []>} : vector<8x128xf32>, vector<128x128xf32>, vector<8x128xf32> -> vector<8x128xf32>
    %140 = vector.broadcast %137 : vector<1x1xf32> to vector<8x128xf32>
    %141 = arith.mulf %139, %140 : vector<8x128xf32>
    %142 = vector.extract_strided_slice %17 {offsets = [0, 640], sizes = [128, 128], strides = [1, 1]} : vector<128x1024xf32> to vector<128x128xf32>
    %cst_48 = arith.constant dense<0.000000e+00> : vector<8x128xf32>
    %143 = tpu.matmul %141, %142, %cst_48 {dimension_numbers = #tpu.dot_dimension_numbers<[1], [0], [0], [1], [0, 0, 1, 1], [], []>} : vector<8x128xf32>, vector<128x128xf32>, vector<8x128xf32> -> vector<8x128xf32>
    %144 = vector.extract_strided_slice %12 {offsets = [0, 768], sizes = [128, 128], strides = [1, 1]} : vector<128x1024xf32> to vector<128x128xf32>
    %145 = vector.shape_cast %144 : vector<128x128xf32> to vector<1x128x128xf32>
    %cst_49 = arith.constant dense<0xFF800000> : vector<1xf32>
    %146 = vector.multi_reduction <maximumf>, %145, %cst_49 [1, 2] : vector<1x128x128xf32> to vector<1xf32>
    %147 = vector.shape_cast %146 : vector<1xf32> to vector<1x1x1xf32>
    %148 = vector.extract %147[0, 0, 0] : f32 from vector<1x1x1xf32>
    %149 = vector.broadcast %148 : f32 to vector<128x128xf32>
    %150 = arith.subf %144, %149 : vector<128x128xf32>
    %151 = math.exp %150 : vector<128x128xf32>
    %152 = vector.shape_cast %151 : vector<128x128xf32> to vector<1x128x128xf32>
    %cst_50 = arith.constant dense<0.000000e+00> : vector<1xf32>
    %153 = vector.multi_reduction <add>, %152, %cst_50 [1, 2] : vector<1x128x128xf32> to vector<1xf32>
    %154 = vector.shape_cast %153 : vector<1xf32> to vector<1x1x1xf32>
    %155 = vector.extract %154[0, 0, 0] : f32 from vector<1x1x1xf32>
    %156 = vector.broadcast %155 : f32 to vector<1x1xf32>
    %cst_51 = arith.constant 7.812500e-03 : f32
    %157 = vector.broadcast %cst_51 : f32 to vector<1x1xf32>
    %158 = arith.divf %157, %156 : vector<1x1xf32>
    %159 = vector.extract_strided_slice %7 {offsets = [0, 768], sizes = [8, 128], strides = [1, 1]} : vector<8x1024xf32> to vector<8x128xf32>
    %cst_52 = arith.constant dense<0.000000e+00> : vector<8x128xf32>
    %160 = tpu.matmul %159, %151, %cst_52 {dimension_numbers = #tpu.dot_dimension_numbers<[1], [0], [0], [1], [0, 0, 1, 1], [], []>} : vector<8x128xf32>, vector<128x128xf32>, vector<8x128xf32> -> vector<8x128xf32>
    %161 = vector.broadcast %158 : vector<1x1xf32> to vector<8x128xf32>
    %162 = arith.mulf %160, %161 : vector<8x128xf32>
    %163 = vector.extract_strided_slice %17 {offsets = [0, 768], sizes = [128, 128], strides = [1, 1]} : vector<128x1024xf32> to vector<128x128xf32>
    %cst_53 = arith.constant dense<0.000000e+00> : vector<8x128xf32>
    %164 = tpu.matmul %162, %163, %cst_53 {dimension_numbers = #tpu.dot_dimension_numbers<[1], [0], [0], [1], [0, 0, 1, 1], [], []>} : vector<8x128xf32>, vector<128x128xf32>, vector<8x128xf32> -> vector<8x128xf32>
    %165 = vector.extract_strided_slice %12 {offsets = [0, 896], sizes = [128, 128], strides = [1, 1]} : vector<128x1024xf32> to vector<128x128xf32>
    %166 = vector.shape_cast %165 : vector<128x128xf32> to vector<1x128x128xf32>
    %cst_54 = arith.constant dense<0xFF800000> : vector<1xf32>
    %167 = vector.multi_reduction <maximumf>, %166, %cst_54 [1, 2] : vector<1x128x128xf32> to vector<1xf32>
    %168 = vector.shape_cast %167 : vector<1xf32> to vector<1x1x1xf32>
    %169 = vector.extract %168[0, 0, 0] : f32 from vector<1x1x1xf32>
    %170 = vector.broadcast %169 : f32 to vector<128x128xf32>
    %171 = arith.subf %165, %170 : vector<128x128xf32>
    %172 = math.exp %171 : vector<128x128xf32>
    %173 = vector.shape_cast %172 : vector<128x128xf32> to vector<1x128x128xf32>
    %cst_55 = arith.constant dense<0.000000e+00> : vector<1xf32>
    %174 = vector.multi_reduction <add>, %173, %cst_55 [1, 2] : vector<1x128x128xf32> to vector<1xf32>
    %175 = vector.shape_cast %174 : vector<1xf32> to vector<1x1x1xf32>
    %176 = vector.extract %175[0, 0, 0] : f32 from vector<1x1x1xf32>
    %177 = vector.broadcast %176 : f32 to vector<1x1xf32>
    %cst_56 = arith.constant 7.812500e-03 : f32
    %178 = vector.broadcast %cst_56 : f32 to vector<1x1xf32>
    %179 = arith.divf %178, %177 : vector<1x1xf32>
    %180 = vector.extract_strided_slice %7 {offsets = [0, 896], sizes = [8, 128], strides = [1, 1]} : vector<8x1024xf32> to vector<8x128xf32>
    %cst_57 = arith.constant dense<0.000000e+00> : vector<8x128xf32>
    %181 = tpu.matmul %180, %172, %cst_57 {dimension_numbers = #tpu.dot_dimension_numbers<[1], [0], [0], [1], [0, 0, 1, 1], [], []>} : vector<8x128xf32>, vector<128x128xf32>, vector<8x128xf32> -> vector<8x128xf32>
    %182 = vector.broadcast %179 : vector<1x1xf32> to vector<8x128xf32>
    %183 = arith.mulf %181, %182 : vector<8x128xf32>
    %184 = vector.extract_strided_slice %17 {offsets = [0, 896], sizes = [128, 128], strides = [1, 1]} : vector<128x1024xf32> to vector<128x128xf32>
    %cst_58 = arith.constant dense<0.000000e+00> : vector<8x128xf32>
    %185 = tpu.matmul %183, %184, %cst_58 {dimension_numbers = #tpu.dot_dimension_numbers<[1], [0], [0], [1], [0, 0, 1, 1], [], []>} : vector<8x128xf32>, vector<128x128xf32>, vector<8x128xf32> -> vector<8x128xf32>
    %186 = tpu.concatenate %38, %59, %80, %101, %122, %143, %164, %185 in 1 : vector<8x128xf32>, vector<8x128xf32>, vector<8x128xf32>, vector<8x128xf32>, vector<8x128xf32>, vector<8x128xf32>, vector<8x128xf32>, vector<8x128xf32> -> vector<8x1024xf32>
    %c0_59 = arith.constant 0 : index
    %c0_60 = arith.constant 0 : index
    %187 = vector.load %arg9[%c0_59, %c0_60] : memref<1024x32xf32, #tpu.memory_space<vmem>>, vector<1024x32xf32>
    %cst_61 = arith.constant dense<0.000000e+00> : vector<8x32xf32>
    %188 = tpu.matmul %186, %187, %cst_61 {dimension_numbers = #tpu.dot_dimension_numbers<[1], [0], [0], [1], [0, 0, 1, 1], [], []>} : vector<8x1024xf32>, vector<1024x32xf32>, vector<8x32xf32> -> vector<8x32xf32>
    %c0_62 = arith.constant 0 : index
    %c0_63 = arith.constant 0 : index
    %189 = vector.load %arg10[%c0_62, %c0_63] : memref<1x32xf32, #tpu.memory_space<vmem>>, vector<1x32xf32>
    %190 = vector.broadcast %189 : vector<1x32xf32> to vector<8x32xf32>
    %191 = arith.addf %188, %190 : vector<8x32xf32>
    %cst_64 = arith.constant dense<0.000000e+00> : vector<8xf32>
    %192 = vector.multi_reduction <add>, %191, %cst_64 [1] : vector<8x32xf32> to vector<8xf32>
    %193 = vector.shape_cast %192 : vector<8xf32> to vector<8x1xf32>
    %cst_65 = arith.constant 3.200000e+01 : f32
    %194 = vector.broadcast %cst_65 : f32 to vector<8x1xf32>
    %195 = arith.divf %193, %194 : vector<8x1xf32>
    %196 = vector.broadcast %195 : vector<8x1xf32> to vector<8x32xf32>
    %197 = arith.subf %191, %196 : vector<8x32xf32>
    %198 = arith.mulf %197, %197 : vector<8x32xf32>
    %cst_66 = arith.constant dense<0.000000e+00> : vector<8xf32>
    %199 = vector.multi_reduction <add>, %198, %cst_66 [1] : vector<8x32xf32> to vector<8xf32>
    %200 = vector.shape_cast %199 : vector<8xf32> to vector<8x1xf32>
    %cst_67 = arith.constant 3.200000e+01 : f32
    %201 = vector.broadcast %cst_67 : f32 to vector<8x1xf32>
    %202 = arith.divf %200, %201 : vector<8x1xf32>
    %203 = vector.broadcast %195 : vector<8x1xf32> to vector<8x32xf32>
    %204 = arith.subf %191, %203 : vector<8x32xf32>
    %cst_68 = arith.constant 9.99999974E-6 : f32
    %205 = vector.broadcast %cst_68 : f32 to vector<8x1xf32>
    %206 = arith.addf %202, %205 : vector<8x1xf32>
    %207 = math.rsqrt %206 : vector<8x1xf32>
    %208 = vector.broadcast %207 : vector<8x1xf32> to vector<8x32xf32>
    %209 = arith.mulf %204, %208 : vector<8x32xf32>
    %c0_69 = arith.constant 0 : index
    %c0_70 = arith.constant 0 : index
    %210 = vector.load %arg11[%c0_69, %c0_70] : memref<1x32xf32, #tpu.memory_space<vmem>>, vector<1x32xf32>
    %211 = vector.broadcast %210 : vector<1x32xf32> to vector<8x32xf32>
    %212 = arith.mulf %209, %211 : vector<8x32xf32>
    %c0_71 = arith.constant 0 : index
    %c0_72 = arith.constant 0 : index
    %213 = vector.load %arg12[%c0_71, %c0_72] : memref<1x32xf32, #tpu.memory_space<vmem>>, vector<1x32xf32>
    %214 = vector.broadcast %213 : vector<1x32xf32> to vector<8x32xf32>
    %215 = arith.addf %212, %214 : vector<8x32xf32>
    %c0_73 = arith.constant 0 : index
    %c0_74 = arith.constant 0 : index
    %216 = vector.load %arg13[%c0_73, %c0_74] : memref<8x32xf32, #tpu.memory_space<vmem>>, vector<8x32xf32>
    tpu.vector_store %arg13[%c0_73, %c0_74], %215 {strides = array<i32>} : memref<8x32xf32, #tpu.memory_space<vmem>>, vector<8x32xf32>,
    return
  }
}

</mosaic_0001>

<bundles_post_ra>
// kernel: tpu_custom_call.1
= control target key start
LH: loop header
LB: loop body
LE: loop exit
PB: predicated region body
PF: predicated region fallthrough
CT: control target
= control target key end

     0   :  { %v9577_v4 = vmov 0.0   ;;  %vm152_vm0 = vcmask 261120   ;;  %s9563_s0 = inlined_call_operand.vmem [shape: f32[8,32], index: 0, kind: input, shape index: {}]   ;;  %s9564_s1 = inlined_call_operand.vmem [shape: f32[128,64], index: 1, kind: input, shape index: {}]   ;;  %s9565_s2 = inlined_call_operand.vmem [shape: f32[128,64], index: 2, kind: input, shape index: {}]   ;;  %s9566_s3 = inlined_call_operand.vmem [shape: f32[32,1024], index: 3, kind: input, shape index: {}]   ;;  %s9567_s4 = inlined_call_operand.vmem [shape: f32[1,1024], index: 4, kind: input, shape index: {}]   ;;  %s9568_s5 = inlined_call_operand.vmem [shape: f32[64,1024], index: 5, kind: input, shape index: {}]   ;;  %s9569_s6 = inlined_call_operand.vmem [shape: f32[1,1024], index: 6, kind: input, shape index: {}]   ;;  %s9570_s7 = inlined_call_operand.vmem [shape: f32[64,1024], index: 7, kind: input, shape index: {}]   ;;  %s9571_s8 = inlined_call_operand.vmem [shape: f32[1,1024], index: 8, kind: input, shape index: {}]   ;;  %s9572_s9 = inlined_call_operand.vmem [shape: f32[1024,32], index: 9, kind: input, shape index: {}]   ;;  %s9573_s10 = inlined_call_operand.vmem [shape: f32[1,32], index: 10, kind: input, shape index: {}]   ;;  %s9574_s11 = inlined_call_operand.vmem [shape: f32[1,32], index: 11, kind: input, shape index: {}]   ;;  %s9575_s12 = inlined_call_operand.vmem [shape: f32[1,32], index: 12, kind: input, shape index: {}]   ;;  %s9576_s13 = inlined_call_operand.hbm [shape: f32[8,32], index: 13, kind: output, shape index: {}]  }
   0x1   :  { %v103_v0 = vld [vmem:[%s9566_s3 + $0xc8] sm:$0xff]  ;;  %v102_v1 = vld [vmem:[%s9566_s3 + $0xc0] sm:$0xff]  ;;  %220 = vmatprep.mubr.f32.mxu0 %v9577_v4  ;;  %291 = vmatprep.mubr.f32.mxu1 %v9577_v4 }
   0x2   :  { %v95_v2 = vld [vmem:[%s9566_s3 + $0x88] sm:$0xff]  ;;  %180 = vmatprep.subr.mxu0 %v103_v0  ;;  %v94_v3 = vld [vmem:[%s9566_s3 + $0x80] sm:$0xff] }
   0x3   :  { %181 = vmatpush1.msra.mxu0 %v102_v1  ;;  %v87_v5 = vld [vmem:[%s9566_s3 + $0x48] sm:$0xff]  ;;  %v86_v6 = vld [vmem:[%s9566_s3 + $0x40] sm:$0xff] }
   0x4   :  { %182 = vmatprep.subr.mxu0 %v95_v2  ;;  %v79_v7 = vld [vmem:[%s9566_s3 + $0x8] sm:$0xff]  ;;  %v78_v8 = vld [vmem:[%s9566_s3] sm:$0xff] }
   0x5   :  { %183 = vmatpush1.msra.mxu0 %v94_v3  ;;  %v6004_v9 = vld [vmem:[%s9563_s0] sm:$0xff]  ;;  %v107_v10 = vld [vmem:[%s9566_s3 + $0xe8] sm:$0xff] }
   0x6   :  { %184 = vmatprep.subr.mxu0 %v87_v5  ;;  %v106_v11 = vld [vmem:[%s9566_s3 + $0xe0] sm:$0xff]  ;;  %v99_v12 = vld [vmem:[%s9566_s3 + $0xa8] sm:$0xff] }
   0x7   :  { %185 = vmatpush1.msra.mxu0 %v86_v6  ;;  %v98_v13 = vld [vmem:[%s9566_s3 + $0xa0] sm:$0xff]  ;;  %v91_v14 = vld [vmem:[%s9566_s3 + $0x68] sm:$0xff] }
   0x8   :  { %186 = vmatprep.subr.mxu0 %v79_v7  ;;  %v90_v15 = vld [vmem:[%s9566_s3 + $0x60] sm:$0xff]  ;;  %v83_v16 = vld [vmem:[%s9566_s3 + $0x28] sm:$0xff] }
   0x9   :  { %187 = vmatpush1.msra.mxu0 %v78_v8  ;;  %v82_v17 = vld [vmem:[%s9566_s3 + $0x20] sm:$0xff]  ;;  %v497_v18 = vld [vmem:[%s9568_s5 + $0x1c8] sm:$0xff] }
   0xa   :  { %4425 = vmatmul.mubr.msk.f32.vlgmr.msra.gmra.mxu0 %vm152_vm0, %v6004_v9  ;;  %322 = vmatprep.subr.mxu0 %v107_v10  ;;  %v496_v19 = vld [vmem:[%s9568_s5 + $0x1c0] sm:$0xff]  ;;  %v489_v20 = vld [vmem:[%s9568_s5 + $0x188] sm:$0xff] }
   0xb   :  { %323 = vmatpush1.msra.mxu0 %v106_v11  ;;  %362 = vmatprep.mubr.f32.mxu0 %v9577_v4 }
   0xc   :  { %324 = vmatprep.subr.mxu0 %v99_v12 }
   0xd   :  { %325 = vmatpush1.msra.mxu0 %v98_v13 }
   0xe   :  { %326 = vmatprep.subr.mxu0 %v91_v14 }
   0xf   :  { %327 = vmatpush1.msra.mxu0 %v90_v15 }
  0x10   :  { %328 = vmatprep.subr.mxu0 %v83_v16 }
  0x11   :  { %329 = vmatpush1.msra.mxu0 %v82_v17 }
  0x12   :  { %18 = vsyncpa [#allocation3], 0  ;;  %4427 = vmatmul.mubr.msk.f32.vlgmr.msra.gmra.mxu0 %vm152_vm0, %v6004_v9  ;;  %611 = vmatprep.subr.mxu0 %v497_v18  ;;  %v488_v21 = vld [vmem:[%s9568_s5 + $0x180] sm:$0xff]  ;;  %v481_v22 = vld [vmem:[%s9568_s5 + $0x148] sm:$0xff]  ;;  %vm546_vm1 = vcmask 523264   ;;  %vm5903_vm2 = vmmov 0  }
  0x13   :  { %612 = vmatpush1.msra.mxu0 %v496_v19  ;;  %659 = vmatprep.mubr.f32.mxu0 %v9577_v4  ;;  %v480_v23 = vld [vmem:[%s9568_s5 + $0x140] sm:$0xff]  ;;  %v473_v24 = vld [vmem:[%s9568_s5 + $0x108] sm:$0xff]  ;;  %v6103_v36 = vld [vmem:[%s9565_s2 + $0x10] sm:$0xff] }
  0x14   :  { %613 = vmatprep.subr.mxu0 %v489_v20  ;;  %v472_v25 = vld [vmem:[%s9568_s5 + $0x100] sm:$0xff]  ;;  %v465_v26 = vld [vmem:[%s9568_s5 + $0xc8] sm:$0xff]  ;;  %v6111_v37 = vld [vmem:[%s9565_s2 + $0x18] sm:$0xff] }
  0x15   :  { %614 = vmatpush1.msra.mxu0 %v488_v21  ;;  %v464_v27 = vld [vmem:[%s9568_s5 + $0xc0] sm:$0xff]  ;;  %v457_v28 = vld [vmem:[%s9568_s5 + $0x88] sm:$0xff]  ;;  %v6135_v40 = vld [vmem:[%s9565_s2 + $0x30] sm:$0xff] }
  0x16   :  { %615 = vmatprep.subr.mxu0 %v481_v22  ;;  %v456_v29 = vld [vmem:[%s9568_s5 + $0x80] sm:$0xff]  ;;  %v449_v30 = vld [vmem:[%s9568_s5 + $0x48] sm:$0xff]  ;;  %v6143_v41 = vld [vmem:[%s9565_s2 + $0x38] sm:$0xff] }
  0x17   :  { %616 = vmatpush1.msra.mxu0 %v480_v23  ;;  %v448_v31 = vld [vmem:[%s9568_s5 + $0x40] sm:$0xff]  ;;  %v441_v32 = vld [vmem:[%s9568_s5 + $0x8] sm:$0xff]  ;;  %v6167_v44 = vld [vmem:[%s9565_s2 + $0x50] sm:$0xff] }
  0x18   :  { %617 = vmatprep.subr.mxu0 %v473_v24  ;;  %v440_v33 = vld [vmem:[%s9568_s5] sm:$0xff]  ;;  %v6095_v35 = vld [vmem:[%s9565_s2 + $0x8] sm:$0xff]  ;;  %v6175_v45 = vld [vmem:[%s9565_s2 + $0x58] sm:$0xff] }
  0x19   :  { %618 = vmatpush1.msra.mxu0 %v472_v25  ;;  %v6087_v34 = vld [vmem:[%s9565_s2] sm:$0xff]  ;;  %v6127_v39 = vld [vmem:[%s9565_s2 + $0x28] sm:$0xff]  ;;  %v6199_v48 = vld [vmem:[%s9565_s2 + $0x70] sm:$0xff] }
  0x1a   :  { %619 = vmatprep.subr.mxu0 %v465_v26  ;;  %v6119_v38 = vld [vmem:[%s9565_s2 + $0x20] sm:$0xff]  ;;  %v6159_v43 = vld [vmem:[%s9565_s2 + $0x48] sm:$0xff]  ;;  %v6207_v49 = vld [vmem:[%s9565_s2 + $0x78] sm:$0xff] }
  0x1b   :  { %620 = vmatpush1.msra.mxu0 %v464_v27  ;;  %v6151_v42 = vld [vmem:[%s9565_s2 + $0x40] sm:$0xff]  ;;  %v6191_v47 = vld [vmem:[%s9565_s2 + $0x68] sm:$0xff] }
  0x1c   :  { %621 = vmatprep.subr.mxu0 %v457_v28  ;;  %v6183_v46 = vld [vmem:[%s9565_s2 + $0x60] sm:$0xff]  ;;  %v501_v50 = vld [vmem:[%s9568_s5 + $0x1e8] sm:$0xff] }
  0x1d   :  { %622 = vmatpush1.msra.mxu0 %v456_v29  ;;  %v500_v51 = vld [vmem:[%s9568_s5 + $0x1e0] sm:$0xff]  ;;  %v493_v52 = vld [vmem:[%s9568_s5 + $0x1a8] sm:$0xff] }
  0x1e   :  { %623 = vmatprep.subr.mxu0 %v449_v30  ;;  %v492_v53 = vld [vmem:[%s9568_s5 + $0x1a0] sm:$0xff]  ;;  %v485_v54 = vld [vmem:[%s9568_s5 + $0x168] sm:$0xff] }
  0x1f   :  { %624 = vmatpush1.msra.mxu0 %v448_v31  ;;  %v484_v55 = vld [vmem:[%s9568_s5 + $0x160] sm:$0xff]  ;;  %v477_v56 = vld [vmem:[%s9568_s5 + $0x128] sm:$0xff] }
  0x20   :  { %625 = vmatprep.subr.mxu0 %v441_v32  ;;  %v476_v57 = vld [vmem:[%s9568_s5 + $0x120] sm:$0xff]  ;;  %v469_v58 = vld [vmem:[%s9568_s5 + $0xe8] sm:$0xff] }
  0x21   :  { %626 = vmatpush1.msra.mxu0 %v440_v33  ;;  %v468_v59 = vld [vmem:[%s9568_s5 + $0xe0] sm:$0xff]  ;;  %v461_v60 = vld [vmem:[%s9568_s5 + $0xa8] sm:$0xff] }
  0x22   :  { %4429 = vmatmul.mubr.msk.f32.vlgmr.msra.gmra.mxu0 %vm546_vm1, %v6087_v34  ;;  %933 = vmatprep.subr.mxu0 %v501_v50  ;;  %v460_v61 = vld [vmem:[%s9568_s5 + $0xa0] sm:$0xff]  ;;  %v453_v62 = vld [vmem:[%s9568_s5 + $0x68] sm:$0xff] }
  0x23   :  { %665 = vmatprep.mubr.f32.mxu0 %v9577_v4  ;;  %934 = vmatpush1.msra.mxu0 %v500_v51  ;;  %v452_v63 = vld [vmem:[%s9568_s5 + $0x60] sm:$0xff]  ;;  %v445_v0 = vld [vmem:[%s9568_s5 + $0x28] sm:$0xff] }
  0x24   :  { %935 = vmatprep.subr.mxu0 %v493_v52  ;;  %v444_v1 = vld [vmem:[%s9568_s5 + $0x20] sm:$0xff]  ;;  %v1296_v2 = vld [vmem:[%s9570_s7 + $0x1c8] sm:$0xff] }
  0x25   :  { %936 = vmatpush1.msra.mxu0 %v492_v53  ;;  %v1295_v3 = vld [vmem:[%s9570_s7 + $0x1c0] sm:$0xff]  ;;  %v1288_v5 = vld [vmem:[%s9570_s7 + $0x188] sm:$0xff] }
  0x26   :  { %4430 = vmatmul.mubr.msk.f32.gmra.mxu0 %vm546_vm1, %v6095_v35  ;;  %937 = vmatprep.subr.mxu0 %v485_v54  ;;  %v1287_v6 = vld [vmem:[%s9570_s7 + $0x180] sm:$0xff]  ;;  %v1280_v7 = vld [vmem:[%s9570_s7 + $0x148] sm:$0xff] }
  0x27   :  { %671 = vmatprep.mubr.f32.mxu0 %v9577_v4  ;;  %938 = vmatpush1.msra.mxu0 %v484_v55  ;;  %v1279_v8 = vld [vmem:[%s9570_s7 + $0x140] sm:$0xff]  ;;  %v1272_v10 = vld [vmem:[%s9570_s7 + $0x108] sm:$0xff] }
  0x28   :  { %939 = vmatprep.subr.mxu0 %v477_v56  ;;  %v1271_v11 = vld [vmem:[%s9570_s7 + $0x100] sm:$0xff]  ;;  %v1264_v12 = vld [vmem:[%s9570_s7 + $0xc8] sm:$0xff] }
  0x29   :  { %940 = vmatpush1.msra.mxu0 %v476_v57  ;;  %v1263_v13 = vld [vmem:[%s9570_s7 + $0xc0] sm:$0xff]  ;;  %v1256_v14 = vld [vmem:[%s9570_s7 + $0x88] sm:$0xff]  ;;  %v6383_v57 = vld [vmem:[%s9564_s1 + $0x10] sm:$0xff] }
  0x2a   :  { %4431 = vmatmul.mubr.msk.f32.gmra.mxu0 %vm546_vm1, %v6103_v36  ;;  %941 = vmatprep.subr.mxu0 %v469_v58  ;;  %v1255_v15 = vld [vmem:[%s9570_s7 + $0x80] sm:$0xff]  ;;  %v1248_v16 = vld [vmem:[%s9570_s7 + $0x48] sm:$0xff] }
  0x2b   :  { %677 = vmatprep.mubr.f32.mxu0 %v9577_v4  ;;  %942 = vmatpush1.msra.mxu0 %v468_v59  ;;  %v1247_v17 = vld [vmem:[%s9570_s7 + $0x40] sm:$0xff]  ;;  %v1240_v18 = vld [vmem:[%s9570_s7 + $0x8] sm:$0xff] }
  0x2c   :  { %943 = vmatprep.subr.mxu0 %v461_v60  ;;  %v1239_v19 = vld [vmem:[%s9570_s7] sm:$0xff]  ;;  %v6375_v54 = vld [vmem:[%s9564_s1 + $0x8] sm:$0xff]  ;;  %v6391_v60 = vld [vmem:[%s9564_s1 + $0x18] sm:$0xff] }
  0x2d   :  { %944 = vmatpush1.msra.mxu0 %v460_v61  ;;  %v6367_v51 = vld [vmem:[%s9564_s1] sm:$0xff] }
  0x2e   :  { %4432 = vmatmul.mubr.msk.f32.gmra.mxu0 %vm546_vm1, %v6111_v37  ;;  %945 = vmatprep.subr.mxu0 %v453_v62 }
  0x2f   :  { %683 = vmatprep.mubr.f32.mxu0 %v9577_v4  ;;  %946 = vmatpush1.msra.mxu0 %v452_v63  ;;  %v112_v63 = vlaneseq }
  0x30   :  { %947 = vmatprep.subr.mxu0 %v445_v0 }
  0x31   :  { %948 = vmatpush1.msra.mxu0 %v444_v1 }
  0x32   :  { %4433 = vmatmul.mubr.msk.f32.gmra.mxu0 %vm546_vm1, %v6119_v38  ;;  %1409 = vmatprep.subr.mxu0 %v1296_v2  ;;  %v6396_v2 = vshrl.u32 %v112_v63, 7 }
  0x33   :  { %689 = vmatprep.mubr.f32.mxu0 %v9577_v4 }
  0x34   :  { %9629 = vst [vmem:[#allocation9_spill] sm:$0xff] %v6396_v2 }
  0x36   :  { %4434 = vmatmul.mubr.msk.f32.gmra.mxu0 %vm546_vm1, %v6127_v39 }
  0x37   :  { %695 = vmatprep.mubr.f32.mxu0 %v9577_v4 }
  0x3a   :  { %4435 = vmatmul.mubr.msk.f32.gmra.mxu0 %vm546_vm1, %v6135_v40 }
  0x3b   :  { %701 = vmatprep.mubr.f32.mxu0 %v9577_v4 }
  0x3e   :  { %4436 = vmatmul.mubr.msk.f32.gmra.mxu0 %vm546_vm1, %v6143_v41 }
  0x3f   :  { %707 = vmatprep.mubr.f32.mxu0 %v9577_v4 }
  0x42   :  { %4437 = vmatmul.mubr.msk.f32.gmra.mxu0 %vm546_vm1, %v6151_v42 }
  0x43   :  { %713 = vmatprep.mubr.f32.mxu0 %v9577_v4 }
  0x46   :  { %4438 = vmatmul.mubr.msk.f32.gmra.mxu0 %vm546_vm1, %v6159_v43 }
  0x47   :  { %719 = vmatprep.mubr.f32.mxu0 %v9577_v4 }
  0x4a   :  { %4439 = vmatmul.mubr.msk.f32.gmra.mxu0 %vm546_vm1, %v6167_v44 }
  0x4b   :  { %725 = vmatprep.mubr.f32.mxu0 %v9577_v4 }
  0x4e   :  { %4440 = vmatmul.mubr.msk.f32.gmra.mxu0 %vm546_vm1, %v6175_v45 }
  0x4f   :  { %731 = vmatprep.mubr.f32.mxu0 %v9577_v4 }
  0x52   :  { %4441 = vmatmul.mubr.msk.f32.gmra.mxu0 %vm546_vm1, %v6183_v46 }
  0x53   :  { %737 = vmatprep.mubr.f32.mxu0 %v9577_v4 }
  0x56   :  { %4442 = vmatmul.mubr.msk.f32.gmra.mxu0 %vm546_vm1, %v6191_v47 }
  0x57   :  { %743 = vmatprep.mubr.f32.mxu0 %v9577_v4 }
  0x5a   :  { %4443 = vmatmul.mubr.msk.f32.gmra.mxu0 %vm546_vm1, %v6199_v48 }
  0x5b   :  { %749 = vmatprep.mubr.f32.mxu0 %v9577_v4 }
  0x5e   :  { %4444 = vmatmul.mubr.msk.f32.gmra.mxu0 %vm546_vm1, %v6207_v49 }
  0x5f   :  { %981 = vmatprep.mubr.f32.mxu0 %v9577_v4 }
  0x62   :  { %4461 = vmatmul.mubr.msk.f32.vlgmr.msra.gmra.mxu0 %vm546_vm1, %v6087_v34 }
  0x63   :  { %987 = vmatprep.mubr.f32.mxu0 %v9577_v4  ;;  %1410 = vmatpush1.msra.mxu0 %v1295_v3 }
  0x64   :  { %1411 = vmatprep.subr.mxu0 %v1288_v5  ;;  %v504_v5 = vld [vmem:[%s9569_s6] sm:$0xff] }
  0x65   :  { %1412 = vmatpush1.msra.mxu0 %v1287_v6 }
  0x66   :  { %4462 = vmatmul.mubr.msk.f32.gmra.mxu0 %vm546_vm1, %v6095_v35  ;;  %1413 = vmatprep.subr.mxu0 %v1280_v7  ;;  %v6402_v7 = vsub.s32 0, %v6396_v2 }
  0x67   :  { %993 = vmatprep.mubr.f32.mxu0 %v9577_v4  ;;  %1414 = vmatpush1.msra.mxu0 %v1279_v8  ;;  %v6405_v8 = vsub.s32 1, %v6396_v2 }
  0x68   :  { %1415 = vmatprep.subr.mxu0 %v1272_v10  ;;  %9630 = vst [vmem:[#allocation10_spill] sm:$0xff] %v6402_v7 }
  0x69   :  { %1416 = vmatpush1.msra.mxu0 %v1271_v11  ;;  %9631 = vst [vmem:[#allocation11_spill] sm:$0xff] %v6405_v8  ;;  %v509_v11 = vrot.slane %v504_v5, %v6402_v7 }
  0x6a   :  { %4463 = vmatmul.mubr.msk.f32.gmra.mxu0 %vm546_vm1, %v6103_v36  ;;  %1417 = vmatprep.subr.mxu0 %v1264_v12  ;;  %v513_v12 = vrot.slane %v504_v5, %v6405_v8 }
  0x6b   :  { %999 = vmatprep.mubr.f32.mxu0 %v9577_v4  ;;  %1418 = vmatpush1.msra.mxu0 %v1263_v13 }
  0x6c   :  { %1419 = vmatprep.subr.mxu0 %v1256_v14 }
  0x6d   :  { %1420 = vmatpush1.msra.mxu0 %v1255_v15 }
  0x6e   :  { %4464 = vmatmul.mubr.msk.f32.gmra.mxu0 %vm546_vm1, %v6111_v37  ;;  %1421 = vmatprep.subr.mxu0 %v1248_v16 }
  0x6f   :  { %1005 = vmatprep.mubr.f32.mxu0 %v9577_v4  ;;  %1422 = vmatpush1.msra.mxu0 %v1247_v17 }
  0x70   :  { %1423 = vmatprep.subr.mxu0 %v1240_v18 }
  0x71   :  { %1424 = vmatpush1.msra.mxu0 %v1239_v19 }
  0x72   :  { %4465 = vmatmul.mubr.msk.f32.gmra.mxu0 %vm546_vm1, %v6119_v38 }
  0x73   :  { %1011 = vmatprep.mubr.f32.mxu0 %v9577_v4 }
  0x76   :  { %4466 = vmatmul.mubr.msk.f32.gmra.mxu0 %vm546_vm1, %v6127_v39 }
  0x77   :  { %1017 = vmatprep.mubr.f32.mxu0 %v9577_v4 }
  0x7a   :  { %4467 = vmatmul.mubr.msk.f32.gmra.mxu0 %vm546_vm1, %v6135_v40 }
  0x7b   :  { %1023 = vmatprep.mubr.f32.mxu0 %v9577_v4 }
  0x7e   :  { %4468 = vmatmul.mubr.msk.f32.gmra.mxu0 %vm546_vm1, %v6143_v41 }
  0x7f   :  { %1029 = vmatprep.mubr.f32.mxu0 %v9577_v4 }
  0x82   :  { %4469 = vmatmul.mubr.msk.f32.gmra.mxu0 %vm546_vm1, %v6151_v42 }
  0x83   :  { %1035 = vmatprep.mubr.f32.mxu0 %v9577_v4 }
  0x86   :  { %4470 = vmatmul.mubr.msk.f32.gmra.mxu0 %vm546_vm1, %v6159_v43 }
  0x87   :  { %1041 = vmatprep.mubr.f32.mxu0 %v9577_v4 }
  0x8a   :  { %4471 = vmatmul.mubr.msk.f32.gmra.mxu0 %vm546_vm1, %v6167_v44 }
  0x8b   :  { %1047 = vmatprep.mubr.f32.mxu0 %v9577_v4 }
  0x8e   :  { %4472 = vmatmul.mubr.msk.f32.gmra.mxu0 %vm546_vm1, %v6175_v45 }
  0x8f   :  { %1053 = vmatprep.mubr.f32.mxu0 %v9577_v4 }
  0x92   :  { %4473 = vmatmul.mubr.msk.f32.gmra.mxu0 %vm546_vm1, %v6183_v46 }
  0x93   :  { %1059 = vmatprep.mubr.f32.mxu0 %v9577_v4 }
  0x96   :  { %4474 = vmatmul.mubr.msk.f32.gmra.mxu0 %vm546_vm1, %v6191_v47 }
  0x97   :  { %1065 = vmatprep.mubr.f32.mxu0 %v9577_v4 }
  0x9a   :  { %4475 = vmatmul.mubr.msk.f32.gmra.mxu0 %vm546_vm1, %v6199_v48 }
  0x9b   :  { %1071 = vmatprep.mubr.f32.mxu0 %v9577_v4 }
  0x9e   :  { %4476 = vmatmul.mubr.msk.f32.gmra.mxu0 %vm546_vm1, %v6207_v49 }
  0x9f   :  { %1457 = vmatprep.mubr.f32.mxu0 %v9577_v4 }
  0xa2   :  { %4493 = vmatmul.mubr.msk.f32.vlgmr.msra.gmra.mxu0 %vm546_vm1, %v6367_v51 }
  0xa3   :  { %1463 = vmatprep.mubr.f32.mxu0 %v9577_v4 }
  0xa6   :  { %4494 = vmatmul.mubr.msk.f32.gmra.mxu0 %vm546_vm1, %v6375_v54 }
  0xa7   :  { %1469 = vmatprep.mubr.f32.mxu0 %v9577_v4 }
  0xaa   :  { %4495 = vmatmul.mubr.msk.f32.gmra.mxu0 %vm546_vm1, %v6383_v57 }
  0xab   :  { %1475 = vmatprep.mubr.f32.mxu0 %v9577_v4 }
  0xae   :  { %4496 = vmatmul.mubr.msk.f32.gmra.mxu0 %vm546_vm1, %v6391_v60 }
  0xaf   :  { %1481 = vmatprep.mubr.f32.mxu0 %v9577_v4 }
  0xca   :  { %v6329_v20 = vpop.f32.mrf.mxu0 }
  0xcb   :  { %9625 = vst [vmem:[#allocation5_spill] sm:$0xff] %v6329_v20 }
  0xcc   :  { %v6334_v21 = vpop.f32.mrf.mxu0 }
  0xcd   :  { %9626 = vst [vmem:[#allocation6_spill] sm:$0xff] %v6334_v21 }
  0xd2   :  { %v6339_v22 = vpop.f32.mrf.mxu0 }
  0xd3   :  { %9627 = vst [vmem:[#allocation7_spill] sm:$0xff] %v6339_v22 }
  0xd4   :  { %v6344_v23 = vpop.f32.mrf.mxu0 }
  0xd5   :  { %9628 = vst [vmem:[#allocation8_spill] sm:$0xff] %v6344_v23 }
  0xe2   :  { %v661_v24 = vpop.f32.mrf.mxu0 }
  0xe3   :  { %v6413_v17 = vadd.f32 %v661_v24, %v509_v11 }
  0xe4   :  { %v663_v25 = vpop.f32.mrf.mxu0 }
  0xe5   :  { %v6419_v63 = vadd.f32 %v663_v25, %v513_v12 }
  0xe6   :  { %v667_v26 = vpop.f32.mrf.mxu0 }
  0xe7   :  { %9635 = vst [vmem:[#allocation15_spill] sm:$0xff] %v6419_v63  ;;  %v6421_v4 = vadd.f32 %v667_v26, %v509_v11 }
  0xe8   :  { %v669_v27 = vpop.f32.mrf.mxu0 }
  0xe9   :  { %v6423_v23 = vadd.f32 %v669_v27, %v513_v12 }
  0xea   :  { %v673_v28 = vpop.f32.mrf.mxu0 }
  0xeb   :  { %9636 = vst [vmem:[#allocation16_spill] sm:$0xff] %v6423_v23 }
  0xec   :  { %v675_v29 = vpop.f32.mrf.mxu0 }
  0xee   :  { %v679_v30 = vpop.f32.mrf.mxu0 }
  0xf0   :  { %v681_v31 = vpop.f32.mrf.mxu0 }
  0xf2   :  { %v685_v32 = vpop.f32.mrf.mxu0 }
  0xf3   :  { %v6409_v14 = vadd.f32 %v685_v32, %v509_v11  ;;  %v6427_v32 = vadd.f32 %v673_v28, %v509_v11 }
  0xf4   :  { %v687_v33 = vpop.f32.mrf.mxu0 }
  0xf5   :  { %9632 = vst [vmem:[#allocation12_spill] sm:$0xff] %v6409_v14  ;;  %v6411_v15 = vadd.f32 %v687_v33, %v513_v12  ;;  %v6429_v33 = vadd.f32 %v675_v29, %v513_v12  ;;  %v2037_v25 = vmax.f32 %v6413_v17, %v6409_v14 }
  0xf6   :  { %v691_v50 = vpop.f32.mrf.mxu0 }
  0xf7   :  { %9633 = vst [vmem:[#allocation13_spill] sm:$0xff] %v6411_v15  ;;  %v6415_v18 = vadd.f32 %v691_v50, %v509_v11  ;;  %9637 = vst [vmem:[#allocation17_spill] sm:$0xff] %v6429_v33  ;;  %v6435_v50 = vadd.f32 %v679_v30, %v509_v11  ;;  %v2278_v26 = vmax.f32 %v6419_v63, %v6411_v15 }
  0xf8   :  { %v693_v52 = vpop.f32.mrf.mxu0 }
  0xf9   :  { %v6417_v19 = vadd.f32 %v693_v52, %v513_v12  ;;  %v6437_v52 = vadd.f32 %v681_v31, %v513_v12  ;;  %v2038_v28 = vmax.f32 %v6421_v4, %v6415_v18 }
  0xfa   :  { %v697_v53 = vpop.f32.mrf.mxu0 }
  0xfb   :  { %9634 = vst [vmem:[#allocation14_spill] sm:$0xff] %v6417_v19  ;;  %v6425_v22 = vadd.f32 %v697_v53, %v509_v11  ;;  %9639 = vst [vmem:[#allocation19_spill] sm:$0xff] %v6437_v52  ;;  %v2279_v29 = vmax.f32 %v6423_v23, %v6417_v19 }
  0xfc   :  { %v699_v55 = vpop.f32.mrf.mxu0 }
  0xfd   :  { %v6431_v21 = vadd.f32 %v699_v55, %v513_v12  ;;  %v2039_v30 = vmax.f32 %v6427_v32, %v6425_v22 }
  0xfe   :  { %v703_v56 = vpop.f32.mrf.mxu0 }
  0xff   :  { %9638 = vst [vmem:[#allocation18_spill] sm:$0xff] %v6431_v21  ;;  %v6433_v24 = vadd.f32 %v703_v56, %v509_v11  ;;  %v2280_v63 = vmax.f32 %v6429_v33, %v6431_v21 }
 0x100   :  { %v705_v58 = vpop.f32.mrf.mxu0 }
 0x101   :  { %v6447_v53 = vadd.f32 %v705_v58, %v513_v12  ;;  %v2040_v19 = vmax.f32 %v6435_v50, %v6433_v24 }
 0x102   :  { %v709_v59 = vpop.f32.mrf.mxu0 }
 0x103   :  { %9640 = vst [vmem:[#allocation20_spill] sm:$0xff] %v6447_v53  ;;  %v6453_v31 = vadd.f32 %v709_v59, %v509_v11  ;;  %v2281_v20 = vmax.f32 %v6437_v52, %v6447_v53 }
 0x104   :  { %v711_v61 = vpop.f32.mrf.mxu0 }
 0x105   :  { %v6467_v23 = vadd.f32 %v711_v61, %v513_v12 }
 0x106   :  { %v715_v62 = vpop.f32.mrf.mxu0 }
 0x107   :  { %v6449_v55 = vadd.f32 %v715_v62, %v509_v11  ;;  %9642 = vst [vmem:[#allocation22_spill] sm:$0xff] %v6467_v23 }
 0x108   :  { %v717_v0 = vpop.f32.mrf.mxu0 }
 0x109   :  { %v6455_v56 = vadd.f32 %v717_v0, %v513_v12  ;;  %v2042_v21 = vmax.f32 %v2038_v28, %v6449_v55 }
 0x10a   :  { %v721_v1 = vpop.f32.mrf.mxu0 }
 0x10b   :  { %9641 = vst [vmem:[#allocation21_spill] sm:$0xff] %v6455_v56  ;;  %v6457_v8 = vadd.f32 %v721_v1, %v509_v11  ;;  %v2283_v61 = vmax.f32 %v2279_v29, %v6455_v56 }
 0x10c   :  { %v723_v3 = vpop.f32.mrf.mxu0 }
 0x10d   :  { %v6469_v2 = vadd.f32 %v723_v3, %v513_v12  ;;  %v2043_v3 = vmax.f32 %v2039_v30, %v6457_v8 }
 0x10e   :  { %v727_v6 = vpop.f32.mrf.mxu0 }
 0x10f   :  { %v6463_v58 = vadd.f32 %v727_v6, %v509_v11 }
 0x110   :  { %v729_v10 = vpop.f32.mrf.mxu0 }
 0x111   :  { %v6471_v59 = vadd.f32 %v729_v10, %v513_v12  ;;  %v2044_v7 = vmax.f32 %v2040_v19, %v6463_v58 }
 0x112   :  { %v733_v13 = vpop.f32.mrf.mxu0 }
 0x113   :  { %v6473_v0 = vadd.f32 %v733_v13, %v509_v11 }
 0x114   :  { %v735_v16 = vpop.f32.mrf.mxu0 }
 0x115   :  { %v6485_v10 = vadd.f32 %v735_v16, %v513_v12 }
 0x116   :  { %v739_v5 = vpop.f32.mrf.mxu0 }
 0x117   :  { %v6465_v62 = vadd.f32 %v739_v5, %v509_v11  ;;  %v2041_v5 = vmax.f32 %v2037_v25, %v6453_v31  ;;  %v2285_v25 = vmax.f32 %v2281_v20, %v6471_v59 }
 0x118   :  { %v741_v27 = vpop.f32.mrf.mxu0 }
 0x119   :  { %v6478_v33 = vadd.f32 %v741_v27, %v513_v12  ;;  %v2046_v14 = vmax.f32 %v2042_v21, %v6465_v62  ;;  %v2284_v27 = vmax.f32 %v2280_v63, %v6469_v2  ;;  %v2045_v29 = vmax.f32 %v2041_v5, %v6473_v0 }
 0x11a   :  { %v745_v15 = vpop.f32.mrf.mxu0 }
 0x11b   :  { %v6480_v6 = vadd.f32 %v745_v15, %v509_v11  ;;  %v2282_v15 = vmax.f32 %v2278_v26, %v6467_v23  ;;  %v2287_v16 = vmax.f32 %v2283_v61, %v6478_v33  ;;  %v2049_v63 = vmax.f32 %v2045_v29, %v2046_v14  ;;  %v104_v14 = vld [vmem:[%s9566_s3 + $0xd0] sm:$0xff]  ;;  %v6528_v61 = vld [vmem:[%s9564_s1 + $0x28] sm:$0xff] }
 0x11c   :  { %v747_v1 = vpop.f32.mrf.mxu0  ;;  %v6548_v29 = vld [vmem:[%s9564_s1 + $0x30] sm:$0xff] }
 0x11d   :  { %v6489_v52 = vadd.f32 %v747_v1, %v513_v12  ;;  %v2047_v53 = vmax.f32 %v2043_v3, %v6480_v6  ;;  %v89_v3 = vld [vmem:[%s9566_s3 + $0x58] sm:$0xff] }
 0x11e   :  { %v751_v13 = vpop.f32.mrf.mxu0 }
 0x11f   :  { %v6491_v28 = vadd.f32 %v751_v13, %v509_v11  ;;  %v2286_v11 = vmax.f32 %v2282_v15, %v6485_v10  ;;  %v2288_v1 = vmax.f32 %v2284_v27, %v6489_v52  ;;  %v88_v15 = vld [vmem:[%s9566_s3 + $0x50] sm:$0xff]  ;;  %v81_v27 = vld [vmem:[%s9566_s3 + $0x18] sm:$0xff] }
 0x120   :  { %v753_v30 = vpop.f32.mrf.mxu0 }
 0x121   :  { %v2048_v19 = vmax.f32 %v2044_v7, %v6491_v28  ;;  %v6500_v21 = vadd.f32 %v753_v30, %v513_v12  ;;  %v2290_v23 = vmax.f32 %v2286_v11, %v2287_v16  ;;  %v6508_v7 = vld [vmem:[%s9564_s1 + $0x20] sm:$0xff]  ;;  %v105_v12 = vld [vmem:[%s9566_s3 + $0xd8] sm:$0xff]  ;;  %v108_v16 = vld [vmem:[%s9566_s3 + $0xf0] sm:$0xff] }
 0x122   :  { %4497 = vmatmul.mubr.msk.f32.gmra.mxu0 %vm546_vm1, %v6508_v7  ;;  %251 = vmatprep.subr.mxu1 %v105_v12  ;;  %v109_v30 = vld [vmem:[%s9566_s3 + $0xf8] sm:$0xff]  ;;  %v100_v11 = vld [vmem:[%s9566_s3 + $0xb0] sm:$0xff] }
 0x123   :  { %v2289_v26 = vmax.f32 %v2285_v25, %v6500_v21  ;;  %v2050_v13 = vmax.f32 %v2047_v53, %v2048_v19  ;;  %v9643_v53 = vmov 0.0   ;;  %252 = vmatpush1.msra.mxu1 %v104_v14  ;;  %v80_v25 = vld [vmem:[%s9566_s3 + $0x10] sm:$0xff]  ;;  %v101_v19 = vld [vmem:[%s9566_s3 + $0xb8] sm:$0xff] }
 0x124   :  { %1487 = vmatprep.mubr.f32.mxu0 %v9643_v53  ;;  %v499_v12 = vld [vmem:[%s9568_s5 + $0x1d8] sm:$0xff]  ;;  %v498_v14 = vld [vmem:[%s9568_s5 + $0x1d0] sm:$0xff] }
 0x125   :  { %v2051_v20 = vmax.f32 %v2049_v63, %v2050_v13  ;;  %v2291_v5 = vmax.f32 %v2288_v1, %v2289_v26  ;;  %v6569_v1 = vld [vmem:[%s9564_s1 + $0x38] sm:$0xff]  ;;  %v92_v63 = vld [vmem:[%s9566_s3 + $0x70] sm:$0xff] }
 0x126   :  { %4498 = vmatmul.mubr.msk.f32.gmra.mxu0 %vm546_vm1, %v6528_v61  ;;  %v93_v26 = vld [vmem:[%s9566_s3 + $0x78] sm:$0xff] }
 0x127   :  { %2052 = vmax.xlane.f32.xlu0 %v2051_v20  ;;  %v2292_v56 = vmax.f32 %v2290_v23, %v2291_v5  ;;  %v97_v23 = vld [vmem:[%s9566_s3 + $0x98] sm:$0xff]  ;;  %1493 = vmatprep.mubr.f32.mxu0 %v9643_v53  ;;  %v84_v20 = vld [vmem:[%s9566_s3 + $0x30] sm:$0xff]  ;;  %v6591_v5 = vld [vmem:[%s9564_s1 + $0x40] sm:$0xff] }
 0x128   :  { %253 = vmatprep.subr.mxu1 %v97_v23  ;;  %v85_v13 = vld [vmem:[%s9566_s3 + $0x38] sm:$0xff] }
 0x129   :  { %2293 = vmax.xlane.f32.xlu1 %v2292_v56  ;;  %v96_v56 = vld [vmem:[%s9566_s3 + $0x90] sm:$0xff]  ;;  %v491_v23 = vld [vmem:[%s9568_s5 + $0x198] sm:$0xff] }
 0x12a   :  { %254 = vmatpush1.msra.mxu1 %v96_v56  ;;  %4499 = vmatmul.mubr.msk.f32.gmra.mxu0 %vm546_vm1, %v6548_v29  ;;  %v490_v56 = vld [vmem:[%s9568_s5 + $0x190] sm:$0xff] }
 0x12b   :  { %255 = vmatprep.subr.mxu1 %v89_v3  ;;  %1499 = vmatprep.mubr.f32.mxu0 %v9643_v53  ;;  %v6612_v3 = vld [vmem:[%s9564_s1 + $0x48] sm:$0xff] }
 0x12c   :  { %256 = vmatpush1.msra.mxu1 %v88_v15  ;;  %v483_v15 = vld [vmem:[%s9568_s5 + $0x158] sm:$0xff] }
 0x12d   :  { %257 = vmatprep.subr.mxu1 %v81_v27  ;;  %v475_v27 = vld [vmem:[%s9568_s5 + $0x118] sm:$0xff] }
 0x12e   :  { %258 = vmatpush1.msra.mxu1 %v80_v25  ;;  %4500 = vmatmul.mubr.msk.f32.gmra.mxu0 %vm546_vm1, %v6569_v1  ;;  %v1300_v25 = vld [vmem:[%s9570_s7 + $0x1e8] sm:$0xff] }
 0x12f   :  { %393 = vmatprep.subr.mxu1 %v109_v30  ;;  %4426 = vmatmul.mubr.msk.f32.vlgmr.msra.gmra.mxu1 %vm152_vm0, %v6004_v9  ;;  %v1299_v30 = vld [vmem:[%s9570_s7 + $0x1e0] sm:$0xff] }
 0x130   :  { %394 = vmatpush1.msra.mxu1 %v108_v16  ;;  %433 = vmatprep.mubr.f32.mxu1 %v9643_v53  ;;  %v474_v16 = vld [vmem:[%s9568_s5 + $0x110] sm:$0xff] }
 0x131   :  { %395 = vmatprep.subr.mxu1 %v101_v19  ;;  %1505 = vmatprep.mubr.f32.mxu0 %v9643_v53  ;;  %v6640_v19 = vld [vmem:[%s9564_s1 + $0x50] sm:$0xff] }
 0x132   :  { %396 = vmatpush1.msra.mxu1 %v100_v11  ;;  %4501 = vmatmul.mubr.msk.f32.gmra.mxu0 %vm546_vm1, %v6591_v5  ;;  %v467_v11 = vld [vmem:[%s9568_s5 + $0xd8] sm:$0xff] }
 0x133   :  { %397 = vmatprep.subr.mxu1 %v93_v26  ;;  %1511 = vmatprep.mubr.f32.mxu0 %v9643_v53  ;;  %v466_v26 = vld [vmem:[%s9568_s5 + $0xd0] sm:$0xff] }
 0x134   :  { %398 = vmatpush1.msra.mxu1 %v92_v63  ;;  %1731 = vmatprep.subr.mxu0 %v1300_v25  ;;  %v1292_v63 = vld [vmem:[%s9570_s7 + $0x1a8] sm:$0xff]  ;;  %v442_v25 = vld [vmem:[%s9568_s5 + $0x10] sm:$0xff] }
 0x135   :  { %399 = vmatprep.subr.mxu1 %v85_v13  ;;  %1732 = vmatpush1.msra.mxu0 %v1299_v30  ;;  %v459_v13 = vld [vmem:[%s9568_s5 + $0x98] sm:$0xff]  ;;  %v6692_v30 = vld [vmem:[%s9564_s1 + $0x60] sm:$0xff] }
 0x136   :  { %400 = vmatpush1.msra.mxu1 %v84_v20  ;;  %4502 = vmatmul.mubr.msk.f32.gmra.mxu0 %vm546_vm1, %v6612_v3  ;;  %v1291_v20 = vld [vmem:[%s9570_s7 + $0x1a0] sm:$0xff] }
 0x137   :  { %772 = vmatprep.subr.mxu1 %v499_v12  ;;  %4428 = vmatmul.mubr.msk.f32.vlgmr.msra.gmra.mxu1 %vm152_vm0, %v6004_v9  ;;  %v482_v9 = vld [vmem:[%s9568_s5 + $0x150] sm:$0xff] }
 0x138   :  { %773 = vmatpush1.msra.mxu1 %v498_v14  ;;  %820 = vmatprep.mubr.f32.mxu1 %v9643_v53  ;;  %v458_v12 = vld [vmem:[%s9568_s5 + $0x90] sm:$0xff]  ;;  %v6666_v14 = vld [vmem:[%s9564_s1 + $0x58] sm:$0xff] }
 0x139   :  { %774 = vmatprep.subr.mxu1 %v491_v23  ;;  %1517 = vmatprep.mubr.f32.mxu0 %v9643_v53  ;;  %v451_v23 = vld [vmem:[%s9568_s5 + $0x58] sm:$0xff] }
 0x13a   :  { %775 = vmatpush1.msra.mxu1 %v490_v56  ;;  %4503 = vmatmul.mubr.msk.f32.gmra.mxu0 %vm546_vm1, %v6640_v19  ;;  %v450_v56 = vld [vmem:[%s9568_s5 + $0x50] sm:$0xff] }
 0x13b   :  { %776 = vmatprep.subr.mxu1 %v483_v15  ;;  %1523 = vmatprep.mubr.f32.mxu0 %v9643_v53  ;;  %v1284_v15 = vld [vmem:[%s9570_s7 + $0x168] sm:$0xff] }
 0x13c   :  { %777 = vmatpush1.msra.mxu1 %v482_v9  ;;  %1733 = vmatprep.subr.mxu0 %v1292_v63  ;;  %v443_v9 = vld [vmem:[%s9568_s5 + $0x18] sm:$0xff]  ;;  %v1268_v63 = vld [vmem:[%s9570_s7 + $0xe8] sm:$0xff] }
 0x13d   :  { %778 = vmatprep.subr.mxu1 %v475_v27  ;;  %1734 = vmatpush1.msra.mxu0 %v1291_v20  ;;  %v1283_v27 = vld [vmem:[%s9570_s7 + $0x160] sm:$0xff]  ;;  %v6728_v20 = vld [vmem:[%s9564_s1 + $0x70] sm:$0xff] }
 0x13e   :  { %779 = vmatpush1.msra.mxu1 %v474_v16  ;;  %4504 = vmatmul.mubr.msk.f32.gmra.mxu0 %vm546_vm1, %v6666_v14  ;;  %v1276_v16 = vld [vmem:[%s9570_s7 + $0x128] sm:$0xff] }
 0x13f   :  { %780 = vmatprep.subr.mxu1 %v467_v11  ;;  %1529 = vmatprep.mubr.f32.mxu0 %v9643_v53  ;;  %v1275_v11 = vld [vmem:[%s9570_s7 + $0x120] sm:$0xff] }
 0x140   :  { %781 = vmatpush1.msra.mxu1 %v466_v26  ;;  %1735 = vmatprep.subr.mxu0 %v1284_v15  ;;  %v6708_v26 = vld [vmem:[%s9564_s1 + $0x68] sm:$0xff] }
 0x141   :  { %782 = vmatprep.subr.mxu1 %v459_v13  ;;  %1736 = vmatpush1.msra.mxu0 %v1283_v27  ;;  %v1267_v13 = vld [vmem:[%s9570_s7 + $0xe0] sm:$0xff]  ;;  %v1244_v15 = vld [vmem:[%s9570_s7 + $0x28] sm:$0xff] }
 0x142   :  { %783 = vmatpush1.msra.mxu1 %v458_v12  ;;  %4505 = vmatmul.mubr.msk.f32.gmra.mxu0 %vm546_vm1, %v6692_v30  ;;  %v1259_v12 = vld [vmem:[%s9570_s7 + $0xa0] sm:$0xff] }
 0x143   :  { %784 = vmatprep.subr.mxu1 %v451_v23  ;;  %1535 = vmatprep.mubr.f32.mxu0 %v9643_v53  ;;  %v6745_v23 = vld [vmem:[%s9564_s1 + $0x78] sm:$0xff] }
 0x144   :  { %785 = vmatpush1.msra.mxu1 %v450_v56  ;;  %1737 = vmatprep.subr.mxu0 %v1276_v16  ;;  %v1251_v56 = vld [vmem:[%s9570_s7 + $0x60] sm:$0xff]  ;;  %v470_v16 = vld [vmem:[%s9568_s5 + $0xf0] sm:$0xff] }
 0x145   :  { %786 = vmatprep.subr.mxu1 %v443_v9  ;;  %1738 = vmatpush1.msra.mxu0 %v1275_v11 }
 0x146   :  { %787 = vmatpush1.msra.mxu1 %v442_v25  ;;  %4506 = vmatmul.mubr.msk.f32.gmra.mxu0 %vm546_vm1, %v6708_v26  ;;  %v471_v25 = vld [vmem:[%s9568_s5 + $0xf8] sm:$0xff] }
 0x147   :  { %4445 = vmatmul.mubr.msk.f32.vlgmr.msra.gmra.mxu1 %vm546_vm1, %v6087_v34  ;;  %1739 = vmatprep.subr.mxu0 %v1268_v63  ;;  %v1260_v34 = vld [vmem:[%s9570_s7 + $0xa8] sm:$0xff] }
 0x148   :  { %826 = vmatprep.mubr.f32.mxu1 %v9643_v53  ;;  %1541 = vmatprep.mubr.f32.mxu0 %v9643_v53 }
 0x149   :  { %1740 = vmatpush1.msra.mxu0 %v1267_v13  ;;  %v463_v13 = vld [vmem:[%s9568_s5 + $0xb8] sm:$0xff] }
 0x14a   :  { %1741 = vmatprep.subr.mxu0 %v1260_v34  ;;  %4507 = vmatmul.mubr.msk.f32.gmra.mxu0 %vm546_vm1, %v6728_v20  ;;  %v462_v34 = vld [vmem:[%s9568_s5 + $0xb0] sm:$0xff] }
 0x14b   :  { %4446 = vmatmul.mubr.msk.f32.gmra.mxu1 %vm546_vm1, %v6095_v35  ;;  %v1252_v35 = vld [vmem:[%s9570_s7 + $0x68] sm:$0xff]  ;;  %1547 = vmatprep.mubr.f32.mxu0 %v9643_v53 }
 0x14c   :  { %832 = vmatprep.mubr.f32.mxu1 %v9643_v53  ;;  %1742 = vmatpush1.msra.mxu0 %v1259_v12 }
 0x14d   :  { %1743 = vmatprep.subr.mxu0 %v1252_v35 }
 0x14e   :  { %4508 = vmatmul.mubr.msk.f32.gmra.mxu0 %vm546_vm1, %v6745_v23 }
 0x14f   :  { %4447 = vmatmul.mubr.msk.f32.gmra.mxu1 %vm546_vm1, %v6103_v36  ;;  %v1243_v36 = vld [vmem:[%s9570_s7 + $0x20] sm:$0xff]  ;;  %1744 = vmatpush1.msra.mxu0 %v1251_v56  ;;  %v455_v56 = vld [vmem:[%s9568_s5 + $0x78] sm:$0xff] }
 0x150   :  { %838 = vmatprep.mubr.f32.mxu1 %v9643_v53  ;;  %1745 = vmatprep.subr.mxu0 %v1244_v15  ;;  %v454_v15 = vld [vmem:[%s9568_s5 + $0x70] sm:$0xff] }
 0x151   :  { %1779 = vmatprep.mubr.f32.mxu0 %v9643_v53  ;;  %1746 = vmatpush1.msra.mxu0 %v1243_v36 }
 0x152   :  { %4525 = vmatmul.mubr.msk.f32.vlgmr.msra.gmra.mxu0 %vm546_vm1, %v6367_v51  ;;  %4972 = vmatprep.subr.mxu0 %v9643_v53 }
 0x153   :  { %4448 = vmatmul.mubr.msk.f32.gmra.mxu1 %vm546_vm1, %v6111_v37  ;;  %1785 = vmatprep.mubr.f32.mxu0 %v9643_v53  ;;  %v6849_v37 = vpop.f32.mrf.mxu0 }
 0x154   :  { %844 = vmatprep.mubr.f32.mxu1 %v9643_v53  ;;  %9644 = vst [vmem:[#allocation23_spill] sm:$0xff] %v6849_v37 }
 0x156   :  { %4526 = vmatmul.mubr.msk.f32.gmra.mxu0 %vm546_vm1, %v6375_v54 }
 0x157   :  { %4449 = vmatmul.mubr.msk.f32.gmra.mxu1 %vm546_vm1, %v6119_v38  ;;  %1791 = vmatprep.mubr.f32.mxu0 %v9643_v53  ;;  %v503_v38 = vld [vmem:[%s9568_s5 + $0x1f8] sm:$0xff] }
 0x158   :  { %850 = vmatprep.mubr.f32.mxu1 %v9643_v53  ;;  %1094 = vmatprep.subr.mxu1 %v503_v38 }
 0x15a   :  { %4527 = vmatmul.mubr.msk.f32.gmra.mxu0 %vm546_vm1, %v6383_v57 }
 0x15b   :  { %4450 = vmatmul.mubr.msk.f32.gmra.mxu1 %vm546_vm1, %v6127_v39  ;;  %1797 = vmatprep.mubr.f32.mxu0 %v9643_v53  ;;  %v502_v39 = vld [vmem:[%s9568_s5 + $0x1f0] sm:$0xff] }
 0x15c   :  { %856 = vmatprep.mubr.f32.mxu1 %v9643_v53  ;;  %1095 = vmatpush1.msra.mxu1 %v502_v39  ;;  %v447_v39 = vld [vmem:[%s9568_s5 + $0x38] sm:$0xff] }
 0x15e   :  { %4528 = vmatmul.mubr.msk.f32.gmra.mxu0 %vm546_vm1, %v6391_v60  ;;  %v478_v60 = vld [vmem:[%s9568_s5 + $0x130] sm:$0xff] }
 0x15f   :  { %4451 = vmatmul.mubr.msk.f32.gmra.mxu1 %vm546_vm1, %v6135_v40  ;;  %1803 = vmatprep.mubr.f32.mxu0 %v9643_v53  ;;  %v495_v40 = vld [vmem:[%s9568_s5 + $0x1b8] sm:$0xff] }
 0x160   :  { %862 = vmatprep.mubr.f32.mxu1 %v9643_v53  ;;  %1096 = vmatprep.subr.mxu1 %v495_v40  ;;  %v446_v40 = vld [vmem:[%s9568_s5 + $0x30] sm:$0xff] }
 0x162   :  { %4529 = vmatmul.mubr.msk.f32.gmra.mxu0 %vm546_vm1, %v6508_v7 }
 0x163   :  { %4452 = vmatmul.mubr.msk.f32.gmra.mxu1 %vm546_vm1, %v6143_v41  ;;  %1809 = vmatprep.mubr.f32.mxu0 %v9643_v53 }
 0x164   :  { %868 = vmatprep.mubr.f32.mxu1 %v9643_v53 }
 0x166   :  { %4530 = vmatmul.mubr.msk.f32.gmra.mxu0 %vm546_vm1, %v6528_v61 }
 0x167   :  { %4453 = vmatmul.mubr.msk.f32.gmra.mxu1 %vm546_vm1, %v6151_v42  ;;  %1815 = vmatprep.mubr.f32.mxu0 %v9643_v53  ;;  %v494_v42 = vld [vmem:[%s9568_s5 + $0x1b0] sm:$0xff] }
 0x168   :  { %874 = vmatprep.mubr.f32.mxu1 %v9643_v53  ;;  %1097 = vmatpush1.msra.mxu1 %v494_v42  ;;  %v1298_v42 = vld [vmem:[%s9570_s7 + $0x1d8] sm:$0xff] }
 0x16a   :  { %4531 = vmatmul.mubr.msk.f32.gmra.mxu0 %vm546_vm1, %v6548_v29 }
 0x16b   :  { %4454 = vmatmul.mubr.msk.f32.gmra.mxu1 %vm546_vm1, %v6159_v43  ;;  %1821 = vmatprep.mubr.f32.mxu0 %v9643_v53 }
 0x16c   :  { %880 = vmatprep.mubr.f32.mxu1 %v9643_v53 }
 0x16e   :  { %4532 = vmatmul.mubr.msk.f32.gmra.mxu0 %vm546_vm1, %v6569_v1 }
 0x16f   :  { %4455 = vmatmul.mubr.msk.f32.gmra.mxu1 %vm546_vm1, %v6167_v44  ;;  %1827 = vmatprep.mubr.f32.mxu0 %v9643_v53  ;;  %v6863_v44 = vpop.f32.mrf.mxu0 }
 0x170   :  { %886 = vmatprep.mubr.f32.mxu1 %v9643_v53  ;;  %9645 = vst [vmem:[#allocation24_spill] sm:$0xff] %v6863_v44 }
 0x172   :  { %4533 = vmatmul.mubr.msk.f32.gmra.mxu0 %vm546_vm1, %v6591_v5 }
 0x173   :  { %4456 = vmatmul.mubr.msk.f32.gmra.mxu1 %vm546_vm1, %v6175_v45  ;;  %1833 = vmatprep.mubr.f32.mxu0 %v9643_v53  ;;  %v487_v45 = vld [vmem:[%s9568_s5 + $0x178] sm:$0xff] }
 0x174   :  { %892 = vmatprep.mubr.f32.mxu1 %v9643_v53  ;;  %1098 = vmatprep.subr.mxu1 %v487_v45 }
 0x176   :  { %4534 = vmatmul.mubr.msk.f32.gmra.mxu0 %vm546_vm1, %v6612_v3 }
 0x177   :  { %4457 = vmatmul.mubr.msk.f32.gmra.mxu1 %vm546_vm1, %v6183_v46  ;;  %1839 = vmatprep.mubr.f32.mxu0 %v9643_v53  ;;  %v486_v46 = vld [vmem:[%s9568_s5 + $0x170] sm:$0xff] }
 0x178   :  { %898 = vmatprep.mubr.f32.mxu1 %v9643_v53  ;;  %1099 = vmatpush1.msra.mxu1 %v486_v46  ;;  %v1290_v46 = vld [vmem:[%s9570_s7 + $0x198] sm:$0xff] }
 0x17a   :  { %4535 = vmatmul.mubr.msk.f32.gmra.mxu0 %vm546_vm1, %v6640_v19 }
 0x17b   :  { %4458 = vmatmul.mubr.msk.f32.gmra.mxu1 %vm546_vm1, %v6191_v47  ;;  %1845 = vmatprep.mubr.f32.mxu0 %v9643_v53 }
 0x17c   :  { %904 = vmatprep.mubr.f32.mxu1 %v9643_v53 }
 0x17e   :  { %4536 = vmatmul.mubr.msk.f32.gmra.mxu0 %vm546_vm1, %v6666_v14 }
 0x17f   :  { %4459 = vmatmul.mubr.msk.f32.gmra.mxu1 %vm546_vm1, %v6199_v48  ;;  %1851 = vmatprep.mubr.f32.mxu0 %v9643_v53  ;;  %v6871_v48 = vpop.f32.mrf.mxu0 }
 0x180   :  { %910 = vmatprep.mubr.f32.mxu1 %v9643_v53  ;;  %9646 = vst [vmem:[#allocation25_spill] sm:$0xff] %v6871_v48 }
 0x181   :  { %v6879_v27 = vpop.f32.mrf.mxu0 }
 0x182   :  { %4537 = vmatmul.mubr.msk.f32.gmra.mxu0 %vm546_vm1, %v6692_v30  ;;  %9647 = vst [vmem:[#allocation26_spill] sm:$0xff] %v6879_v27 }
 0x183   :  { %4460 = vmatmul.mubr.msk.f32.gmra.mxu1 %vm546_vm1, %v6207_v49  ;;  %1857 = vmatprep.mubr.f32.mxu0 %v9643_v53  ;;  %v479_v49 = vld [vmem:[%s9568_s5 + $0x138] sm:$0xff]  ;;  %v6887_v63 = vpop.f32.mrf.mxu0 }
 0x184   :  { %1142 = vmatprep.mubr.f32.mxu1 %v9643_v53  ;;  %1100 = vmatprep.subr.mxu1 %v479_v49  ;;  %9648 = vst [vmem:[#allocation27_spill] sm:$0xff] %v6887_v63  ;;  %v1289_v49 = vld [vmem:[%s9570_s7 + $0x190] sm:$0xff] }
 0x185   :  { %1101 = vmatpush1.msra.mxu1 %v478_v60  ;;  %v6895_v35 = vpop.f32.mrf.mxu0 }
 0x186   :  { %4538 = vmatmul.mubr.msk.f32.gmra.mxu0 %vm546_vm1, %v6708_v26  ;;  %1102 = vmatprep.subr.mxu1 %v471_v25  ;;  %9649 = vst [vmem:[#allocation28_spill] sm:$0xff] %v6895_v35  ;;  %v1281_v25 = vld [vmem:[%s9570_s7 + $0x150] sm:$0xff] }
 0x187   :  { %1863 = vmatprep.mubr.f32.mxu0 %v9643_v53  ;;  %1103 = vmatpush1.msra.mxu1 %v470_v16  ;;  %v6903_v38 = vpop.f32.mrf.mxu0 }
 0x188   :  { %1104 = vmatprep.subr.mxu1 %v463_v13  ;;  %9650 = vst [vmem:[#allocation29_spill] sm:$0xff] %v6903_v38  ;;  %v5842_v13 = vld [vmem:[%s9565_s2 + $0x8] sm:$0xff] }
 0x189   :  { %1105 = vmatpush1.msra.mxu1 %v462_v34  ;;  %v1273_v34 = vld [vmem:[%s9570_s7 + $0x110] sm:$0xff] }
 0x18a   :  { %4539 = vmatmul.mubr.msk.f32.gmra.mxu0 %vm546_vm1, %v6728_v20  ;;  %1106 = vmatprep.subr.mxu1 %v455_v56  ;;  %v1266_v56 = vld [vmem:[%s9570_s7 + $0xd8] sm:$0xff] }
 0x18b   :  { %1869 = vmatprep.mubr.f32.mxu0 %v9643_v53  ;;  %1107 = vmatpush1.msra.mxu1 %v454_v15  ;;  %v1265_v15 = vld [vmem:[%s9570_s7 + $0xd0] sm:$0xff] }
 0x18c   :  { %1108 = vmatprep.subr.mxu1 %v447_v39  ;;  %v1258_v39 = vld [vmem:[%s9570_s7 + $0x98] sm:$0xff] }
 0x18d   :  { %1109 = vmatpush1.msra.mxu1 %v446_v40  ;;  %v5843_v40 = vld [vmem:[%s9565_s2 + $0x10] sm:$0xff] }
 0x18e   :  { %4540 = vmatmul.mubr.msk.f32.gmra.mxu0 %vm546_vm1, %v6745_v23  ;;  %1570 = vmatprep.subr.mxu1 %v1298_v42  ;;  %v1257_v42 = vld [vmem:[%s9570_s7 + $0x90] sm:$0xff] }
 0x18f   :  { %5004 = vmatprep.mubr.msk.f32.mxu0 %vm5903_vm2, %v9643_v53 }
 0x1b0   :  { %v2053_v41 = vpop.xlane.xlu0 %2052 }
 0x1b1   :  { %v2054_v43 = vrot.slane %v2053_v41, 4 }
 0x1b3   :  { %v2055_v47 = vmax.f32 %v2053_v41, %v2054_v43  ;;  %v6911_v41 = vpop.f32.mrf.mxu0  ;;  %v1297_v43 = vld [vmem:[%s9570_s7 + $0x1d0] sm:$0xff] }
 0x1b4   :  { %9651 = vst [vmem:[#allocation30_spill] sm:$0xff] %v6911_v41 }
 0x1b5   :  { %v2056_v9 = vrot.slane %v2055_v47, 2  ;;  %v6919_v45 = vpop.f32.mrf.mxu0 }
 0x1b6   :  { %9652 = vst [vmem:[#allocation31_spill] sm:$0xff] %v6919_v45 }
 0x1b7   :  { %v2057_v11 = vmax.f32 %v2055_v47, %v2056_v9  ;;  %v5841_v47 = vld [vmem:[%s9565_s2] sm:$0xff]  ;;  %v6931_v60 = vpop.f32.mrf.mxu0  ;;  %v1282_v9 = vld [vmem:[%s9570_s7 + $0x158] sm:$0xff] }
 0x1b8   :  { %4477 = vmatmul.mubr.msk.f32.vlgmr.msra.gmra.mxu1 %vm546_vm1, %v5841_v47  ;;  %9653 = vst [vmem:[#allocation32_spill] sm:$0xff] %v6931_v60  ;;  %v1249_v47 = vld [vmem:[%s9570_s7 + $0x50] sm:$0xff] }
 0x1b9   :  { %v2058_v12 = vrot.slane %v2057_v11, 1  ;;  %1148 = vmatprep.mubr.f32.mxu1 %v9643_v53  ;;  %1571 = vmatpush1.msra.mxu1 %v1297_v43  ;;  %v6940_v16 = vpop.f32.mrf.mxu0 }
 0x1ba   :  { %1572 = vmatprep.subr.mxu1 %v1290_v46  ;;  %9654 = vst [vmem:[#allocation33_spill] sm:$0xff] %v6940_v16  ;;  %v1250_v46 = vld [vmem:[%s9570_s7 + $0x58] sm:$0xff] }
 0x1bb   :  { %v2059_v36 = vmax.f32 %v2057_v11, %v2058_v12  ;;  %1573 = vmatpush1.msra.mxu1 %v1289_v49  ;;  %v1274_v11 = vld [vmem:[%s9570_s7 + $0x118] sm:$0xff]  ;;  %v6952_v12 = vpop.f32.mrf.mxu0 }
 0x1bc   :  { %4478 = vmatmul.mubr.msk.f32.gmra.mxu1 %vm546_vm1, %v5842_v13  ;;  %1574 = vmatprep.subr.mxu1 %v1282_v9  ;;  %9655 = vst [vmem:[#allocation34_spill] sm:$0xff] %v6952_v12  ;;  %v1242_v9 = vld [vmem:[%s9570_s7 + $0x18] sm:$0xff] }
 0x1bd   :  { %5532 = vpush %v2059_v36  ;;  %1154 = vmatprep.mubr.f32.mxu1 %v9643_v53  ;;  %1575 = vmatpush1.msra.mxu1 %v1281_v25  ;;  %v6961_v36 = vpop.f32.mrf.mxu0  ;;  %v5844_v25 = vld [vmem:[%s9565_s2 + $0x18] sm:$0xff] }
 0x1be   :  { %1576 = vmatprep.subr.mxu1 %v1274_v11  ;;  %9656 = vst [vmem:[#allocation35_spill] sm:$0xff] %v6961_v36  ;;  %v1241_v11 = vld [vmem:[%s9570_s7 + $0x10] sm:$0xff] }
 0x1bf   :  { %1577 = vmatpush1.msra.mxu1 %v1273_v34  ;;  %v6973_v43 = vpop.f32.mrf.mxu0 }
 0x1c0   :  { %4479 = vmatmul.mubr.msk.f32.gmra.mxu1 %vm546_vm1, %v5843_v40  ;;  %1578 = vmatprep.subr.mxu1 %v1266_v56  ;;  %9657 = vst [vmem:[#allocation36_spill] sm:$0xff] %v6973_v43  ;;  %v5845_v56 = vld [vmem:[%s9565_s2 + $0x20] sm:$0xff]  ;;  %v5846_v40 = vld [vmem:[%s9565_s2 + $0x28] sm:$0xff] }
 0x1c1   :  { %1160 = vmatprep.mubr.f32.mxu1 %v9643_v53  ;;  %1579 = vmatpush1.msra.mxu1 %v1265_v15  ;;  %v6982_v49 = vpop.f32.mrf.mxu0 }
 0x1c2   :  { %1580 = vmatprep.subr.mxu1 %v1258_v39  ;;  %9658 = vst [vmem:[#allocation37_spill] sm:$0xff] %v6982_v49 }
 0x1c3   :  { %1581 = vmatpush1.msra.mxu1 %v1257_v42  ;;  %v6994_v13 = vpop.f32.mrf.mxu0 }
 0x1c4   :  { %4480 = vmatmul.mubr.msk.f32.gmra.mxu1 %vm546_vm1, %v5844_v25  ;;  %1582 = vmatprep.subr.mxu1 %v1250_v46  ;;  %9659 = vst [vmem:[#allocation38_spill] sm:$0xff] %v6994_v13 }
 0x1c5   :  { %1166 = vmatprep.mubr.f32.mxu1 %v9643_v53  ;;  %1583 = vmatpush1.msra.mxu1 %v1249_v47  ;;  %v6997_v34 = vpop.f32.mrf.mxu0  ;;  %v5847_v47 = vld [vmem:[%s9565_s2 + $0x30] sm:$0xff] }
 0x1c6   :  { %1584 = vmatprep.subr.mxu1 %v1242_v9  ;;  %9660 = vst [vmem:[#allocation39_spill] sm:$0xff] %v6997_v34 }
 0x1c7   :  { %1585 = vmatpush1.msra.mxu1 %v1241_v11  ;;  %v7003_v15 = vpop.f32.mrf.mxu0  ;;  %v5848_v11 = vld [vmem:[%s9565_s2 + $0x38] sm:$0xff] }
 0x1c8   :  { %4481 = vmatmul.mubr.msk.f32.gmra.mxu1 %vm546_vm1, %v5845_v56  ;;  %9661 = vst [vmem:[#allocation40_spill] sm:$0xff] %v7003_v15 }
 0x1c9   :  { %1172 = vmatprep.mubr.f32.mxu1 %v9643_v53  ;;  %v7006_v39 = vpop.f32.mrf.mxu0 }
 0x1ca   :  { %9662 = vst [vmem:[#allocation41_spill] sm:$0xff] %v7006_v39 }
 0x1cb   :  { %v7012_v42 = vpop.f32.mrf.mxu0 }
 0x1cc   :  { %4482 = vmatmul.mubr.msk.f32.gmra.mxu1 %vm546_vm1, %v5846_v40  ;;  %9663 = vst [vmem:[#allocation42_spill] sm:$0xff] %v7012_v42 }
 0x1cd   :  { %1178 = vmatprep.mubr.f32.mxu1 %v9643_v53  ;;  %v7015_v46 = vpop.f32.mrf.mxu0 }
 0x1ce   :  { %9664 = vst [vmem:[#allocation43_spill] sm:$0xff] %v7015_v46 }
 0x1cf   :  { %v7021_v9 = vpop.f32.mrf.mxu0 }
 0x1d0   :  { %4483 = vmatmul.mubr.msk.f32.gmra.mxu1 %vm546_vm1, %v5847_v47  ;;  %9665 = vst [vmem:[#allocation44_spill] sm:$0xff] %v7021_v9  ;;  %v5849_v47 = vld [vmem:[%s9565_s2 + $0x40] sm:$0xff] }
 0x1d1   :  { %1184 = vmatprep.mubr.f32.mxu1 %v9643_v53  ;;  %v7024_v25 = vpop.f32.mrf.mxu0 }
 0x1d2   :  { %9666 = vst [vmem:[#allocation45_spill] sm:$0xff] %v7024_v25 }
 0x1d3   :  { %v7030_v56 = vpop.f32.mrf.mxu0 }
 0x1d4   :  { %4484 = vmatmul.mubr.msk.f32.gmra.mxu1 %vm546_vm1, %v5848_v11  ;;  %9667 = vst [vmem:[#allocation46_spill] sm:$0xff] %v7030_v56  ;;  %v5850_v11 = vld [vmem:[%s9565_s2 + $0x48] sm:$0xff] }
 0x1d5   :  { %1190 = vmatprep.mubr.f32.mxu1 %v9643_v53  ;;  %v7033_v40 = vpop.f32.mrf.mxu0 }
 0x1d6   :  { %9668 = vst [vmem:[#allocation47_spill] sm:$0xff] %v7033_v40 }
 0x1d7   :  { %v7039_v9 = vpop.f32.mrf.mxu0 }
 0x1d8   :  { %4485 = vmatmul.mubr.msk.f32.gmra.mxu1 %vm546_vm1, %v5849_v47  ;;  %9669 = vst [vmem:[#allocation48_spill] sm:$0xff] %v7039_v9  ;;  %v5851_v47 = vld [vmem:[%s9565_s2 + $0x50] sm:$0xff] }
 0x1d9   :  { %1196 = vmatprep.mubr.f32.mxu1 %v9643_v53  ;;  %v7042_v25 = vpop.f32.mrf.mxu0 }
 0x1da   :  { %9670 = vst [vmem:[#allocation49_spill] sm:$0xff] %v7042_v25 }
 0x1db   :  { %v7048_v56 = vpop.f32.mrf.mxu0 }
 0x1dc   :  { %4486 = vmatmul.mubr.msk.f32.gmra.mxu1 %vm546_vm1, %v5850_v11  ;;  %9671 = vst [vmem:[#allocation50_spill] sm:$0xff] %v7048_v56  ;;  %v5852_v11 = vld [vmem:[%s9565_s2 + $0x58] sm:$0xff] }
 0x1dd   :  { %1202 = vmatprep.mubr.f32.mxu1 %v9643_v53  ;;  %v7051_v40 = vpop.f32.mrf.mxu0 }
 0x1de   :  { %9672 = vst [vmem:[#allocation51_spill] sm:$0xff] %v7051_v40 }
 0x1df   :  { %v7057_v9 = vpop.f32.mrf.mxu0 }
 0x1e0   :  { %4487 = vmatmul.mubr.msk.f32.gmra.mxu1 %vm546_vm1, %v5851_v47  ;;  %9673 = vst [vmem:[#allocation52_spill] sm:$0xff] %v7057_v9 }
 0x1e1   :  { %1208 = vmatprep.mubr.f32.mxu1 %v9643_v53  ;;  %v7060_v25 = vpop.f32.mrf.mxu0 }
 0x1e2   :  { %9674 = vst [vmem:[#allocation53_spill] sm:$0xff] %v7060_v25 }
 0x1e3   :  { %v7066_v56 = vpop.f32.mrf.mxu0 }
 0x1e4   :  { %4488 = vmatmul.mubr.msk.f32.gmra.mxu1 %vm546_vm1, %v5852_v11  ;;  %9675 = vst [vmem:[#allocation54_spill] sm:$0xff] %v7066_v56  ;;  %v5853_v11 = vld [vmem:[%s9565_s2 + $0x60] sm:$0xff] }
 0x1e5   :  { %1214 = vmatprep.mubr.f32.mxu1 %v9643_v53  ;;  %v7071_v47 = vpop.f32.mrf.mxu0 }
 0x1e7   :  { %v7083_v56 = vpop.f32.mrf.mxu0 }
 0x1e8   :  { %4489 = vmatmul.mubr.msk.f32.gmra.mxu1 %vm546_vm1, %v5853_v11  ;;  %9676 = vst [vmem:[#allocation55_spill] sm:$0xff] %v7083_v56  ;;  %v5854_v11 = vld [vmem:[%s9565_s2 + $0x68] sm:$0xff] }
 0x1e9   :  { %1220 = vmatprep.mubr.f32.mxu1 %v9643_v53  ;;  %v7088_v15 = vpop.f32.mrf.mxu0 }
 0x1eb   :  { %v7096_v34 = vpop.f32.mrf.mxu0 }
 0x1ec   :  { %4490 = vmatmul.mubr.msk.f32.gmra.mxu1 %vm546_vm1, %v5854_v11  ;;  %9677 = vst [vmem:[#allocation56_spill] sm:$0xff] %v7096_v34  ;;  %v1246_v34 = vld [vmem:[%s9570_s7 + $0x38] sm:$0xff] }
 0x1ed   :  { %1226 = vmatprep.mubr.f32.mxu1 %v9643_v53 }
 0x1ee   :  { %s5533_s16 = spop %5532 }
 0x1ef   :  { %v7069_v40 = vstv %s5533_s16 }
 0x1f0   :  { %v2077_v9 = vsub.f32 %v6491_v28, %v7069_v40  ;;  %v2076_v25 = vsub.f32 %v6480_v6, %v7069_v40  ;;  %v2075_v46 = vsub.f32 %v6465_v62, %v7069_v40  ;;  %v2074_v28 = vsub.f32 %v6473_v0, %v7069_v40 }
 0x1f1   :  { %v2073_v62 = vsub.f32 %v6463_v58, %v7069_v40  ;;  %v2072_v0 = vsub.f32 %v6457_v8, %v7069_v40  ;;  %v2071_v58 = vsub.f32 %v6449_v55, %v7069_v40  ;;  %v2062_v55 = vsub.f32 %v6413_v17, %v7069_v40 }
 0x1f2   :  { %v2108_v42 = vmul.f32 1.442695, %v2077_v9  ;;  %v2106_v39 = vmul.f32 1.442695, %v2076_v25  ;;  %v2104_v6 = vmul.f32 1.442695, %v2075_v46  ;;  %v2068_v17 = vsub.f32 %v6425_v22, %v7069_v40 }
 0x1f3   :  { %v2102_v9 = vmul.f32 1.442695, %v2074_v28  ;;  %v2100_v46 = vmul.f32 1.442695, %v2073_v62  ;;  %v5855_v25 = vld [vmem:[%s9565_s2 + $0x70] sm:$0xff]  ;;  %v9680_v22 = vld [vmem:[#allocation12_spill] sm:$0xff] }
 0x1f4   :  { %5567 = vpow2.f32 %v2108_v42  ;;  %v7101_v42 = vpop.f32.mrf.mxu0  ;;  %4491 = vmatmul.mubr.msk.f32.gmra.mxu1 %vm546_vm1, %v5855_v25  ;;  %v2098_v8 = vmul.f32 1.442695, %v2072_v0  ;;  %v2096_v11 = vmul.f32 1.442695, %v2071_v58  ;;  %v2069_v25 = vsub.f32 %v6433_v24, %v7069_v40 }
 0x1f5   :  { %5569 = vpow2.f32 %v2106_v39  ;;  %v2070_v39 = vsub.f32 %v6453_v31, %v7069_v40  ;;  %1232 = vmatprep.mubr.f32.mxu1 %v9643_v53  ;;  %v5856_v31 = vld [vmem:[%s9565_s2 + $0x78] sm:$0xff]  ;;  %v2065_v24 = vsub.f32 %v6435_v50, %v7069_v40  ;;  %v2078_v58 = vmul.f32 1.442695, %v2062_v55  ;;  %v7149_v55 = vpop.f32.mrf.mxu1 }
 0x1f6   :  { %5571 = vpow2.f32 %v2104_v6  ;;  %v7111_v28 = vpop.f32.mrf.mxu0  ;;  %v2063_v6 = vsub.f32 %v6421_v4, %v7069_v40  ;;  %v2064_v4 = vsub.f32 %v6427_v32, %v7069_v40  ;;  %v2067_v32 = vsub.f32 %v6415_v18, %v7069_v40  ;;  %9682 = vst [vmem:[#allocation59_spill] sm:$0xff] %v7149_v55 }
 0x1f7   :  { %9678 = vst [vmem:[#allocation57_spill] sm:$0xff] %v7111_v28  ;;  %5573 = vpow2.f32 %v2102_v9  ;;  %v2094_v9 = vmul.f32 1.442695, %v2070_v39  ;;  %v2092_v39 = vmul.f32 1.442695, %v2069_v25 }
 0x1f8   :  { %v7118_v62 = vpop.f32.mrf.mxu0  ;;  %5575 = vpow2.f32 %v2100_v46  ;;  %4492 = vmatmul.mubr.msk.f32.gmra.mxu1 %vm546_vm1, %v5856_v31  ;;  %v2080_v46 = vmul.f32 1.442695, %v2063_v6  ;;  %v2082_v6 = vmul.f32 1.442695, %v2064_v4  ;;  %v2090_v50 = vmul.f32 1.442695, %v2068_v17  ;;  %v7166_v17 = vpop.f32.mrf.mxu1 }
 0x1f9   :  { %1618 = vmatprep.mubr.f32.mxu1 %v9643_v53  ;;  %5577 = vpow2.f32 %v2098_v8  ;;  %v2066_v8 = vsub.f32 %v9680_v22, %v7069_v40  ;;  %v2088_v40 = vmul.f32 1.442695, %v2067_v32  ;;  %9684 = vst [vmem:[#allocation61_spill] sm:$0xff] %v7166_v17 }
 0x1fa   :  { %v7128_v0 = vpop.f32.mrf.mxu0  ;;  %5579 = vpow2.f32 %v2096_v11 }
 0x1fb   :  { %9679 = vst [vmem:[#allocation58_spill] sm:$0xff] %v7128_v0  ;;  %5581 = vpow2.f32 %v2094_v9  ;;  %v2086_v9 = vmul.f32 1.442695, %v2066_v8 }
 0x1fc   :  { %v7135_v13 = vpop.f32.mrf.mxu0  ;;  %4509 = vmatmul.mubr.msk.f32.vlgmr.msra.gmra.mxu1 %vm546_vm1, %v6367_v51  ;;  %5583 = vpow2.f32 %v2080_v46  ;;  %v2084_v51 = vmul.f32 1.442695, %v2065_v24 }
 0x1fd   :  { %1624 = vmatprep.mubr.f32.mxu1 %v9643_v53  ;;  %5585 = vpow2.f32 %v2078_v58 }
 0x1fe   :  { %v7145_v49 = vpop.f32.mrf.mxu0  ;;  %5587 = vpow2.f32 %v2092_v39  ;;  %v7183_v39 = vpop.f32.mrf.mxu1 }
 0x1ff   :  { %9681 = vst [vmem:[#allocation12_spill] sm:$0xff] %v7145_v49  ;;  %5589 = vpow2.f32 %v2082_v6  ;;  %9686 = vst [vmem:[#allocation63_spill] sm:$0xff] %v7183_v39 }
 0x200   :  { %v7154_v11 = vpop.f32.mrf.mxu0  ;;  %4510 = vmatmul.mubr.msk.f32.gmra.mxu1 %vm546_vm1, %v6375_v54  ;;  %5591 = vpow2.f32 %v2090_v50 }
 0x201   :  { %v7141_v31 = vpop.eup %5567  ;;  %1630 = vmatprep.mubr.f32.mxu1 %v9643_v53  ;;  %5593 = vpow2.f32 %v2084_v51  ;;  %v7205_v51 = vpop.f32.mrf.mxu1 }
 0x202   :  { %4973 = vmatpush3.msra.mxu0 %v7141_v31  ;;  %v7151_v18 = vpop.eup %5569  ;;  %v7162_v4 = vpop.f32.mrf.mxu0  ;;  %5595 = vpow2.f32 %v2088_v40  ;;  %9688 = vst [vmem:[#allocation65_spill] sm:$0xff] %v7205_v51 }
 0x203   :  { %4974 = vmatprep.subr.mxu0 %v9643_v53  ;;  %v7159_v25 = vpop.eup %5571  ;;  %9683 = vst [vmem:[#allocation60_spill] sm:$0xff] %v7162_v4  ;;  %5597 = vpow2.f32 %v2086_v9 }
 0x204   :  { %4975 = vmatpush3.msra.mxu0 %v7151_v18  ;;  %v7168_v46 = vpop.eup %5573  ;;  %v7171_v54 = vpop.f32.mrf.mxu0  ;;  %4511 = vmatmul.mubr.msk.f32.gmra.mxu1 %vm546_vm1, %v6383_v57  ;;  %v7194_v57 = vld [vmem:[%s9564_s1 + $0x18] sm:$0xff] }
 0x205   :  { %4976 = vmatprep.subr.mxu0 %v9643_v53  ;;  %v7176_v24 = vpop.eup %5575  ;;  %1636 = vmatprep.mubr.f32.mxu1 %v9643_v53 }
 0x206   :  { %4977 = vmatpush3.msra.mxu0 %v7159_v25  ;;  %v7179_v58 = vpop.f32.mrf.mxu0  ;;  %v7185_v32 = vpop.eup %5577 }
 0x207   :  { %4978 = vmatprep.subr.mxu0 %v9643_v53  ;;  %9685 = vst [vmem:[#allocation62_spill] sm:$0xff] %v7179_v58  ;;  %v7198_v8 = vpop.eup %5579  ;;  %v7214_v12 = vpop.f32.mrf.mxu1 }
 0x208   :  { %4979 = vmatpush3.msra.mxu0 %v7168_v46  ;;  %v7188_v22 = vpop.f32.mrf.mxu0  ;;  %4512 = vmatmul.mubr.msk.f32.gmra.mxu1 %vm546_vm1, %v7194_v57  ;;  %v5582_v50 = vpop.eup %5581 }
 0x209   :  { %4980 = vmatprep.subr.mxu0 %v9643_v53  ;;  %1642 = vmatprep.mubr.f32.mxu1 %v9643_v53  ;;  %v5584_v40 = vpop.eup %5583 }
 0x20a   :  { %4981 = vmatpush3.msra.mxu0 %v7176_v24  ;;  %v7201_v6 = vpop.f32.mrf.mxu0  ;;  %v5586_v39 = vpop.eup %5585 }
 0x20b   :  { %4982 = vmatprep.subr.mxu0 %v9643_v53  ;;  %9687 = vst [vmem:[#allocation64_spill] sm:$0xff] %v7201_v6  ;;  %v5588_v17 = vpop.eup %5587  ;;  %v2110_v43 = vadd.f32 %v5586_v39, %v5584_v40 }
 0x20c   :  { %4983 = vmatpush3.msra.mxu0 %v7185_v32  ;;  %v7208_v9 = vpop.f32.mrf.mxu0  ;;  %4513 = vmatmul.mubr.msk.f32.gmra.mxu1 %vm546_vm1, %v6508_v7  ;;  %v5590_v36 = vpop.eup %5589 }
 0x20d   :  { %4984 = vmatprep.subr.mxu0 %v9643_v53  ;;  %1648 = vmatprep.mubr.f32.mxu1 %v9643_v53  ;;  %v5592_v51 = vpop.eup %5591  ;;  %v2111_v16 = vadd.f32 %v5590_v36, %v2110_v43  ;;  %v7221_v7 = vpop.f32.mrf.mxu1 }
 0x20e   :  { %4985 = vmatpush3.msra.mxu0 %v7198_v8  ;;  %v7217_v60 = vpop.f32.mrf.mxu0  ;;  %v5594_v45 = vpop.eup %5593 }
 0x20f   :  { %4986 = vmatprep.subr.mxu0 %v9643_v53  ;;  %9689 = vst [vmem:[#allocation66_spill] sm:$0xff] %v7217_v60  ;;  %v5596_v41 = vpop.eup %5595  ;;  %v2112_v38 = vadd.f32 %v5594_v45, %v2111_v16  ;;  %v7225_v63 = vpop.f32.mrf.mxu1 }
 0x210   :  { %4987 = vmatpush3.msra.mxu0 %v5582_v50  ;;  %4514 = vmatmul.mubr.msk.f32.gmra.mxu1 %vm546_vm1, %v6528_v61  ;;  %v5598_v35 = vpop.eup %5597  ;;  %v7228_v27 = vpop.f32.mrf.mxu0  ;;  %v110_v61 = vld [vmem:[%s9567_s4] sm:$0xff] }
 0x211   :  { %4988 = vmatprep.subr.mxu0 %v9643_v53  ;;  %1654 = vmatprep.mubr.f32.mxu1 %v9643_v53  ;;  %v2113_v43 = vadd.f32 %v5598_v35, %v2112_v38  ;;  %v7235_v16 = vpop.f32.mrf.mxu1  ;;  %v9690_v38 = vld [vmem:[#allocation10_spill] sm:$0xff] }
 0x212   :  { %4989 = vmatpush3.msra.mxu0 %v5588_v17  ;;  %v115_v37 = vrot.slane %v110_v61, %v9690_v38  ;;  %v7243_v56 = vpop.f32.mrf.mxu0 }
 0x213   :  { %4990 = vmatprep.subr.mxu0 %v9643_v53  ;;  %v2114_v48 = vadd.f32 %v5596_v41, %v2113_v43  ;;  %v7239_v44 = vpop.f32.mrf.mxu1 }
 0x214   :  { %4991 = vmatpush3.msra.mxu0 %v5592_v51  ;;  %4515 = vmatmul.mubr.msk.f32.gmra.mxu1 %vm546_vm1, %v6548_v29 }
 0x215   :  { %4992 = vmatprep.subr.mxu0 %v9643_v53  ;;  %1660 = vmatprep.mubr.f32.mxu1 %v9643_v53  ;;  %v2115_v55 = vadd.f32 %v5592_v51, %v2114_v48  ;;  %v7253_v48 = vpop.f32.mrf.mxu0 }
 0x216   :  { %4993 = vmatpush3.msra.mxu0 %v5596_v41  ;;  %v9691_v41 = vld [vmem:[#allocation5_spill] sm:$0xff] }
 0x217   :  { %4994 = vmatprep.subr.mxu0 %v9643_v53  ;;  %v2116_v29 = vadd.f32 %v5588_v17, %v2115_v55  ;;  %v7265_v55 = vpop.f32.mrf.mxu0 }
 0x218   :  { %4995 = vmatpush3.msra.mxu0 %v5598_v35  ;;  %4516 = vmatmul.mubr.msk.f32.gmra.mxu1 %vm546_vm1, %v6569_v1  ;;  %v7249_v35 = vpop.f32.mrf.mxu1 }
 0x219   :  { %4996 = vmatprep.subr.mxu0 %v9643_v53  ;;  %1666 = vmatprep.mubr.f32.mxu1 %v9643_v53  ;;  %v2117_v43 = vadd.f32 %v5582_v50, %v2116_v29 }
 0x21a   :  { %4997 = vmatpush3.msra.mxu0 %v5594_v45  ;;  %v223_v45 = vadd.f32 %v9691_v41, %v115_v37  ;;  %v1293_v41 = vld [vmem:[%s9570_s7 + $0x1b0] sm:$0xff] }
 0x21b   :  { %4998 = vmatprep.subr.mxu0 %v9643_v53  ;;  %v2118_v1 = vadd.f32 %v7198_v8, %v2117_v43  ;;  %v7274_v8 = vpop.f32.mrf.mxu0  ;;  %v1286_v43 = vld [vmem:[%s9570_s7 + $0x178] sm:$0xff] }
 0x21c   :  { %4999 = vmatpush3.msra.mxu0 %v5590_v36  ;;  %4517 = vmatmul.mubr.msk.f32.gmra.mxu1 %vm546_vm1, %v6591_v5  ;;  %v7258_v36 = vpop.f32.mrf.mxu1 }
 0x21d   :  { %5000 = vmatprep.subr.mxu0 %v9643_v53  ;;  %1672 = vmatprep.mubr.f32.mxu1 %v9643_v53  ;;  %v2119_v37 = vadd.f32 %v7185_v32, %v2118_v1  ;;  %v1285_v1 = vld [vmem:[%s9570_s7 + $0x170] sm:$0xff] }
 0x21e   :  { %5001 = vmatpush3.msra.mxu0 %v5584_v40  ;;  %v7270_v17 = vpop.f32.mrf.mxu1 }
 0x21f   :  { %5002 = vmatprep.subr.mxu0 %v9643_v53  ;;  %v2120_v5 = vadd.f32 %v7176_v24, %v2119_v37  ;;  %v7283_v24 = vpop.f32.mrf.mxu0  ;;  %v1278_v37 = vld [vmem:[%s9570_s7 + $0x138] sm:$0xff] }
 0x220   :  { %5003 = vmatpush3.msra.mxu0 %v5586_v39  ;;  %4518 = vmatmul.mubr.msk.f32.gmra.mxu1 %vm546_vm1, %v6612_v3  ;;  %v7279_v50 = vpop.f32.mrf.mxu1 }
 0x221   :  { %5005 = vmatmul.mubr.f32.vlgmr.msra.gmra.mxu0 %v223_v45  ;;  %5042 = vmatprep.subr.mxu0 %v9643_v53  ;;  %v2121_v39 = vadd.f32 %v7168_v46, %v2120_v5 }
 0x222   :  { %5074 = vmatprep.mubr.msk.f32.mxu0 %vm5903_vm2, %v9643_v53  ;;  %1678 = vmatprep.mubr.f32.mxu1 %v9643_v53  ;;  %v7288_v51 = vpop.f32.mrf.mxu1 }
 0x223   :  { %v2122_v32 = vadd.f32 %v7159_v25, %v2121_v39 }
 0x224   :  { %4519 = vmatmul.mubr.msk.f32.gmra.mxu1 %vm546_vm1, %v6640_v19  ;;  %v7291_v19 = vpop.f32.mrf.mxu0  ;;  %v7295_v25 = vpop.f32.mrf.mxu1 }
 0x225   :  { %1684 = vmatprep.mubr.f32.mxu1 %v9643_v53  ;;  %v2123_v3 = vadd.f32 %v7151_v18, %v2122_v32  ;;  %v1270_v32 = vld [vmem:[%s9570_s7 + $0xf8] sm:$0xff] }
 0x226   :  { %v7298_v18 = vpop.f32.mrf.mxu0 }
 0x227   :  { %v2124_v46 = vadd.f32 %v7141_v31, %v2123_v3  ;;  %v1269_v3 = vld [vmem:[%s9570_s7 + $0xf0] sm:$0xff] }
 0x228   :  { %4520 = vmatmul.mubr.msk.f32.gmra.mxu1 %vm546_vm1, %v6666_v14  ;;  %v7302_v14 = vpop.f32.mrf.mxu1  ;;  %v7305_v31 = vpop.f32.mrf.mxu0 }
 0x229   :  { %1690 = vmatprep.mubr.f32.mxu1 %v9643_v53  ;;  %2125 = vadd.xlane.f32.xlu0 %v2124_v46  ;;  %v7356_v46 = vld [vmem:[%s9571_s8] sm:$0xff] }
 0x22a   :  { %v7309_v40 = vpop.f32.mrf.mxu1  ;;  %v7318_v61 = vpop.f32.mrf.mxu0 }
 0x22c   :  { %4521 = vmatmul.mubr.msk.f32.gmra.mxu1 %vm546_vm1, %v6692_v30  ;;  %v1302_v30 = vld [vmem:[%s9570_s7 + $0x1f8] sm:$0xff]  ;;  %v7320_v29 = vpop.f32.mrf.mxu1  ;;  %v1543_v5 = vpop.f32.mrf.mxu0 }
 0x22d   :  { %1696 = vmatprep.mubr.f32.mxu1 %v9643_v53  ;;  %1892 = vmatprep.subr.mxu1 %v1302_v30 }
 0x22e   :  { %v7330_v45 = vpop.f32.mrf.mxu1 }
 0x230   :  { %4522 = vmatmul.mubr.msk.f32.gmra.mxu1 %vm546_vm1, %v6708_v26  ;;  %v1301_v26 = vld [vmem:[%s9570_s7 + $0x1f0] sm:$0xff]  ;;  %v7345_v39 = vpop.f32.mrf.mxu1 }
 0x231   :  { %1702 = vmatprep.mubr.f32.mxu1 %v9643_v53  ;;  %1893 = vmatpush1.msra.mxu1 %v1301_v26  ;;  %v1262_v26 = vld [vmem:[%s9570_s7 + $0xb8] sm:$0xff] }
 0x232   :  { %v7358_v30 = vpop.f32.mrf.mxu1 }
 0x234   :  { %4523 = vmatmul.mubr.msk.f32.gmra.mxu1 %vm546_vm1, %v6728_v20  ;;  %v1294_v20 = vld [vmem:[%s9570_s7 + $0x1b8] sm:$0xff] }
 0x235   :  { %1708 = vmatprep.mubr.f32.mxu1 %v9643_v53  ;;  %1894 = vmatprep.subr.mxu1 %v1294_v20  ;;  %v1261_v20 = vld [vmem:[%s9570_s7 + $0xb0] sm:$0xff] }
 0x236   :  { %1895 = vmatpush1.msra.mxu1 %v1293_v41  ;;  %v7366_v41 = vpop.f32.mrf.mxu0 }
 0x237   :  { %1896 = vmatprep.subr.mxu1 %v1286_v43  ;;  %v7368_v43 = vpop.f32.mrf.mxu1 }
 0x238   :  { %4524 = vmatmul.mubr.msk.f32.gmra.mxu1 %vm546_vm1, %v6745_v23  ;;  %v1277_v23 = vld [vmem:[%s9570_s7 + $0x130] sm:$0xff] }
 0x239   :  { %1940 = vmatprep.mubr.f32.mxu1 %v9643_v53  ;;  %1897 = vmatpush1.msra.mxu1 %v1285_v1  ;;  %v7372_v1 = vrot.slane %v7356_v46, %v9690_v38  ;;  %v1245_v38 = vld [vmem:[%s9570_s7 + $0x30] sm:$0xff] }
 0x23a   :  { %1898 = vmatprep.subr.mxu1 %v1278_v37  ;;  %v876_v37 = vpop.f32.mrf.mxu1 }
 0x23b   :  { %1899 = vmatpush1.msra.mxu1 %v1277_v23  ;;  %v1254_v23 = vld [vmem:[%s9570_s7 + $0x78] sm:$0xff]  ;;  %v1544_v6 = vadd.f32 %v1543_v5, %v7372_v1  ;;  %v7419_v5 = vadd.f32 %v7171_v54, %v7372_v1 }
 0x23c   :  { %1900 = vmatprep.subr.mxu1 %v1270_v32  ;;  %v1253_v32 = vld [vmem:[%s9570_s7 + $0x70] sm:$0xff]  ;;  %v7383_v28 = vpop.f32.mrf.mxu1 }
 0x23d   :  { %1901 = vmatpush1.msra.mxu1 %v1269_v3  ;;  %v1549_v3 = vpop.f32.mrf.mxu0 }
 0x23e   :  { %1902 = vmatprep.subr.mxu1 %v1262_v26  ;;  %v9692_v26 = vld [vmem:[#allocation9_spill] sm:$0xff]  ;;  %v1550_v0 = vadd.f32 %v1549_v3, %v7372_v1  ;;  %v7395_v4 = vpop.f32.mrf.mxu1  ;;  %v1538_v3 = vadd.f32 %v7305_v31, %v7372_v1  ;;  %v1514_v31 = vadd.f32 %v7228_v27, %v7372_v1 }
 0x23f   :  { %1903 = vmatpush1.msra.mxu1 %v1261_v20  ;;  %v7389_v20 = vsub.s32 2, %v9692_v26  ;;  %v7393_v49 = vsub.s32 3, %v9692_v26 }
 0x240   :  { %1904 = vmatprep.subr.mxu1 %v1254_v23  ;;  %v5858_v23 = vld [vmem:[%s9569_s6] sm:$0xff] }
 0x241   :  { %1905 = vmatpush1.msra.mxu1 %v1253_v32  ;;  %9693 = vst [vmem:[#allocation10_spill] sm:$0xff] %v7393_v49  ;;  %v7401_v58 = vrot.slane %v5858_v23, %v7389_v20  ;;  %v7405_v60 = vrot.slane %v5858_v23, %v7393_v49  ;;  %v5859_v32 = vld [vmem:[%s9564_s1] sm:$0xff]  ;;  %v7427_v23 = vadd.f32 %v7208_v9, %v7372_v1 }
 0x242   :  { %1906 = vmatprep.subr.mxu1 %v1246_v34  ;;  %v7411_v34 = vpop.f32.mrf.mxu1 }
 0x243   :  { %1907 = vmatpush1.msra.mxu1 %v1245_v38  ;;  %v7423_v38 = vadd.f32 %v7188_v22, %v7372_v1  ;;  %v7436_v54 = vadd.f32 %v7214_v12, %v7401_v58  ;;  %v7440_v22 = vadd.f32 %v7279_v50, %v7401_v58  ;;  %v7444_v9 = vadd.f32 %v7221_v7, %v7405_v60  ;;  %v5860_v12 = vld [vmem:[%s9564_s1 + $0x8] sm:$0xff] }
 0x244   :  { %4541 = vmatmul.mubr.msk.f32.vlgmr.msra.gmra.mxu1 %vm546_vm1, %v5859_v32  ;;  %5007 = vmatprep.subr.mxu1 %v9643_v53  ;;  %v888_v32 = vpop.f32.mrf.mxu1  ;;  %v7448_v49 = vadd.f32 %v7225_v63, %v7401_v58  ;;  %v7452_v27 = vadd.f32 %v7295_v25, %v7401_v58  ;;  %v1526_v63 = vadd.f32 %v7274_v8, %v7372_v1 }
 0x245   :  { %1946 = vmatprep.mubr.f32.mxu1 %v9643_v53  ;;  %5008 = vmatpush3.msra.mxu1 %v1550_v0  ;;  %v1532_v0 = vadd.f32 %v7291_v19, %v7372_v1  ;;  %9694 = vst [vmem:[#allocation5_spill] sm:$0xff] %v7440_v22  ;;  %9695 = vst [vmem:[#allocation67_spill] sm:$0xff] %v7444_v9  ;;  %v7465_v7 = vadd.f32 %v7288_v51, %v7405_v60 }
 0x246   :  { %5009 = vmatprep.subr.mxu1 %v9643_v53  ;;  %v890_v50 = vpop.f32.mrf.mxu1  ;;  %v7470_v19 = vadd.f32 %v7235_v16, %v7405_v60  ;;  %v7474_v25 = vadd.f32 %v7239_v44, %v7401_v58  ;;  %v7482_v8 = vadd.f32 %v7302_v14, %v7405_v60  ;;  %v7489_v16 = vadd.f32 %v7309_v40, %v7401_v58  ;;  %v5861_v40 = vld [vmem:[%s9564_s1 + $0x10] sm:$0xff] }
 0x247   :  { %5010 = vmatpush3.msra.mxu1 %v1544_v6  ;;  %v1520_v6 = vadd.f32 %v7253_v48, %v7372_v1  ;;  %9696 = vst [vmem:[#allocation68_spill] sm:$0xff] %v7465_v7  ;;  %v7478_v48 = vadd.f32 %v7249_v35, %v7405_v60  ;;  %v7493_v44 = vadd.f32 %v7320_v29, %v7405_v60 }
 0x248   :  { %4542 = vmatmul.mubr.msk.f32.gmra.mxu1 %vm546_vm1, %v5860_v12  ;;  %5011 = vmatprep.subr.mxu1 %v9643_v53  ;;  %9697 = vst [vmem:[#allocation69_spill] sm:$0xff] %v7470_v19  ;;  %9699 = vst [vmem:[#allocation71_spill] sm:$0xff] %v7482_v8  ;;  %v894_v51 = vpop.f32.mrf.mxu1  ;;  %v7497_v35 = vadd.f32 %v7358_v30, %v7401_v58  ;;  %v7501_v14 = vadd.f32 %v7258_v36, %v7401_v58 }
 0x249   :  { %1952 = vmatprep.mubr.f32.mxu1 %v9643_v53  ;;  %5012 = vmatpush3.msra.mxu1 %v1538_v3  ;;  %9698 = vst [vmem:[#allocation70_spill] sm:$0xff] %v7478_v48  ;;  %v2519_v3 = vmax.f32 %v7436_v54, %v7440_v22  ;;  %9700 = vst [vmem:[#allocation72_spill] sm:$0xff] %v7493_v44  ;;  %v2520_v12 = vmax.f32 %v7448_v49, %v7452_v27 }
 0x24a   :  { %5013 = vmatprep.subr.mxu1 %v9643_v53  ;;  %v7506_v26 = vadd.f32 %v876_v37, %v7401_v58  ;;  %v896_v29 = vpop.f32.mrf.mxu1  ;;  %v7515_v30 = vadd.f32 %v7270_v17, %v7405_v60  ;;  %v2760_v36 = vmax.f32 %v7444_v9, %v7465_v7  ;;  %v7521_v37 = vadd.f32 %v7330_v45, %v7401_v58 }
 0x24b   :  { %5014 = vmatpush3.msra.mxu1 %v1532_v0  ;;  %v2761_v0 = vmax.f32 %v7470_v19, %v7482_v8  ;;  %v7532_v17 = vadd.f32 %v7368_v43, %v7405_v60  ;;  %v7536_v7 = vadd.f32 %v7383_v28, %v7405_v60  ;;  %v2762_v8 = vmax.f32 %v7478_v48, %v7493_v44 }
 0x24c   :  { %4543 = vmatmul.mubr.msk.f32.gmra.mxu1 %vm546_vm1, %v5861_v40  ;;  %5015 = vmatprep.subr.mxu1 %v9643_v53  ;;  %9701 = vst [vmem:[#allocation73_spill] sm:$0xff] %v7515_v30  ;;  %v7528_v40 = vadd.f32 %v7345_v39, %v7405_v60  ;;  %v900_v45 = vpop.f32.mrf.mxu1  ;;  %v2523_v39 = vmax.f32 %v2519_v3, %v7497_v35 }
 0x24d   :  { %1958 = vmatprep.mubr.f32.mxu1 %v9643_v53  ;;  %5016 = vmatpush3.msra.mxu1 %v1526_v63  ;;  %9703 = vst [vmem:[#allocation75_spill] sm:$0xff] %v7532_v17  ;;  %v2521_v63 = vmax.f32 %v7474_v25, %v7489_v16  ;;  %v7546_v9 = vadd.f32 %v7395_v4, %v7401_v58 }
 0x24e   :  { %9702 = vst [vmem:[#allocation74_spill] sm:$0xff] %v7528_v40  ;;  %5017 = vmatprep.subr.mxu1 %v9643_v53  ;;  %v2524_v43 = vmax.f32 %v2520_v12, %v7506_v26  ;;  %v7550_v28 = vadd.f32 %v894_v51, %v7401_v58  ;;  %v7553_v19 = vadd.f32 %v900_v45, %v7401_v58  ;;  %v902_v22 = vpop.f32.mrf.mxu1 }
 0x24f   :  { %5018 = vmatpush3.msra.mxu1 %v1520_v6  ;;  %v2522_v3 = vmax.f32 %v7501_v14, %v7521_v37  ;;  %v7562_v4 = vadd.f32 %v7411_v34, %v7405_v60  ;;  %v7565_v6 = vadd.f32 %v888_v32, %v7401_v58  ;;  %v2763_v51 = vmax.f32 %v7515_v30, %v7528_v40 }
 0x250   :  { %4544 = vmatmul.mubr.msk.f32.gmra.mxu1 %vm546_vm1, %v7194_v57  ;;  %5019 = vmatprep.subr.mxu1 %v9643_v53  ;;  %v2764_v57 = vmax.f32 %v2760_v36, %v7532_v17  ;;  %v2765_v12 = vmax.f32 %v2761_v0, %v7536_v7  ;;  %v7573_v45 = vadd.f32 %v890_v50, %v7405_v60  ;;  %v906_v44 = vpop.f32.mrf.mxu1 }
 0x251   :  { %1964 = vmatprep.mubr.f32.mxu1 %v9643_v53  ;;  %5020 = vmatpush3.msra.mxu1 %v1514_v31  ;;  %v2525_v34 = vmax.f32 %v2521_v63, %v7546_v9  ;;  %v7578_v32 = vadd.f32 %v896_v29, %v7405_v60  ;;  %v7581_v31 = vadd.f32 %v902_v22, %v7405_v60  ;;  %v5862_v29 = vld [vmem:[%s9564_s1 + $0x20] sm:$0xff] }
 0x252   :  { %5021 = vmatprep.subr.mxu1 %v9643_v53  ;;  %v7584_v30 = vadd.f32 %v906_v44, %v7401_v58  ;;  %v1490_v50 = vadd.f32 %v7154_v11, %v7372_v1  ;;  %v2527_v36 = vmax.f32 %v2523_v39, %v7550_v28  ;;  %v2528_v0 = vmax.f32 %v2524_v43, %v7553_v19  ;;  %v908_v22 = vpop.f32.mrf.mxu1  ;;  %v7605_v39 = vpop.f32.mrf.mxu0 }
 0x253   :  { %5022 = vmatpush3.msra.mxu1 %v7427_v23  ;;  %v2766_v44 = vmax.f32 %v2762_v8, %v7562_v4  ;;  %v2526_v23 = vmax.f32 %v2522_v3, %v7565_v6  ;;  %v7599_v63 = vadd.f32 %v908_v22, %v7405_v60  ;;  %v1484_v11 = vadd.f32 %v7135_v13, %v7372_v1 }
 0x254   :  { %4545 = vmatmul.mubr.msk.f32.gmra.mxu1 %vm546_vm1, %v5862_v29  ;;  %5023 = vmatprep.subr.mxu1 %v9643_v53  ;;  %v2767_v43 = vmax.f32 %v2763_v51, %v7573_v45  ;;  %v912_v29 = vpop.f32.mrf.mxu1  ;;  %v2768_v8 = vmax.f32 %v2764_v57, %v7578_v32  ;;  %v2769_v3 = vmax.f32 %v2765_v12, %v7581_v31 }
 0x255   :  { %1970 = vmatprep.mubr.f32.mxu1 %v9643_v53  ;;  %5024 = vmatpush3.msra.mxu1 %v7423_v38  ;;  %v2529_v22 = vmax.f32 %v2525_v34, %v7584_v30  ;;  %v7613_v48 = vadd.f32 %v912_v29, %v7401_v58  ;;  %v1478_v13 = vadd.f32 %v7118_v62, %v7372_v1  ;;  %v5863_v38 = vld [vmem:[%s9564_s1 + $0x28] sm:$0xff]  ;;  %v7629_v62 = vpop.f32.mrf.mxu0 }
 0x256   :  { %5025 = vmatprep.subr.mxu1 %v9643_v53  ;;  %v914_v51 = vpop.f32.mrf.mxu1  ;;  %v2531_v57 = vmax.f32 %v2527_v36, %v2528_v0  ;;  %v2770_v12 = vmax.f32 %v2766_v44, %v7599_v63  ;;  %9704 = vst [vmem:[#allocation76_spill] sm:$0xff] %v7629_v62  ;;  %v2772_v29 = vmax.f32 %v2768_v8, %v2769_v3  ;;  %v5865_v8 = vld [vmem:[%s9564_s1 + $0x38] sm:$0xff]  ;;  %v5867_v3 = vld [vmem:[%s9564_s1 + $0x48] sm:$0xff] }
 0x257   :  { %5026 = vmatpush3.msra.mxu1 %v7419_v5  ;;  %v2530_v58 = vmax.f32 %v2526_v23, %v7613_v48  ;;  %v7626_v34 = vadd.f32 %v914_v51, %v7405_v60  ;;  %v1472_v5 = vadd.f32 %v7101_v42, %v7372_v1  ;;  %v5864_v60 = vld [vmem:[%s9564_s1 + $0x30] sm:$0xff]  ;;  %v7643_v23 = vpop.f32.mrf.mxu0  ;;  %v5869_v51 = vld [vmem:[%s9564_s1 + $0x58] sm:$0xff] }
 0x258   :  { %4546 = vmatmul.mubr.msk.f32.gmra.mxu1 %vm546_vm1, %v5863_v38  ;;  %5027 = vmatprep.subr.mxu1 %v9643_v53  ;;  %9705 = vst [vmem:[#allocation77_spill] sm:$0xff] %v7643_v23 }
 0x259   :  { %1976 = vmatprep.mubr.f32.mxu1 %v9643_v53  ;;  %5028 = vmatpush3.msra.mxu1 %v1490_v50  ;;  %v2771_v36 = vmax.f32 %v2767_v43, %v7626_v34  ;;  %v2532_v0 = vmax.f32 %v2529_v22, %v2530_v58  ;;  %v1466_v50 = vadd.f32 %v7088_v15, %v7372_v1  ;;  %v7654_v15 = vpop.f32.mrf.mxu0 }
 0x25a   :  { %5029 = vmatprep.subr.mxu1 %v9643_v53  ;;  %9706 = vst [vmem:[#allocation78_spill] sm:$0xff] %v7654_v15 }
 0x25b   :  { %5030 = vmatpush3.msra.mxu1 %v1484_v11  ;;  %v2533_v44 = vmax.f32 %v2531_v57, %v2532_v0  ;;  %v2773_v42 = vmax.f32 %v2770_v12, %v2771_v36  ;;  %v1460_v11 = vadd.f32 %v7071_v47, %v7372_v1  ;;  %v5866_v47 = vld [vmem:[%s9564_s1 + $0x40] sm:$0xff]  ;;  %v7663_v1 = vpop.f32.mrf.mxu0  ;;  %v5872_v0 = vld [vmem:[%s9564_s1 + $0x70] sm:$0xff] }
 0x25c   :  { %4547 = vmatmul.mubr.msk.f32.gmra.mxu1 %vm546_vm1, %v5864_v60  ;;  %5031 = vmatprep.subr.mxu1 %v9643_v53  ;;  %9707 = vst [vmem:[#allocation79_spill] sm:$0xff] %v7663_v1  ;;  %v5870_v12 = vld [vmem:[%s9564_s1 + $0x60] sm:$0xff]  ;;  %v5873_v60 = vld [vmem:[%s9564_s1 + $0x78] sm:$0xff] }
 0x25d   :  { %1982 = vmatprep.mubr.f32.mxu1 %v9643_v53  ;;  %5032 = vmatpush3.msra.mxu1 %v1478_v13  ;;  %v2774_v43 = vmax.f32 %v2772_v29, %v2773_v42  ;;  %v7670_v22 = vpop.f32.mrf.mxu0  ;;  %v5868_v13 = vld [vmem:[%s9564_s1 + $0x50] sm:$0xff] }
 0x25e   :  { %5033 = vmatprep.subr.mxu1 %v9643_v53  ;;  %2534 = vmax.xlane.f32.xlu0 %v2533_v44  ;;  %9708 = vst [vmem:[#allocation80_spill] sm:$0xff] %v7670_v22 }
 0x25f   :  { %5034 = vmatpush3.msra.mxu1 %v1472_v5  ;;  %v7677_v38 = vpop.f32.mrf.mxu0  ;;  %v5871_v5 = vld [vmem:[%s9564_s1 + $0x68] sm:$0xff] }
 0x260   :  { %4548 = vmatmul.mubr.msk.f32.gmra.mxu1 %vm546_vm1, %v5865_v8  ;;  %5035 = vmatprep.subr.mxu1 %v9643_v53  ;;  %9709 = vst [vmem:[#allocation81_spill] sm:$0xff] %v7677_v38 }
 0x261   :  { %1988 = vmatprep.mubr.f32.mxu1 %v9643_v53  ;;  %5036 = vmatpush3.msra.mxu1 %v1466_v50  ;;  %v7684_v57 = vpop.f32.mrf.mxu0 }
 0x262   :  { %5037 = vmatprep.subr.mxu1 %v9643_v53  ;;  %2775 = vmax.xlane.f32.xlu0 %v2774_v43  ;;  %9710 = vst [vmem:[#allocation82_spill] sm:$0xff] %v7684_v57 }
 0x263   :  { %5038 = vmatpush3.msra.mxu1 %v1460_v11  ;;  %v7691_v58 = vpop.f32.mrf.mxu0 }
 0x264   :  { %4549 = vmatmul.mubr.msk.f32.gmra.mxu1 %vm546_vm1, %v5866_v47  ;;  %5077 = vmatprep.subr.mxu1 %v9643_v53  ;;  %9711 = vst [vmem:[#allocation83_spill] sm:$0xff] %v7691_v58 }
 0x265   :  { %1994 = vmatprep.mubr.f32.mxu1 %v9643_v53  ;;  %v7698_v36 = vpop.f32.mrf.mxu0 }
 0x266   :  { %9712 = vst [vmem:[#allocation84_spill] sm:$0xff] %v7698_v36 }
 0x267   :  { %v7705_v29 = vpop.f32.mrf.mxu0 }
 0x268   :  { %4550 = vmatmul.mubr.msk.f32.gmra.mxu1 %vm546_vm1, %v5867_v3  ;;  %9713 = vst [vmem:[#allocation85_spill] sm:$0xff] %v7705_v29 }
 0x269   :  { %2000 = vmatprep.mubr.f32.mxu1 %v9643_v53  ;;  %v7715_v44 = vpop.f32.mrf.mxu0 }
 0x26a   :  { %9715 = vst [vmem:[#allocation87_spill] sm:$0xff] %v7715_v44 }
 0x26b   :  { %v7719_v11 = vpop.f32.mrf.mxu0 }
 0x26c   :  { %4551 = vmatmul.mubr.msk.f32.gmra.mxu1 %vm546_vm1, %v5868_v13  ;;  %9717 = vst [vmem:[#allocation89_spill] sm:$0xff] %v7719_v11 }
 0x26d   :  { %2006 = vmatprep.mubr.f32.mxu1 %v9643_v53  ;;  %v7725_v47 = vpop.f32.mrf.mxu0 }
 0x26e   :  { %9720 = vst [vmem:[#allocation92_spill] sm:$0xff] %v7725_v47 }
 0x270   :  { %4552 = vmatmul.mubr.msk.f32.gmra.mxu1 %vm546_vm1, %v5869_v51  ;;  %v7731_v51 = vpop.f32.mrf.mxu0 }
 0x271   :  { %2012 = vmatprep.mubr.f32.mxu1 %v9643_v53  ;;  %9723 = vst [vmem:[#allocation95_spill] sm:$0xff] %v7731_v51 }
 0x274   :  { %4553 = vmatmul.mubr.msk.f32.gmra.mxu1 %vm546_vm1, %v5870_v12 }
 0x275   :  { %2018 = vmatprep.mubr.f32.mxu1 %v9643_v53 }
 0x278   :  { %4554 = vmatmul.mubr.msk.f32.gmra.mxu1 %vm546_vm1, %v5871_v5  ;;  %v7713_v50 = vpop.f32.mrf.mxu1 }
 0x279   :  { %2024 = vmatprep.mubr.f32.mxu1 %v9643_v53  ;;  %9714 = vst [vmem:[#allocation86_spill] sm:$0xff] %v7713_v50 }
 0x27a   :  { %v7717_v42 = vpop.f32.mrf.mxu1 }
 0x27b   :  { %9716 = vst [vmem:[#allocation88_spill] sm:$0xff] %v7717_v42 }
 0x27c   :  { %4555 = vmatmul.mubr.msk.f32.gmra.mxu1 %vm546_vm1, %v5872_v0  ;;  %v7721_v43 = vpop.f32.mrf.mxu1  ;;  %v7737_v0 = vpop.f32.mrf.mxu0 }
 0x27d   :  { %2030 = vmatprep.mubr.f32.mxu1 %v9643_v53  ;;  %9718 = vst [vmem:[#allocation90_spill] sm:$0xff] %v7721_v43  ;;  %9726 = vst [vmem:[#allocation98_spill] sm:$0xff] %v7737_v0 }
 0x27e   :  { %v7723_v8 = vpop.f32.mrf.mxu1  ;;  %v7743_v1 = vpop.f32.mrf.mxu0 }
 0x27f   :  { %9719 = vst [vmem:[#allocation91_spill] sm:$0xff] %v7723_v8  ;;  %9729 = vst [vmem:[#allocation101_spill] sm:$0xff] %v7743_v1 }
 0x280   :  { %4556 = vmatmul.mubr.msk.f32.gmra.mxu1 %vm546_vm1, %v5873_v60  ;;  %v7727_v3 = vpop.f32.mrf.mxu1  ;;  %v7747_v58 = vpop.f32.mrf.mxu0 }
 0x281   :  { %5039 = vmatprep.mubr.msk.f32.mxu1 %vm5903_vm2, %v9643_v53  ;;  %9721 = vst [vmem:[#allocation93_spill] sm:$0xff] %v7727_v3  ;;  %9731 = vst [vmem:[#allocation103_spill] sm:$0xff] %v7747_v58 }
 0x282   :  { %v7729_v13 = vpop.f32.mrf.mxu1  ;;  %v7751_v11 = vpop.f32.mrf.mxu0 }
 0x283   :  { %9722 = vst [vmem:[#allocation94_spill] sm:$0xff] %v7729_v13  ;;  %9733 = vst [vmem:[#allocation105_spill] sm:$0xff] %v7751_v11  ;;  %v2294_v13 = vpop.xlane.xlu1 %2293 }
 0x284   :  { %v7733_v12 = vpop.f32.mrf.mxu1 }
 0x285   :  { %9724 = vst [vmem:[#allocation96_spill] sm:$0xff] %v7733_v12  ;;  %v7755_v12 = vpop.f32.mrf.mxu0 }
 0x286   :  { %v7735_v5 = vpop.f32.mrf.mxu1  ;;  %9735 = vst [vmem:[#allocation107_spill] sm:$0xff] %v7755_v12 }
 0x287   :  { %9725 = vst [vmem:[#allocation97_spill] sm:$0xff] %v7735_v5 }
 0x288   :  { %v7739_v60 = vpop.f32.mrf.mxu1 }
 0x289   :  { %9727 = vst [vmem:[#allocation99_spill] sm:$0xff] %v7739_v60  ;;  %v7759_v60 = vpop.f32.mrf.mxu0 }
 0x28a   :  { %v7741_v23 = vpop.f32.mrf.mxu1  ;;  %9737 = vst [vmem:[#allocation109_spill] sm:$0xff] %v7759_v60 }
 0x28b   :  { %9728 = vst [vmem:[#allocation100_spill] sm:$0xff] %v7741_v23  ;;  %v2295_v23 = vrot.slane %v2294_v13, 4  ;;  %v7763_v1 = vpop.f32.mrf.mxu0 }
 0x28c   :  { %v7745_v38 = vpop.f32.mrf.mxu1  ;;  %9739 = vst [vmem:[#allocation111_spill] sm:$0xff] %v7763_v1 }
 0x28d   :  { %9730 = vst [vmem:[#allocation102_spill] sm:$0xff] %v7745_v38  ;;  %v2296_v38 = vmax.f32 %v2294_v13, %v2295_v23 }
 0x28e   :  { %v7749_v29 = vpop.f32.mrf.mxu1 }
 0x28f   :  { %9732 = vst [vmem:[#allocation104_spill] sm:$0xff] %v7749_v29  ;;  %v7767_v29 = vpop.f32.mrf.mxu0  ;;  %v2297_v11 = vrot.slane %v2296_v38, 2 }
 0x290   :  { %v7753_v51 = vpop.f32.mrf.mxu1  ;;  %9741 = vst [vmem:[#allocation113_spill] sm:$0xff] %v7767_v29 }
 0x291   :  { %9734 = vst [vmem:[#allocation106_spill] sm:$0xff] %v7753_v51  ;;  %v7771_v50 = vpop.f32.mrf.mxu0  ;;  %v2298_v62 = vmax.f32 %v2296_v38, %v2297_v11 }
 0x292   :  { %v7757_v5 = vpop.f32.mrf.mxu1  ;;  %9743 = vst [vmem:[#allocation115_spill] sm:$0xff] %v7771_v50 }
 0x293   :  { %9736 = vst [vmem:[#allocation108_spill] sm:$0xff] %v7757_v5  ;;  %v7777_v22 = vpop.f32.mrf.mxu0  ;;  %v2299_v29 = vrot.slane %v2298_v62, 1 }
 0x294   :  { %v7761_v3 = vpop.f32.mrf.mxu1  ;;  %9746 = vst [vmem:[#allocation118_spill] sm:$0xff] %v7777_v22 }
 0x295   :  { %9738 = vst [vmem:[#allocation110_spill] sm:$0xff] %v7761_v3 }
 0x296   :  { %v7765_v8 = vpop.f32.mrf.mxu1 }
 0x297   :  { %9740 = vst [vmem:[#allocation112_spill] sm:$0xff] %v7765_v8 }
 0x298   :  { %v7769_v51 = vpop.f32.mrf.mxu1 }
 0x299   :  { %9742 = vst [vmem:[#allocation114_spill] sm:$0xff] %v7769_v51  ;;  %v7783_v51 = vpop.f32.mrf.mxu0 }
 0x29a   :  { %v7773_v5 = vpop.f32.mrf.mxu1  ;;  %9749 = vst [vmem:[#allocation121_spill] sm:$0xff] %v7783_v51 }
 0x29b   :  { %9744 = vst [vmem:[#allocation116_spill] sm:$0xff] %v7773_v5  ;;  %v2300_v5 = vmax.f32 %v2298_v62, %v2299_v29  ;;  %v7789_v38 = vpop.f32.mrf.mxu0 }
 0x29c   :  { %v7775_v15 = vpop.f32.mrf.mxu1  ;;  %9752 = vst [vmem:[#allocation124_spill] sm:$0xff] %v7789_v38 }
 0x29d   :  { %9745 = vst [vmem:[#allocation117_spill] sm:$0xff] %v7775_v15 }
 0x29e   :  { %v7779_v23 = vpop.f32.mrf.mxu1 }
 0x29f   :  { %9747 = vst [vmem:[#allocation119_spill] sm:$0xff] %v7779_v23 }
 0x2a0   :  { %v7781_v8 = vpop.f32.mrf.mxu1 }
 0x2a1   :  { %9748 = vst [vmem:[#allocation120_spill] sm:$0xff] %v7781_v8 }
 0x2a2   :  { %v7785_v36 = vpop.f32.mrf.mxu1 }
 0x2a3   :  { %9750 = vst [vmem:[#allocation122_spill] sm:$0xff] %v7785_v36 }
 0x2b2   :  { %v2126_v43 = vpop.xlane.xlu0 %2125 }
 0x2b3   :  { %v2127_v42 = vrot.slane %v2126_v43, 4 }
 0x2b5   :  { %v2128_v60 = vadd.f32 %v2127_v42, %v2126_v43  ;;  %v7787_v42 = vpop.f32.mrf.mxu1 }
 0x2b6   :  { %9751 = vst [vmem:[#allocation123_spill] sm:$0xff] %v7787_v42 }
 0x2b7   :  { %v2129_v3 = vrot.slane %v2128_v60, 2  ;;  %v7791_v11 = vpop.f32.mrf.mxu1 }
 0x2b8   :  { %9753 = vst [vmem:[#allocation125_spill] sm:$0xff] %v7791_v11 }
 0x2b9   :  { %v2130_v13 = vadd.f32 %v2129_v3, %v2128_v60  ;;  %v7793_v43 = vpop.f32.mrf.mxu1  ;;  %v7795_v3 = vpop.f32.mrf.mxu0 }
 0x2ba   :  { %9754 = vst [vmem:[#allocation126_spill] sm:$0xff] %v7793_v43  ;;  %9755 = vst [vmem:[#allocation127_spill] sm:$0xff] %v7795_v3 }
 0x2bb   :  { %v2131_v57 = vrot.slane %v2130_v13, 1  ;;  %v7797_v60 = vpop.f32.mrf.mxu1  ;;  %v7801_v8 = vpop.f32.mrf.mxu0 }
 0x2bc   :  { %9756 = vst [vmem:[#allocation128_spill] sm:$0xff] %v7797_v60  ;;  %9758 = vst [vmem:[#allocation130_spill] sm:$0xff] %v7801_v8 }
 0x2bd   :  { %v2132_v44 = vadd.f32 %v2131_v57, %v2130_v13  ;;  %v7799_v22 = vpop.f32.mrf.mxu1  ;;  %v7807_v29 = vpop.f32.mrf.mxu0 }
 0x2be   :  { %9757 = vst [vmem:[#allocation129_spill] sm:$0xff] %v7799_v22  ;;  %9761 = vst [vmem:[#allocation133_spill] sm:$0xff] %v7807_v29 }
 0x2bf   :  { %5534 = vpush %v2132_v44  ;;  %v7803_v57 = vpop.f32.mrf.mxu1  ;;  %v7813_v13 = vpop.f32.mrf.mxu0 }
 0x2c0   :  { %5536 = vpush %v2300_v5  ;;  %9759 = vst [vmem:[#allocation131_spill] sm:$0xff] %v7803_v57 }
 0x2c1   :  { %v7805_v62 = vpop.f32.mrf.mxu1  ;;  %9764 = vst [vmem:[#allocation136_spill] sm:$0xff] %v7813_v13  ;;  %v7819_v60 = vpop.f32.mrf.mxu0 }
 0x2c2   :  { %9760 = vst [vmem:[#allocation132_spill] sm:$0xff] %v7805_v62  ;;  %9766 = vst [vmem:[#allocation138_spill] sm:$0xff] %v7819_v60 }
 0x2c3   :  { %v7809_v44 = vpop.f32.mrf.mxu1  ;;  %v7825_v57 = vpop.f32.mrf.mxu0 }
 0x2c4   :  { %9762 = vst [vmem:[#allocation134_spill] sm:$0xff] %v7809_v44  ;;  %9768 = vst [vmem:[#allocation140_spill] sm:$0xff] %v7825_v57 }
 0x2c5   :  { %v7811_v5 = vpop.f32.mrf.mxu1 }
 0x2c6   :  { %9763 = vst [vmem:[#allocation135_spill] sm:$0xff] %v7811_v5 }
 0x2c7   :  { %v7815_v38 = vpop.f32.mrf.mxu1 }
 0x2c8   :  { %9765 = vst [vmem:[#allocation137_spill] sm:$0xff] %v7815_v38 }
 0x2c9   :  { %v7817_v43 = vpop.f32.mrf.mxu1 }
 0x2cb   :  { %v7821_v22 = vpop.f32.mrf.mxu1 }
 0x2cc   :  { %9767 = vst [vmem:[#allocation139_spill] sm:$0xff] %v7821_v22  ;;  %v9776_v22 = vld [vmem:[#allocation22_spill] sm:$0xff] }
 0x2cd   :  { %v7823_v8 = vpop.f32.mrf.mxu1 }
 0x2cf   :  { %v7827_v62 = vpop.f32.mrf.mxu1 }
 0x2d0   :  { %9769 = vst [vmem:[#allocation141_spill] sm:$0xff] %v7827_v62 }
 0x2d1   :  { %v7829_v11 = vpop.f32.mrf.mxu1 }
 0x2d3   :  { %v7831_v5 = vpop.f32.mrf.mxu1 }
 0x2d4   :  { %9770 = vst [vmem:[#allocation142_spill] sm:$0xff] %v7831_v5  ;;  %v9780_v5 = vld [vmem:[#allocation20_spill] sm:$0xff] }
 0x2d5   :  { %v7833_v42 = vpop.f32.mrf.mxu1 }
 0x2d7   :  { %v7835_v38 = vpop.f32.mrf.mxu1 }
 0x2d8   :  { %9771 = vst [vmem:[#allocation143_spill] sm:$0xff] %v7835_v38 }
 0x2d9   :  { %v7837_v36 = vpop.f32.mrf.mxu1 }
 0x2db   :  { %v7839_v23 = vpop.f32.mrf.mxu1 }
 0x2dc   :  { %9772 = vst [vmem:[#allocation144_spill] sm:$0xff] %v7839_v23 }
 0x2dd   :  { %v7841_v15 = vpop.f32.mrf.mxu1 }
 0x2df   :  { %v7843_v57 = vpop.f32.mrf.mxu1 }
 0x2e0   :  { %9773 = vst [vmem:[#allocation145_spill] sm:$0xff] %v7843_v57  ;;  %v9781_v57 = vld [vmem:[#allocation17_spill] sm:$0xff] }
 0x2e1   :  { %v2203_v44 = vpop.f32.mrf.mxu0  ;;  %v7853_v1 = vpop.f32.mrf.mxu1 }
 0x2e3   :  { %v5006_v13 = vpop.f32.mrf.mxu0  ;;  %v7859_v60 = vpop.f32.mrf.mxu1 }
 0x2e4   :  { %9774 = vst [vmem:[#allocation146_spill] sm:$0xff] %v7859_v60 }
 0x2f0   :  { %s5535_s1 = spop %5534 }
 0x2f1   :  { %v2134_v47 = vstv %s5535_s1  ;;  %s5537_s3 = spop %5536 }
 0x2f2   :  { %5599 = vrcp.f32 %v2134_v47  ;;  %v7845_v0 = vstv %s5537_s3 }
 0x2f3   :  { %v2318_v13 = vsub.f32 %v6500_v21, %v7845_v0  ;;  %v2317_v58 = vsub.f32 %v6489_v52, %v7845_v0  ;;  %v2316_v12 = vsub.f32 %v6478_v33, %v7845_v0  ;;  %v2315_v3 = vsub.f32 %v6485_v10, %v7845_v0 }
 0x2f4   :  { %v2314_v29 = vsub.f32 %v6471_v59, %v7845_v0  ;;  %v2313_v52 = vsub.f32 %v6469_v2, %v7845_v0  ;;  %v2311_v10 = vsub.f32 %v9776_v22, %v7845_v0  ;;  %v9779_v2 = vld [vmem:[#allocation15_spill] sm:$0xff]  ;;  %v2310_v22 = vsub.f32 %v9780_v5, %v7845_v0 }
 0x2f5   :  { %v2349_v50 = vmul.f32 1.442695, %v2318_v13  ;;  %v2347_v51 = vmul.f32 1.442695, %v2317_v58  ;;  %v2345_v47 = vmul.f32 1.442695, %v2316_v12 }
 0x2f6   :  { %v2343_v21 = vmul.f32 1.442695, %v2315_v3  ;;  %v2341_v33 = vmul.f32 1.442695, %v2314_v29  ;;  %v9775_v13 = vld [vmem:[#allocation21_spill] sm:$0xff]  ;;  %v9777_v12 = vld [vmem:[#allocation11_spill] sm:$0xff]  ;;  %v2303_v29 = vsub.f32 %v9779_v2, %v7845_v0 }
 0x2f7   :  { %5601 = vpow2.f32 %v2349_v50  ;;  %v2312_v58 = vsub.f32 %v9775_v13, %v7845_v0  ;;  %v7867_v50 = vpop.f32.mrf.mxu1  ;;  %v7871_v59 = vrot.slane %v7356_v46, %v9777_v12  ;;  %v9778_v3 = vld [vmem:[#allocation16_spill] sm:$0xff]  ;;  %v2335_v23 = vmul.f32 1.442695, %v2311_v10 }
 0x2f8   :  { %5603 = vpow2.f32 %v2347_v51  ;;  %v2339_v51 = vmul.f32 1.442695, %v2313_v52  ;;  %v2304_v62 = vsub.f32 %v9778_v3, %v7845_v0  ;;  %v2305_v46 = vsub.f32 %v9781_v57, %v7845_v0  ;;  %v9783_v52 = vld [vmem:[#allocation18_spill] sm:$0xff] }
 0x2f9   :  { %5605 = vpow2.f32 %v2345_v47  ;;  %v2337_v13 = vmul.f32 1.442695, %v2312_v58  ;;  %v7881_v60 = vpop.f32.mrf.mxu1  ;;  %v2309_v3 = vsub.f32 %v9783_v52, %v7845_v0  ;;  %v9784_v58 = vld [vmem:[#allocation19_spill] sm:$0xff]  ;;  %v2319_v5 = vmul.f32 1.442695, %v2303_v29 }
 0x2fa   :  { %5607 = vpow2.f32 %v2343_v21  ;;  %9782 = vst [vmem:[#allocation21_spill] sm:$0xff] %v7881_v60  ;;  %v1552_v21 = vadd.f32 %v7605_v39, %v7871_v59  ;;  %v2321_v2 = vmul.f32 1.442695, %v2304_v62  ;;  %v2306_v40 = vsub.f32 %v9784_v58, %v7845_v0  ;;  %v9786_v39 = vld [vmem:[#allocation13_spill] sm:$0xff] }
 0x2fb   :  { %5609 = vpow2.f32 %v2341_v33  ;;  %v1546_v10 = vadd.f32 %v7366_v41, %v7871_v59  ;;  %v2333_v57 = vmul.f32 1.442695, %v2310_v22  ;;  %v2307_v62 = vsub.f32 %v9786_v39, %v7845_v0  ;;  %v9791_v39 = vld [vmem:[#allocation62_spill] sm:$0xff] }
 0x2fc   :  { %5611 = vpow2.f32 %v2339_v51  ;;  %v1540_v51 = vadd.f32 %v7318_v61, %v7871_v59  ;;  %v2331_v41 = vmul.f32 1.442695, %v2309_v3  ;;  %v1516_v52 = vadd.f32 %v7243_v56, %v7871_v59  ;;  %v9788_v3 = vld [vmem:[#allocation66_spill] sm:$0xff] }
 0x2fd   :  { %5613 = vpow2.f32 %v2337_v13  ;;  %v2325_v13 = vmul.f32 1.442695, %v2306_v40  ;;  %v2327_v22 = vmul.f32 1.442695, %v2307_v62  ;;  %v1528_v40 = vadd.f32 %v7283_v24, %v7871_v59 }
 0x2fe   :  { %5615 = vpow2.f32 %v2335_v23  ;;  %v1498_v62 = vadd.f32 %v9791_v39, %v7871_v59 }
 0x2ff   :  { %v5600_v47 = vpop.eup %5599  ;;  %5617 = vpow2.f32 %v2321_v2  ;;  %v1510_v2 = vadd.f32 %v9788_v3, %v7871_v59 }
 0x300   :  { %v2136_v38 = vmul.f32 0.0078125, %v5600_v47  ;;  %v9785_v47 = vld [vmem:[#allocation14_spill] sm:$0xff]  ;;  %5619 = vpow2.f32 %v2319_v5  ;;  %v9790_v5 = vld [vmem:[#allocation64_spill] sm:$0xff] }
 0x301   :  { %v2308_v60 = vsub.f32 %v9785_v47, %v7845_v0  ;;  %v1534_v0 = vadd.f32 %v7298_v18, %v7871_v59  ;;  %5621 = vpow2.f32 %v2333_v57 }
 0x302   :  { %v2207_v33 = vmul.f32 %v2203_v44, %v2136_v38  ;;  %v2323_v38 = vmul.f32 1.442695, %v2305_v46  ;;  %v7897_v44 = vpop.f32.mrf.mxu1 }
 0x303   :  { %v2329_v61 = vmul.f32 1.442695, %v2308_v60  ;;  %v1522_v60 = vadd.f32 %v7265_v55, %v7871_v59 }
 0x304   :  { %v7893_v17 = vpop.eup %5601  ;;  %5040 = vmatmul.mubr.f32.vlgmr.msra.gmra.mxu1 %v2207_v33  ;;  %5623 = vpow2.f32 %v2323_v38  ;;  %v7912_v46 = vpop.f32.mrf.mxu1 }
 0x305   :  { %5043 = vmatpush3.msra.mxu0 %v7893_v17  ;;  %5078 = vmatpush3.msra.mxu1 %v1552_v21  ;;  %v7902_v29 = vpop.eup %5603  ;;  %9787 = vst [vmem:[#allocation22_spill] sm:$0xff] %v7912_v46  ;;  %5625 = vpow2.f32 %v2331_v41 }
 0x306   :  { %5044 = vmatprep.subr.mxu0 %v9643_v53  ;;  %5079 = vmatprep.subr.mxu1 %v9643_v53  ;;  %v7909_v23 = vpop.eup %5605  ;;  %5627 = vpow2.f32 %v2325_v13  ;;  %v7928_v24 = vpop.f32.mrf.mxu1 }
 0x307   :  { %5045 = vmatpush3.msra.mxu0 %v7902_v29  ;;  %5080 = vmatpush3.msra.mxu1 %v1546_v10  ;;  %v7918_v18 = vpop.eup %5607  ;;  %5629 = vpow2.f32 %v2329_v61  ;;  %v1504_v10 = vadd.f32 %v9790_v5, %v7871_v59 }
 0x308   :  { %5046 = vmatprep.subr.mxu0 %v9643_v53  ;;  %5081 = vmatprep.subr.mxu1 %v9643_v53  ;;  %v7925_v21 = vpop.eup %5609  ;;  %5631 = vpow2.f32 %v2327_v22  ;;  %v7944_v56 = vpop.f32.mrf.mxu1 }
 0x309   :  { %5047 = vmatpush3.msra.mxu0 %v7909_v23  ;;  %5082 = vmatpush3.msra.mxu1 %v1540_v51  ;;  %v7934_v55 = vpop.eup %5611  ;;  %9789 = vst [vmem:[#allocation11_spill] sm:$0xff] %v7944_v56 }
 0x30a   :  { %5048 = vmatprep.subr.mxu0 %v9643_v53  ;;  %5083 = vmatprep.subr.mxu1 %v9643_v53  ;;  %v7941_v33 = vpop.eup %5613  ;;  %v7958_v41 = vpop.f32.mrf.mxu1 }
 0x30b   :  { %5049 = vmatpush3.msra.mxu0 %v7918_v18  ;;  %5084 = vmatpush3.msra.mxu1 %v1534_v0  ;;  %v7947_v58 = vpop.eup %5615  ;;  %v9792_v0 = vld [vmem:[#allocation60_spill] sm:$0xff] }
 0x30c   :  { %5050 = vmatprep.subr.mxu0 %v9643_v53  ;;  %5085 = vmatprep.subr.mxu1 %v9643_v53  ;;  %v5618_v57 = vpop.eup %5617  ;;  %v1492_v61 = vadd.f32 %v9792_v0, %v7871_v59  ;;  %v7968_v39 = vpop.f32.mrf.mxu1  ;;  %v9795_v0 = vld [vmem:[#allocation58_spill] sm:$0xff] }
 0x30d   :  { %5051 = vmatpush3.msra.mxu0 %v7925_v21  ;;  %5086 = vmatpush3.msra.mxu1 %v1528_v40  ;;  %v5620_v47 = vpop.eup %5619  ;;  %9794 = vst [vmem:[#allocation16_spill] sm:$0xff] %v7968_v39 }
 0x30e   :  { %5052 = vmatprep.subr.mxu0 %v9643_v53  ;;  %5087 = vmatprep.subr.mxu1 %v9643_v53  ;;  %v5622_v38 = vpop.eup %5621  ;;  %v2351_v51 = vadd.f32 %v5620_v47, %v5618_v57  ;;  %v7978_v56 = vpop.f32.mrf.mxu1 }
 0x30f   :  { %5053 = vmatpush3.msra.mxu0 %v7934_v55  ;;  %5088 = vmatpush3.msra.mxu1 %v1522_v60 }
 0x310   :  { %5054 = vmatprep.subr.mxu0 %v9643_v53  ;;  %5089 = vmatprep.subr.mxu1 %v9643_v53 }
 0x311   :  { %5055 = vmatpush3.msra.mxu0 %v7941_v33  ;;  %5090 = vmatpush3.msra.mxu1 %v1516_v52  ;;  %v5624_v13 = vpop.eup %5623  ;;  %v9793_v52 = vld [vmem:[#allocation12_spill] sm:$0xff] }
 0x312   :  { %5056 = vmatprep.subr.mxu0 %v9643_v53  ;;  %5091 = vmatprep.subr.mxu1 %v9643_v53  ;;  %v5626_v22 = vpop.eup %5625  ;;  %v2352_v40 = vadd.f32 %v5624_v13, %v2351_v51  ;;  %v1486_v3 = vadd.f32 %v9793_v52, %v7871_v59  ;;  %v1480_v51 = vadd.f32 %v9795_v0, %v7871_v59  ;;  %v9797_v0 = vld [vmem:[#allocation56_spill] sm:$0xff] }
 0x313   :  { %5057 = vmatpush3.msra.mxu0 %v7947_v58  ;;  %5092 = vmatpush3.msra.mxu1 %v1510_v2  ;;  %v5628_v60 = vpop.eup %5627 }
 0x314   :  { %5058 = vmatprep.subr.mxu0 %v9643_v53  ;;  %5093 = vmatprep.subr.mxu1 %v9643_v53  ;;  %v5630_v2 = vpop.eup %5629  ;;  %v2353_v5 = vadd.f32 %v5628_v60, %v2352_v40 }
 0x315   :  { %5059 = vmatpush3.msra.mxu0 %v5622_v38  ;;  %5094 = vmatpush3.msra.mxu1 %v1504_v10  ;;  %v5632_v10 = vpop.eup %5631 }
 0x316   :  { %5060 = vmatprep.subr.mxu0 %v9643_v53  ;;  %5095 = vmatprep.subr.mxu1 %v9643_v53  ;;  %v2354_v46 = vadd.f32 %v5632_v10, %v2353_v5  ;;  %v7986_v5 = vld [vmem:[%s9567_s4] sm:$0xff] }
 0x317   :  { %5061 = vmatpush3.msra.mxu0 %v5626_v22  ;;  %5096 = vmatpush3.msra.mxu1 %v1498_v62  ;;  %v9796_v62 = vld [vmem:[#allocation57_spill] sm:$0xff] }
 0x318   :  { %5062 = vmatprep.subr.mxu0 %v9643_v53  ;;  %5097 = vmatprep.subr.mxu1 %v9643_v53  ;;  %v1474_v52 = vadd.f32 %v9796_v62, %v7871_v59  ;;  %v2355_v40 = vadd.f32 %v5630_v2, %v2354_v46 }
 0x319   :  { %5063 = vmatpush3.msra.mxu0 %v5630_v2  ;;  %5098 = vmatpush3.msra.mxu1 %v1492_v61  ;;  %v1468_v61 = vadd.f32 %v9797_v0, %v7871_v59  ;;  %v9798_v2 = vld [vmem:[#allocation55_spill] sm:$0xff] }
 0x31a   :  { %5064 = vmatprep.subr.mxu0 %v9643_v53  ;;  %5099 = vmatprep.subr.mxu1 %v9643_v53  ;;  %v2356_v46 = vadd.f32 %v5626_v22, %v2355_v40 }
 0x31b   :  { %5065 = vmatpush3.msra.mxu0 %v5632_v10  ;;  %5100 = vmatpush3.msra.mxu1 %v1486_v3  ;;  %v119_v3 = vrot.slane %v7986_v5, %v9777_v12  ;;  %v1462_v10 = vadd.f32 %v9798_v2, %v7871_v59  ;;  %v9800_v12 = vld [vmem:[#allocation6_spill] sm:$0xff] }
 0x31c   :  { %5066 = vmatprep.subr.mxu0 %v9643_v53  ;;  %5101 = vmatprep.subr.mxu1 %v9643_v53 }
 0x31d   :  { %5067 = vmatpush3.msra.mxu0 %v5628_v60  ;;  %5102 = vmatpush3.msra.mxu1 %v1480_v51  ;;  %v2357_v60 = vadd.f32 %v5622_v38, %v2356_v46  ;;  %v7995_v51 = vpop.f32.mrf.mxu1  ;;  %v225_v62 = vadd.f32 %v9800_v12, %v119_v3 }
 0x31e   :  { %5068 = vmatprep.subr.mxu0 %v9643_v53  ;;  %5103 = vmatprep.subr.mxu1 %v9643_v53  ;;  %9799 = vst [vmem:[#allocation15_spill] sm:$0xff] %v7995_v51 }
 0x31f   :  { %5069 = vmatpush3.msra.mxu0 %v5624_v13  ;;  %5104 = vmatpush3.msra.mxu1 %v1474_v52  ;;  %v2358_v22 = vadd.f32 %v7947_v58, %v2357_v60  ;;  %v8003_v38 = vpop.f32.mrf.mxu1 }
 0x320   :  { %5070 = vmatprep.subr.mxu0 %v9643_v53  ;;  %5105 = vmatprep.subr.mxu1 %v9643_v53 }
 0x321   :  { %5071 = vmatpush3.msra.mxu0 %v5618_v57  ;;  %5106 = vmatpush3.msra.mxu1 %v1468_v61  ;;  %v2359_v59 = vadd.f32 %v7941_v33, %v2358_v22 }
 0x322   :  { %5072 = vmatprep.subr.mxu0 %v9643_v53  ;;  %5107 = vmatprep.subr.mxu1 %v9643_v53 }
 0x323   :  { %5073 = vmatpush3.msra.mxu0 %v5620_v47  ;;  %5108 = vmatpush3.msra.mxu1 %v1462_v10  ;;  %v2360_v57 = vadd.f32 %v7934_v55, %v2359_v59  ;;  %v8013_v47 = vpop.f32.mrf.mxu1 }
 0x324   :  { %5075 = vmatmul.mubr.f32.vlgmr.msra.gmra.mxu0 %v225_v62  ;;  %5109 = vmatprep.mubr.msk.f32.mxu1 %vm5903_vm2, %v9643_v53 }
 0x325   :  { %5112 = vmatprep.subr.mxu0 %v9643_v53  ;;  %5144 = vmatprep.mubr.msk.f32.mxu0 %vm5903_vm2, %v9643_v53  ;;  %v2361_v58 = vadd.f32 %v7925_v21, %v2360_v57  ;;  %v8017_v52 = vpop.f32.mrf.mxu1 }
 0x326   :  { %5147 = vmatprep.subr.mxu1 %v9643_v53 }
 0x327   :  { %v2362_v33 = vadd.f32 %v7918_v18, %v2361_v58  ;;  %v8021_v61 = vpop.f32.mrf.mxu1 }
 0x329   :  { %v2363_v13 = vadd.f32 %v7909_v23, %v2362_v33  ;;  %v8023_v55 = vpop.f32.mrf.mxu1 }
 0x32b   :  { %v2364_v40 = vadd.f32 %v7902_v29, %v2363_v13  ;;  %v8025_v3 = vpop.f32.mrf.mxu1 }
 0x32d   :  { %v2365_v0 = vadd.f32 %v7893_v17, %v2364_v40  ;;  %v8027_v21 = vpop.f32.mrf.mxu1 }
 0x32f   :  { %2366 = vadd.xlane.f32.xlu1 %v2365_v0  ;;  %v8029_v46 = vpop.f32.mrf.mxu1 }
 0x331   :  { %v8031_v18 = vpop.f32.mrf.mxu1 }
 0x332   :  { %9801 = vst [vmem:[#allocation20_spill] sm:$0xff] %v8031_v18 }
 0x333   :  { %v8033_v23 = vpop.f32.mrf.mxu1 }
 0x334   :  { %9802 = vst [vmem:[#allocation17_spill] sm:$0xff] %v8033_v23 }
 0x335   :  { %v8035_v2 = vpop.f32.mrf.mxu1 }
 0x336   :  { %9803 = vst [vmem:[#allocation18_spill] sm:$0xff] %v8035_v2 }
 0x337   :  { %v8037_v29 = vpop.f32.mrf.mxu1 }
 0x338   :  { %9804 = vst [vmem:[#allocation19_spill] sm:$0xff] %v8037_v29 }
 0x339   :  { %v8039_v17 = vpop.f32.mrf.mxu1 }
 0x33a   :  { %9805 = vst [vmem:[#allocation14_spill] sm:$0xff] %v8039_v17 }
 0x33b   :  { %v8041_v10 = vpop.f32.mrf.mxu1 }
 0x33c   :  { %9806 = vst [vmem:[#allocation13_spill] sm:$0xff] %v8041_v10 }
 0x33d   :  { %v8043_v60 = vpop.f32.mrf.mxu1 }
 0x33e   :  { %9807 = vst [vmem:[#allocation66_spill] sm:$0xff] %v8043_v60 }
 0x33f   :  { %v8045_v12 = vpop.f32.mrf.mxu1 }
 0x340   :  { %9808 = vst [vmem:[#allocation64_spill] sm:$0xff] %v8045_v12 }
 0x341   :  { %v8047_v62 = vpop.f32.mrf.mxu1 }
 0x342   :  { %9809 = vst [vmem:[#allocation62_spill] sm:$0xff] %v8047_v62 }
 0x343   :  { %v8049_v22 = vpop.f32.mrf.mxu1 }
 0x344   :  { %9810 = vst [vmem:[#allocation60_spill] sm:$0xff] %v8049_v22 }
 0x345   :  { %v8051_v59 = vpop.f32.mrf.mxu1 }
 0x346   :  { %9811 = vst [vmem:[#allocation12_spill] sm:$0xff] %v8051_v59 }
 0x347   :  { %v8053_v57 = vpop.f32.mrf.mxu1 }
 0x348   :  { %9812 = vst [vmem:[#allocation58_spill] sm:$0xff] %v8053_v57 }
 0x349   :  { %v8055_v58 = vpop.f32.mrf.mxu1 }
 0x34a   :  { %9813 = vst [vmem:[#allocation57_spill] sm:$0xff] %v8055_v58 }
 0x34b   :  { %v8057_v33 = vpop.f32.mrf.mxu1 }
 0x34c   :  { %9814 = vst [vmem:[#allocation56_spill] sm:$0xff] %v8057_v33 }
 0x34d   :  { %v8059_v13 = vpop.f32.mrf.mxu1 }
 0x34e   :  { %9815 = vst [vmem:[#allocation55_spill] sm:$0xff] %v8059_v13 }
 0x34f   :  { %v8061_v40 = vpop.f32.mrf.mxu1 }
 0x350   :  { %9816 = vst [vmem:[#allocation6_spill] sm:$0xff] %v8061_v40 }
 0x351   :  { %v8063_v0 = vpop.f32.mrf.mxu1 }
 0x352   :  { %9817 = vst [vmem:[#allocation147_spill] sm:$0xff] %v8063_v0 }
 0x353   :  { %v8065_v23 = vpop.f32.mrf.mxu1 }
 0x354   :  { %9818 = vst [vmem:[#allocation148_spill] sm:$0xff] %v8065_v23  ;;  %v2535_v23 = vpop.xlane.xlu0 %2534 }
 0x355   :  { %v8067_v29 = vpop.f32.mrf.mxu1  ;;  %v2536_v60 = vrot.slane %v2535_v23, 4 }
 0x356   :  { %9819 = vst [vmem:[#allocation149_spill] sm:$0xff] %v8067_v29 }
 0x357   :  { %v8069_v10 = vpop.f32.mrf.mxu1 }
 0x358   :  { %9820 = vst [vmem:[#allocation150_spill] sm:$0xff] %v8069_v10  ;;  %v2537_v10 = vmax.f32 %v2535_v23, %v2536_v60 }
 0x359   :  { %v8071_v12 = vpop.f32.mrf.mxu1 }
 0x35a   :  { %9821 = vst [vmem:[#allocation151_spill] sm:$0xff] %v8071_v12 }
 0x35b   :  { %v8073_v22 = vpop.f32.mrf.mxu1 }
 0x35c   :  { %9822 = vst [vmem:[#allocation152_spill] sm:$0xff] %v8073_v22  ;;  %v2538_v22 = vrot.slane %v2537_v10, 2 }
 0x35d   :  { %v8075_v57 = vpop.f32.mrf.mxu1 }
 0x35e   :  { %9823 = vst [vmem:[#allocation153_spill] sm:$0xff] %v8075_v57  ;;  %v2539_v29 = vmax.f32 %v2537_v10, %v2538_v22 }
 0x35f   :  { %v8077_v18 = vpop.f32.mrf.mxu1 }
 0x360   :  { %9824 = vst [vmem:[#allocation154_spill] sm:$0xff] %v8077_v18 }
 0x361   :  { %v8079_v33 = vpop.f32.mrf.mxu1 }
 0x362   :  { %9825 = vst [vmem:[#allocation155_spill] sm:$0xff] %v8079_v33  ;;  %v2540_v33 = vrot.slane %v2539_v29, 1 }
 0x363   :  { %v8081_v2 = vpop.f32.mrf.mxu1 }
 0x364   :  { %9826 = vst [vmem:[#allocation156_spill] sm:$0xff] %v8081_v2  ;;  %v2541_v23 = vmax.f32 %v2539_v29, %v2540_v33 }
 0x365   :  { %v8083_v40 = vpop.f32.mrf.mxu1 }
 0x366   :  { %9827 = vst [vmem:[#allocation157_spill] sm:$0xff] %v8083_v40 }
 0x367   :  { %v8085_v17 = vpop.f32.mrf.mxu1 }
 0x368   :  { %9828 = vst [vmem:[#allocation158_spill] sm:$0xff] %v8085_v17 }
 0x369   :  { %v8087_v62 = vpop.f32.mrf.mxu1 }
 0x36a   :  { %9829 = vst [vmem:[#allocation159_spill] sm:$0xff] %v8087_v62 }
 0x36b   :  { %v8089_v59 = vpop.f32.mrf.mxu1 }
 0x36c   :  { %9830 = vst [vmem:[#allocation160_spill] sm:$0xff] %v8089_v59 }
 0x36d   :  { %v8091_v0 = vpop.f32.mrf.mxu1 }
 0x36e   :  { %9831 = vst [vmem:[#allocation161_spill] sm:$0xff] %v8091_v0 }
 0x36f   :  { %v8093_v2 = vpop.f32.mrf.mxu1 }
 0x370   :  { %9832 = vst [vmem:[#allocation162_spill] sm:$0xff] %v8093_v2 }
 0x3b8   :  { %v2367_v58 = vpop.xlane.xlu1 %2366 }
 0x3b9   :  { %v2368_v13 = vrot.slane %v2367_v58, 4 }
 0x3bb   :  { %v2369_v18 = vadd.f32 %v2368_v13, %v2367_v58 }
 0x3bd   :  { %v2370_v12 = vrot.slane %v2369_v18, 2 }
 0x3bf   :  { %v2371_v57 = vadd.f32 %v2370_v12, %v2369_v18 }
 0x3c1   :  { %v2372_v17 = vrot.slane %v2371_v57, 1 }
 0x3c3   :  { %v2373_v39 = vadd.f32 %v2372_v17, %v2371_v57 }
 0x3c4   :  { %v8095_v40 = vpop.f32.mrf.mxu1 }
 0x3c5   :  { %9833 = vst [vmem:[#allocation163_spill] sm:$0xff] %v8095_v40  ;;  %5538 = vpush %v2373_v39  ;;  %v9873_v40 = vld [vmem:[#allocation47_spill] sm:$0xff] }
 0x3c6   :  { %v5041_v62 = vpop.f32.mrf.mxu1  ;;  %5540 = vpush %v2541_v23 }
 0x3e4   :  { %v2444_v60 = vpop.f32.mrf.mxu0 }
 0x3e6   :  { %v5076_v59 = vpop.f32.mrf.mxu0 }
 0x3f6   :  { %s5539_s30 = spop %5538 }
 0x3f7   :  { %v2375_v51 = vstv %s5539_s30  ;;  %s5541_s14 = spop %5540 }
 0x3f8   :  { %5633 = vrcp.f32 %v2375_v51  ;;  %v8097_v10 = vstv %s5541_s14 }
 0x3f9   :  { %v2559_v18 = vsub.f32 %v7613_v48, %v8097_v10  ;;  %v2558_v12 = vsub.f32 %v7584_v30, %v8097_v10  ;;  %v2557_v17 = vsub.f32 %v7553_v19, %v8097_v10  ;;  %v2556_v62 = vsub.f32 %v7550_v28, %v8097_v10  ;;  %v8118_v28 = vld [vmem:[%s9571_s8] sm:$0xff] }
 0x3fa   :  { %v2555_v51 = vsub.f32 %v7565_v6, %v8097_v10  ;;  %v2554_v48 = vsub.f32 %v7546_v9, %v8097_v10  ;;  %v2553_v19 = vsub.f32 %v7506_v26, %v8097_v10  ;;  %v2552_v57 = vsub.f32 %v7497_v35, %v8097_v10 }
 0x3fb   :  { %v2590_v29 = vmul.f32 1.442695, %v2559_v18  ;;  %v2588_v39 = vmul.f32 1.442695, %v2558_v12  ;;  %v2586_v22 = vmul.f32 1.442695, %v2557_v17  ;;  %v8122_v6 = vrot.slane %v8118_v28, %v7389_v20 }
 0x3fc   :  { %v2584_v59 = vmul.f32 1.442695, %v2556_v62  ;;  %v2582_v30 = vmul.f32 1.442695, %v2555_v51  ;;  %v2580_v58 = vmul.f32 1.442695, %v2554_v48  ;;  %v2545_v9 = vsub.f32 %v7448_v49, %v8097_v10 }
 0x3fd   :  { %5635 = vpow2.f32 %v2590_v29  ;;  %v2544_v26 = vsub.f32 %v7436_v54, %v8097_v10  ;;  %v2578_v35 = vmul.f32 1.442695, %v2553_v19  ;;  %v2551_v13 = vsub.f32 %v7521_v37, %v8097_v10 }
 0x3fe   :  { %5637 = vpow2.f32 %v2588_v39  ;;  %v2576_v18 = vmul.f32 1.442695, %v2552_v57  ;;  %v2546_v12 = vsub.f32 %v7474_v25, %v8097_v10  ;;  %v1711_v17 = vadd.f32 %v8027_v21, %v8122_v6 }
 0x3ff   :  { %5639 = vpow2.f32 %v2586_v22  ;;  %v2550_v49 = vsub.f32 %v7489_v16, %v8097_v10  ;;  %v2562_v29 = vmul.f32 1.442695, %v2545_v9  ;;  %v2547_v39 = vsub.f32 %v7501_v14, %v8097_v10  ;;  %v9834_v16 = vld [vmem:[#allocation5_spill] sm:$0xff] }
 0x400   :  { %5641 = vpow2.f32 %v2584_v59  ;;  %v2560_v62 = vmul.f32 1.442695, %v2544_v26  ;;  %v1705_v37 = vadd.f32 %v8023_v55, %v8122_v6  ;;  %v2574_v22 = vmul.f32 1.442695, %v2551_v13 }
 0x401   :  { %5643 = vpow2.f32 %v2582_v30  ;;  %v2549_v25 = vsub.f32 %v7452_v27, %v8097_v10  ;;  %v2548_v21 = vsub.f32 %v9834_v16, %v8097_v10  ;;  %v1699_v14 = vadd.f32 %v8017_v52, %v8122_v6 }
 0x402   :  { %5645 = vpow2.f32 %v2580_v58  ;;  %v2572_v59 = vmul.f32 1.442695, %v2550_v49  ;;  %v2566_v27 = vmul.f32 1.442695, %v2547_v39  ;;  %v1693_v10 = vadd.f32 %v8003_v38, %v8122_v6 }
 0x403   :  { %5647 = vpow2.f32 %v2578_v35  ;;  %v2570_v52 = vmul.f32 1.442695, %v2549_v25  ;;  %v2568_v30 = vmul.f32 1.442695, %v2548_v21  ;;  %v1687_v19 = vadd.f32 %v7978_v56, %v8122_v6 }
 0x404   :  { %5649 = vpow2.f32 %v2576_v18  ;;  %v1681_v57 = vadd.f32 %v7958_v41, %v8122_v6  ;;  %v1675_v56 = vadd.f32 %v7928_v24, %v8122_v6  ;;  %v1669_v41 = vadd.f32 %v7897_v44, %v8122_v6 }
 0x405   :  { %v5634_v33 = vpop.eup %5633  ;;  %5651 = vpow2.f32 %v2562_v29  ;;  %v1657_v13 = vadd.f32 %v7853_v1, %v8122_v6  ;;  %v1645_v29 = vadd.f32 %v7837_v36, %v8122_v6  ;;  %v1633_v36 = vadd.f32 %v7829_v11, %v8122_v6 }
 0x406   :  { %v2377_v23 = vmul.f32 0.0078125, %v5634_v33  ;;  %5653 = vpow2.f32 %v2560_v62  ;;  %v1663_v33 = vadd.f32 %v7867_v50, %v8122_v6  ;;  %v1639_v62 = vadd.f32 %v7833_v42, %v8122_v6 }
 0x407   :  { %5655 = vpow2.f32 %v2574_v22  ;;  %v1627_v42 = vadd.f32 %v7823_v8, %v8122_v6  ;;  %v123_v25 = vrot.slane %v7986_v5, %v7389_v20  ;;  %v1621_v11 = vadd.f32 %v7817_v43, %v8122_v6  ;;  %v9835_v8 = vld [vmem:[#allocation59_spill] sm:$0xff] }
 0x408   :  { %v2448_v54 = vmul.f32 %v2444_v60, %v2377_v23  ;;  %v2564_v60 = vmul.f32 1.442695, %v2546_v12  ;;  %v1651_v12 = vadd.f32 %v7841_v15, %v8122_v6 }
 0x40a   :  { %v8142_v51 = vpop.eup %5635  ;;  %5110 = vmatmul.mubr.f32.vlgmr.msra.gmra.mxu1 %v2448_v54  ;;  %5657 = vpow2.f32 %v2564_v60  ;;  %v294_v60 = vadd.f32 %v9835_v8, %v123_v25 }
 0x40b   :  { %5113 = vmatpush3.msra.mxu0 %v8142_v51  ;;  %5148 = vmatpush3.msra.mxu1 %v1711_v17  ;;  %v8149_v55 = vpop.eup %5637  ;;  %5659 = vpow2.f32 %v2572_v59 }
 0x40c   :  { %5114 = vmatprep.subr.mxu0 %v9643_v53  ;;  %5149 = vmatprep.subr.mxu1 %v9643_v53  ;;  %v8156_v48 = vpop.eup %5639  ;;  %5661 = vpow2.f32 %v2566_v27  ;;  %v9836_v27 = vld [vmem:[#allocation9_spill] sm:$0xff] }
 0x40d   :  { %5115 = vmatpush3.msra.mxu0 %v8149_v55  ;;  %5150 = vmatpush3.msra.mxu1 %v1705_v37  ;;  %v8163_v38 = vpop.eup %5641  ;;  %5663 = vpow2.f32 %v2570_v52  ;;  %v8240_v52 = vsub.s32 5, %v9836_v27 }
 0x40e   :  { %5116 = vmatprep.subr.mxu0 %v9643_v53  ;;  %5151 = vmatprep.subr.mxu1 %v9643_v53  ;;  %v8170_v58 = vpop.eup %5643  ;;  %5665 = vpow2.f32 %v2568_v30 }
 0x40f   :  { %5117 = vmatpush3.msra.mxu0 %v8156_v48  ;;  %5152 = vmatpush3.msra.mxu1 %v1699_v14  ;;  %v8177_v9 = vpop.eup %5645  ;;  %9837 = vst [vmem:[#allocation5_spill] sm:$0xff] %v8240_v52 }
 0x410   :  { %5118 = vmatprep.subr.mxu0 %v9643_v53  ;;  %5153 = vmatprep.subr.mxu1 %v9643_v53  ;;  %v8184_v26 = vpop.eup %5647 }
 0x411   :  { %5119 = vmatpush3.msra.mxu0 %v8163_v38  ;;  %5154 = vmatpush3.msra.mxu1 %v1693_v10  ;;  %v5650_v24 = vpop.eup %5649  ;;  %v8237_v10 = vsub.s32 4, %v9836_v27 }
 0x412   :  { %5120 = vmatprep.subr.mxu0 %v9643_v53  ;;  %5155 = vmatprep.subr.mxu1 %v9643_v53  ;;  %v5652_v35 = vpop.eup %5651 }
 0x413   :  { %5121 = vmatpush3.msra.mxu0 %v8170_v58  ;;  %5156 = vmatpush3.msra.mxu1 %v1687_v19  ;;  %v5654_v44 = vpop.eup %5653  ;;  %v8246_v19 = vld [vmem:[%s9569_s6] sm:$0xff] }
 0x414   :  { %5122 = vmatprep.subr.mxu0 %v9643_v53  ;;  %5157 = vmatprep.subr.mxu1 %v9643_v53  ;;  %v5656_v23 = vpop.eup %5655  ;;  %v2592_v18 = vadd.f32 %v5654_v44, %v5652_v35 }
 0x415   :  { %5123 = vmatpush3.msra.mxu0 %v8177_v9  ;;  %5158 = vmatpush3.msra.mxu1 %v1681_v57  ;;  %v525_v57 = vrot.slane %v8246_v19, %v8237_v10 }
 0x416   :  { %5124 = vmatprep.subr.mxu0 %v9643_v53  ;;  %5159 = vmatprep.subr.mxu1 %v9643_v53 }
 0x417   :  { %5125 = vmatpush3.msra.mxu0 %v8184_v26  ;;  %5160 = vmatpush3.msra.mxu1 %v1675_v56  ;;  %v5658_v50 = vpop.eup %5657  ;;  %v8351_v2 = vadd.f32 %v9873_v40, %v525_v57  ;;  %v9880_v40 = vld [vmem:[#allocation54_spill] sm:$0xff] }
 0x418   :  { %5126 = vmatprep.subr.mxu0 %v9643_v53  ;;  %5161 = vmatprep.subr.mxu1 %v9643_v53  ;;  %v5660_v17 = vpop.eup %5659  ;;  %v2593_v49 = vadd.f32 %v5658_v50, %v2592_v18  ;;  %v9845_v18 = vld [vmem:[#allocation28_spill] sm:$0xff] }
 0x419   :  { %5127 = vmatpush3.msra.mxu0 %v5650_v24  ;;  %5162 = vmatpush3.msra.mxu1 %v1669_v41  ;;  %v5662_v1 = vpop.eup %5661 }
 0x41a   :  { %5128 = vmatprep.subr.mxu0 %v9643_v53  ;;  %5163 = vmatprep.subr.mxu1 %v9643_v53  ;;  %v5664_v54 = vpop.eup %5663  ;;  %v2594_v39 = vadd.f32 %v5662_v1, %v2593_v49  ;;  %v9850_v49 = vld [vmem:[#allocation31_spill] sm:$0xff] }
 0x41b   :  { %5129 = vmatpush3.msra.mxu0 %v5656_v23  ;;  %5164 = vmatpush3.msra.mxu1 %v1663_v33  ;;  %v5666_v15 = vpop.eup %5665 }
 0x41c   :  { %5130 = vmatprep.subr.mxu0 %v9643_v53  ;;  %5165 = vmatprep.subr.mxu1 %v9643_v53  ;;  %v2595_v37 = vadd.f32 %v5666_v15, %v2594_v39  ;;  %v9853_v39 = vld [vmem:[#allocation33_spill] sm:$0xff] }
 0x41d   :  { %5131 = vmatpush3.msra.mxu0 %v5660_v17  ;;  %5166 = vmatpush3.msra.mxu1 %v1657_v13  ;;  %v9844_v13 = vld [vmem:[#allocation27_spill] sm:$0xff] }
 0x41e   :  { %5132 = vmatprep.subr.mxu0 %v9643_v53  ;;  %5167 = vmatprep.subr.mxu1 %v9643_v53  ;;  %v2596_v22 = vadd.f32 %v5664_v54, %v2595_v37 }
 0x41f   :  { %5133 = vmatpush3.msra.mxu0 %v5664_v54  ;;  %5168 = vmatpush3.msra.mxu1 %v1651_v12  ;;  %v9848_v12 = vld [vmem:[#allocation30_spill] sm:$0xff] }
 0x420   :  { %5134 = vmatprep.subr.mxu0 %v9643_v53  ;;  %5169 = vmatprep.subr.mxu1 %v9643_v53  ;;  %v2597_v16 = vadd.f32 %v5660_v17, %v2596_v22 }
 0x421   :  { %5135 = vmatpush3.msra.mxu0 %v5666_v15  ;;  %5170 = vmatpush3.msra.mxu1 %v1645_v29  ;;  %v9851_v29 = vld [vmem:[#allocation32_spill] sm:$0xff]  ;;  %v8285_v15 = vadd.f32 %v9853_v39, %v525_v57 }
 0x422   :  { %5136 = vmatprep.subr.mxu0 %v9643_v53  ;;  %5171 = vmatprep.subr.mxu1 %v9643_v53  ;;  %v2598_v21 = vadd.f32 %v5656_v23, %v2597_v16  ;;  %v8267_v23 = vadd.f32 %v9844_v13, %v525_v57  ;;  %v9859_v16 = vld [vmem:[#allocation37_spill] sm:$0xff] }
 0x423   :  { %5137 = vmatpush3.msra.mxu0 %v5662_v1  ;;  %5172 = vmatpush3.msra.mxu1 %v1639_v62  ;;  %v8279_v1 = vadd.f32 %v9850_v49, %v525_v57  ;;  %v9854_v62 = vld [vmem:[#allocation34_spill] sm:$0xff] }
 0x424   :  { %5138 = vmatprep.subr.mxu0 %v9643_v53  ;;  %5173 = vmatprep.subr.mxu1 %v9643_v53  ;;  %v2599_v20 = vadd.f32 %v5650_v24, %v2598_v21  ;;  %v9841_v24 = vld [vmem:[#allocation25_spill] sm:$0xff]  ;;  %v9860_v21 = vld [vmem:[#allocation38_spill] sm:$0xff] }
 0x425   :  { %5139 = vmatpush3.msra.mxu0 %v5658_v50  ;;  %5174 = vmatpush3.msra.mxu1 %v1633_v36  ;;  %v8261_v33 = vadd.f32 %v9841_v24, %v525_v57  ;;  %v9856_v36 = vld [vmem:[#allocation35_spill] sm:$0xff] }
 0x426   :  { %5140 = vmatprep.subr.mxu0 %v9643_v53  ;;  %5175 = vmatprep.subr.mxu1 %v9643_v53  ;;  %v2600_v43 = vadd.f32 %v8184_v26, %v2599_v20  ;;  %v9839_v26 = vld [vmem:[#allocation24_spill] sm:$0xff]  ;;  %v8291_v22 = vadd.f32 %v9856_v36, %v525_v57 }
 0x427   :  { %5141 = vmatpush3.msra.mxu0 %v5652_v35  ;;  %5176 = vmatpush3.msra.mxu1 %v1627_v42  ;;  %v9842_v35 = vld [vmem:[#allocation26_spill] sm:$0xff]  ;;  %v9857_v42 = vld [vmem:[#allocation36_spill] sm:$0xff] }
 0x428   :  { %5142 = vmatprep.subr.mxu0 %v9643_v53  ;;  %5177 = vmatprep.subr.mxu1 %v9643_v53  ;;  %v2601_v6 = vadd.f32 %v8177_v9, %v2600_v43  ;;  %v9838_v9 = vld [vmem:[#allocation23_spill] sm:$0xff]  ;;  %v3002_v43 = vmax.f32 %v8261_v33, %v8285_v15 }
 0x429   :  { %5143 = vmatpush3.msra.mxu0 %v5654_v44  ;;  %5178 = vmatpush3.msra.mxu1 %v1621_v11  ;;  %v8255_v41 = vadd.f32 %v9838_v9, %v525_v57  ;;  %v8297_v11 = vadd.f32 %v9859_v16, %v525_v57 }
 0x42a   :  { %5145 = vmatmul.mubr.f32.vlgmr.msra.gmra.mxu0 %v294_v60  ;;  %5179 = vmatprep.mubr.msk.f32.mxu1 %vm5903_vm2, %v9643_v53  ;;  %v2602_v14 = vadd.f32 %v8170_v58, %v2601_v6  ;;  %v529_v58 = vrot.slane %v8246_v19, %v8240_v52 }
 0x42b   :  { %5182 = vmatprep.subr.mxu0 %v9643_v53  ;;  %5214 = vmatprep.mubr.msk.f32.mxu0 %vm5903_vm2, %v9643_v53  ;;  %v3001_v60 = vmax.f32 %v8255_v41, %v8279_v1 }
 0x42c   :  { %5217 = vmatprep.subr.mxu1 %v9643_v53  ;;  %v2603_v59 = vadd.f32 %v8163_v38, %v2602_v14  ;;  %v8264_v44 = vadd.f32 %v9842_v35, %v529_v58  ;;  %v8276_v17 = vadd.f32 %v9848_v12, %v529_v58  ;;  %v8282_v54 = vadd.f32 %v9851_v29, %v529_v58  ;;  %v9865_v35 = vld [vmem:[#allocation41_spill] sm:$0xff]  ;;  %v9868_v12 = vld [vmem:[#allocation43_spill] sm:$0xff]  ;;  %v9869_v29 = vld [vmem:[#allocation44_spill] sm:$0xff] }
 0x42d   :  { %v8288_v37 = vadd.f32 %v9854_v62, %v529_v58  ;;  %v8294_v25 = vadd.f32 %v9857_v42, %v529_v58  ;;  %v8300_v8 = vadd.f32 %v9860_v21, %v529_v58  ;;  %v3003_v14 = vmax.f32 %v8267_v23, %v8291_v22  ;;  %v9871_v62 = vld [vmem:[#allocation45_spill] sm:$0xff]  ;;  %v9872_v42 = vld [vmem:[#allocation46_spill] sm:$0xff] }
 0x42e   :  { %v2604_v30 = vadd.f32 %v8156_v48, %v2603_v59  ;;  %v8258_v48 = vadd.f32 %v9839_v26, %v529_v58  ;;  %9843 = vst [vmem:[#allocation9_spill] sm:$0xff] %v8264_v44  ;;  %9849 = vst [vmem:[#allocation24_spill] sm:$0xff] %v8276_v17  ;;  %v9863_v26 = vld [vmem:[#allocation40_spill] sm:$0xff]  ;;  %v8325_v13 = vadd.f32 %v9865_v35, %v525_v57 }
 0x42f   :  { %9852 = vst [vmem:[#allocation25_spill] sm:$0xff] %v8282_v54  ;;  %9855 = vst [vmem:[#allocation26_spill] sm:$0xff] %v8288_v37  ;;  %v3243_v6 = vmax.f32 %v8264_v44, %v8288_v37  ;;  %v8322_v24 = vadd.f32 %v9863_v26, %v529_v58  ;;  %v8331_v49 = vadd.f32 %v9868_v12, %v525_v57 }
 0x430   :  { %v2605_v38 = vadd.f32 %v8149_v55, %v2604_v30  ;;  %9840 = vst [vmem:[#allocation59_spill] sm:$0xff] %v8258_v48  ;;  %v8270_v55 = vadd.f32 %v9845_v18, %v529_v58  ;;  %9858 = vst [vmem:[#allocation27_spill] sm:$0xff] %v8294_v25  ;;  %v3242_v20 = vmax.f32 %v8258_v48, %v8282_v54  ;;  %v9866_v18 = vld [vmem:[#allocation42_spill] sm:$0xff] }
 0x431   :  { %9861 = vst [vmem:[#allocation28_spill] sm:$0xff] %v8300_v8  ;;  %v8334_v39 = vadd.f32 %v9869_v29, %v529_v58  ;;  %v8337_v36 = vadd.f32 %v9871_v62, %v525_v57  ;;  %v8340_v16 = vadd.f32 %v9872_v42, %v529_v58  ;;  %v3006_v26 = vmax.f32 %v3002_v43, %v8325_v13  ;;  %v9874_v42 = vld [vmem:[#allocation48_spill] sm:$0xff]  ;;  %v9876_v43 = vld [vmem:[#allocation50_spill] sm:$0xff] }
 0x432   :  { %v2606_v56 = vadd.f32 %v8142_v51, %v2605_v38  ;;  %9846 = vst [vmem:[#allocation23_spill] sm:$0xff] %v8270_v55  ;;  %v9847_v51 = vld [vmem:[#allocation29_spill] sm:$0xff]  ;;  %v3244_v59 = vmax.f32 %v8270_v55, %v8294_v25  ;;  %v3245_v38 = vmax.f32 %v8276_v17, %v8300_v8  ;;  %v8354_v0 = vadd.f32 %v9874_v42, %v529_v58 }
 0x433   :  { %v8273_v50 = vadd.f32 %v9847_v51, %v525_v57  ;;  %9864 = vst [vmem:[#allocation29_spill] sm:$0xff] %v8322_v24  ;;  %v8328_v51 = vadd.f32 %v9866_v18, %v529_v58  ;;  %9870 = vst [vmem:[#allocation31_spill] sm:$0xff] %v8334_v39  ;;  %v3007_v18 = vmax.f32 %v3003_v14, %v8331_v49 }
 0x434   :  { %2607 = vadd.xlane.f32.xlu1 %v2606_v56  ;;  %v9862_v56 = vld [vmem:[#allocation39_spill] sm:$0xff]  ;;  %v3248_v12 = vmax.f32 %v3244_v59, %v8334_v39  ;;  %v3249_v62 = vmax.f32 %v3245_v38, %v8340_v16  ;;  %v8360_v54 = vadd.f32 %v9876_v43, %v529_v58  ;;  %v9878_v59 = vld [vmem:[#allocation52_spill] sm:$0xff]  ;;  %v8372_v17 = vadd.f32 %v9880_v40, %v529_v58 }
 0x435   :  { %v3004_v30 = vmax.f32 %v8273_v50, %v8297_v11  ;;  %v8319_v9 = vadd.f32 %v9862_v56, %v525_v57  ;;  %9867 = vst [vmem:[#allocation30_spill] sm:$0xff] %v8328_v51  ;;  %v3246_v56 = vmax.f32 %v3242_v20, %v8322_v24  ;;  %v3247_v35 = vmax.f32 %v3243_v6, %v8328_v51  ;;  %v9877_v6 = vld [vmem:[#allocation51_spill] sm:$0xff] }
 0x436   :  { %v8363_v14 = vadd.f32 %v9877_v6, %v525_v57  ;;  %v8366_v37 = vadd.f32 %v9878_v59, %v529_v58 }
 0x437   :  { %v3005_v21 = vmax.f32 %v3001_v60, %v8319_v9  ;;  %v3008_v29 = vmax.f32 %v3004_v30, %v8337_v36  ;;  %v9875_v60 = vld [vmem:[#allocation49_spill] sm:$0xff]  ;;  %v3251_v43 = vmax.f32 %v3247_v35, %v8360_v54 }
 0x438   :  { %v8357_v20 = vadd.f32 %v9875_v60, %v525_v57  ;;  %v9879_v30 = vld [vmem:[#allocation53_spill] sm:$0xff]  ;;  %v3250_v60 = vmax.f32 %v3246_v56, %v8354_v0  ;;  %v3011_v6 = vmax.f32 %v3007_v18, %v8363_v14  ;;  %v3252_v55 = vmax.f32 %v3248_v12, %v8366_v37  ;;  %v2776_v56 = vpop.xlane.xlu0 %2775 }
 0x439   :  { %v8369_v38 = vadd.f32 %v9879_v30, %v525_v57  ;;  %v3009_v42 = vmax.f32 %v3005_v21, %v8351_v2  ;;  %v3253_v57 = vmax.f32 %v3249_v62, %v8372_v17 }
 0x43a   :  { %v3010_v25 = vmax.f32 %v3006_v26, %v8357_v20  ;;  %v3254_v58 = vmax.f32 %v3250_v60, %v3251_v43  ;;  %v2777_v26 = vrot.slane %v2776_v56, 4 }
 0x43b   :  { %v3012_v59 = vmax.f32 %v3008_v29, %v8369_v38  ;;  %v3255_v40 = vmax.f32 %v3252_v55, %v3253_v57 }
 0x43c   :  { %v3013_v30 = vmax.f32 %v3009_v42, %v3010_v25  ;;  %v2778_v44 = vmax.f32 %v2776_v56, %v2777_v26  ;;  %v9882_v56 = vld [vmem:[#allocation75_spill] sm:$0xff]  ;;  %v9883_v26 = vld [vmem:[#allocation10_spill] sm:$0xff] }
 0x43d   :  { %v3014_v8 = vmax.f32 %v3011_v6, %v3012_v59  ;;  %v3256_v21 = vmax.f32 %v3254_v58, %v3255_v40 }
 0x43e   :  { %v2779_v35 = vrot.slane %v2778_v44, 2 }
 0x43f   :  { %v3015_v48 = vmax.f32 %v3013_v30, %v3014_v8 }
 0x440   :  { %v2780_v12 = vmax.f32 %v2778_v44, %v2779_v35  ;;  %v9884_v35 = vld [vmem:[#allocation69_spill] sm:$0xff] }
 0x441   :  { %3016 = vmax.xlane.f32.xlu0 %v3015_v48 }
 0x442   :  { %v2781_v39 = vrot.slane %v2780_v12, 1 }
 0x444   :  { %v2782_v8 = vmax.f32 %v2780_v12, %v2781_v39  ;;  %v9885_v12 = vld [vmem:[#allocation67_spill] sm:$0xff] }
 0x445   :  { %3257 = vmax.xlane.f32.xlu0 %v3256_v21 }
 0x4bd   :  { %v2608_v52 = vpop.xlane.xlu1 %2607 }
 0x4be   :  { %v2609_v18 = vrot.slane %v2608_v52, 4 }
 0x4c0   :  { %v2610_v24 = vadd.f32 %v2609_v18, %v2608_v52 }
 0x4c2   :  { %v2611_v51 = vrot.slane %v2610_v24, 2 }
 0x4c4   :  { %v2612_v29 = vadd.f32 %v2611_v51, %v2610_v24 }
 0x4c6   :  { %v2613_v62 = vrot.slane %v2612_v29, 1 }
 0x4c8   :  { %v2614_v42 = vadd.f32 %v2613_v62, %v2612_v29 }
 0x4ca   :  { %v8382_v25 = vpop.f32.mrf.mxu1  ;;  %5542 = vpush %v2614_v42 }
 0x4cb   :  { %9881 = vst [vmem:[#allocation32_spill] sm:$0xff] %v8382_v25  ;;  %5544 = vpush %v2782_v8 }
 0x4cc   :  { %v5111_v55 = vpop.f32.mrf.mxu1 }
 0x4ea   :  { %v2685_v48 = vpop.f32.mrf.mxu0 }
 0x4ec   :  { %v5146_v60 = vpop.f32.mrf.mxu0 }
 0x4fb   :  { %s5543_s6 = spop %5542 }
 0x4fc   :  { %v2616_v43 = vstv %s5543_s6  ;;  %s5545_s18 = spop %5544 }
 0x4fd   :  { %5667 = vrcp.f32 %v2616_v43  ;;  %v2784_v6 = vstv %s5545_s18 }
 0x4fe   :  { %v2800_v52 = vsub.f32 %v7626_v34, %v2784_v6  ;;  %v2799_v44 = vsub.f32 %v7599_v63, %v2784_v6  ;;  %v2798_v24 = vsub.f32 %v7581_v31, %v2784_v6  ;;  %v2797_v57 = vsub.f32 %v7578_v32, %v2784_v6 }
 0x4ff   :  { %v2796_v30 = vsub.f32 %v7573_v45, %v2784_v6  ;;  %v2795_v40 = vsub.f32 %v7562_v4, %v2784_v6  ;;  %v2794_v34 = vsub.f32 %v7536_v7, %v2784_v6  ;;  %v2793_v63 = vsub.f32 %v9882_v56, %v2784_v6  ;;  %v9886_v4 = vld [vmem:[#allocation74_spill] sm:$0xff] }
 0x500   :  { %v2831_v51 = vmul.f32 1.442695, %v2800_v52  ;;  %v2829_v59 = vmul.f32 1.442695, %v2799_v44  ;;  %v2827_v39 = vmul.f32 1.442695, %v2798_v24  ;;  %v8394_v31 = vrot.slane %v8118_v28, %v9883_v26 }
 0x501   :  { %v2825_v58 = vmul.f32 1.442695, %v2797_v57  ;;  %v2823_v21 = vmul.f32 1.442695, %v2796_v30  ;;  %v2821_v32 = vmul.f32 1.442695, %v2795_v40  ;;  %v2786_v18 = vsub.f32 %v9884_v35, %v2784_v6 }
 0x502   :  { %5669 = vpow2.f32 %v2831_v51  ;;  %v2785_v45 = vsub.f32 %v9885_v12, %v2784_v6  ;;  %v2819_v62 = vmul.f32 1.442695, %v2794_v34  ;;  %v2792_v42 = vsub.f32 %v9886_v4, %v2784_v6  ;;  %v9887_v7 = vld [vmem:[#allocation70_spill] sm:$0xff]  ;;  %v9888_v52 = vld [vmem:[#allocation72_spill] sm:$0xff]  ;;  %v9890_v40 = vld [vmem:[#allocation71_spill] sm:$0xff] }
 0x503   :  { %5671 = vpow2.f32 %v2829_v59  ;;  %v2817_v8 = vmul.f32 1.442695, %v2793_v63  ;;  %v2787_v60 = vsub.f32 %v9887_v7, %v2784_v6  ;;  %v1713_v43 = vadd.f32 %v8029_v46, %v8394_v31  ;;  %v9889_v59 = vld [vmem:[#allocation73_spill] sm:$0xff]  ;;  %v9891_v46 = vld [vmem:[#allocation68_spill] sm:$0xff] }
 0x504   :  { %5673 = vpow2.f32 %v2827_v39  ;;  %v2791_v44 = vsub.f32 %v9888_v52, %v2784_v6  ;;  %v2803_v24 = vmul.f32 1.442695, %v2786_v18  ;;  %v2788_v57 = vsub.f32 %v9889_v59, %v2784_v6 }
 0x505   :  { %5675 = vpow2.f32 %v2825_v58  ;;  %v2801_v39 = vmul.f32 1.442695, %v2785_v45  ;;  %v1707_v30 = vadd.f32 %v8025_v3, %v8394_v31  ;;  %v2815_v58 = vmul.f32 1.442695, %v2792_v42  ;;  %v9892_v45 = vld [vmem:[#allocation15_spill] sm:$0xff] }
 0x506   :  { %5677 = vpow2.f32 %v2823_v21  ;;  %v2790_v21 = vsub.f32 %v9890_v40, %v2784_v6  ;;  %v2789_v56 = vsub.f32 %v9891_v46, %v2784_v6  ;;  %v2805_v63 = vmul.f32 1.442695, %v2787_v60  ;;  %v9895_v60 = vld [vmem:[#allocation22_spill] sm:$0xff]  ;;  %v9898_v46 = vld [vmem:[#allocation145_spill] sm:$0xff] }
 0x507   :  { %5679 = vpow2.f32 %v2821_v32  ;;  %v2813_v32 = vmul.f32 1.442695, %v2791_v44  ;;  %v2807_v35 = vmul.f32 1.442695, %v2788_v57  ;;  %v1695_v6 = vadd.f32 %v8013_v47, %v8394_v31 }
 0x508   :  { %5681 = vpow2.f32 %v2819_v62  ;;  %v2809_v12 = vmul.f32 1.442695, %v2789_v56  ;;  %v9893_v62 = vld [vmem:[#allocation16_spill] sm:$0xff]  ;;  %v1653_v56 = vadd.f32 %v9898_v46, %v8394_v31 }
 0x509   :  { %5683 = vpow2.f32 %v2817_v8  ;;  %v1683_v4 = vadd.f32 %v9893_v62, %v8394_v31 }
 0x50a   :  { %v5668_v29 = vpop.eup %5667  ;;  %5685 = vpow2.f32 %v2803_v24  ;;  %v9896_v24 = vld [vmem:[#allocation21_spill] sm:$0xff] }
 0x50b   :  { %v2618_v55 = vmul.f32 0.0078125, %v5668_v29  ;;  %5687 = vpow2.f32 %v2801_v39  ;;  %v1689_v29 = vadd.f32 %v9892_v45, %v8394_v31  ;;  %v9897_v39 = vld [vmem:[#allocation146_spill] sm:$0xff] }
 0x50c   :  { %5689 = vpow2.f32 %v2815_v58 }
 0x50d   :  { %v2689_v51 = vmul.f32 %v2685_v48, %v2618_v55  ;;  %v1701_v48 = vadd.f32 %v8021_v61, %v8394_v31  ;;  %v2811_v61 = vmul.f32 1.442695, %v2790_v21  ;;  %5691 = vpow2.f32 %v2805_v63  ;;  %v9894_v55 = vld [vmem:[#allocation11_spill] sm:$0xff] }
 0x50e   :  { %5693 = vpow2.f32 %v2813_v32  ;;  %v1677_v8 = vadd.f32 %v9894_v55, %v8394_v31  ;;  %v9901_v55 = vld [vmem:[#allocation142_spill] sm:$0xff] }
 0x50f   :  { %v8407_v34 = vpop.eup %5669  ;;  %5180 = vmatmul.mubr.f32.vlgmr.msra.gmra.mxu1 %v2689_v51  ;;  %5695 = vpow2.f32 %v2807_v35  ;;  %v1665_v51 = vadd.f32 %v9896_v24, %v8394_v31  ;;  %v9899_v35 = vld [vmem:[#allocation144_spill] sm:$0xff] }
 0x510   :  { %5183 = vmatpush3.msra.mxu0 %v8407_v34  ;;  %5218 = vmatpush3.msra.mxu1 %v1713_v43  ;;  %v8413_v3 = vpop.eup %5671  ;;  %5697 = vpow2.f32 %v2811_v61  ;;  %v1671_v43 = vadd.f32 %v9895_v60, %v8394_v31 }
 0x511   :  { %5184 = vmatprep.subr.mxu0 %v9643_v53  ;;  %5219 = vmatprep.subr.mxu1 %v9643_v53  ;;  %v8420_v18 = vpop.eup %5673  ;;  %5699 = vpow2.f32 %v2809_v12 }
 0x512   :  { %5185 = vmatpush3.msra.mxu0 %v8413_v3  ;;  %5220 = vmatpush3.msra.mxu1 %v1707_v30  ;;  %v8427_v47 = vpop.eup %5675  ;;  %v1659_v30 = vadd.f32 %v9897_v39, %v8394_v31 }
 0x513   :  { %5186 = vmatprep.subr.mxu0 %v9643_v53  ;;  %5221 = vmatprep.subr.mxu1 %v9643_v53  ;;  %v8434_v42 = vpop.eup %5677 }
 0x514   :  { %5187 = vmatpush3.msra.mxu0 %v8420_v18  ;;  %5222 = vmatpush3.msra.mxu1 %v1701_v48  ;;  %v8441_v7 = vpop.eup %5679 }
 0x515   :  { %5188 = vmatprep.subr.mxu0 %v9643_v53  ;;  %5223 = vmatprep.subr.mxu1 %v9643_v53  ;;  %v8448_v52 = vpop.eup %5681 }
 0x516   :  { %5189 = vmatpush3.msra.mxu0 %v8427_v47  ;;  %5224 = vmatpush3.msra.mxu1 %v1695_v6  ;;  %v5684_v44 = vpop.eup %5683  ;;  %v1647_v6 = vadd.f32 %v9899_v35, %v8394_v31 }
 0x517   :  { %5190 = vmatprep.subr.mxu0 %v9643_v53  ;;  %5225 = vmatprep.subr.mxu1 %v9643_v53  ;;  %v5686_v59 = vpop.eup %5685 }
 0x518   :  { %5191 = vmatpush3.msra.mxu0 %v8434_v42  ;;  %5226 = vmatpush3.msra.mxu1 %v1689_v29  ;;  %v5688_v57 = vpop.eup %5687  ;;  %v9900_v29 = vld [vmem:[#allocation143_spill] sm:$0xff] }
 0x519   :  { %5192 = vmatprep.subr.mxu0 %v9643_v53  ;;  %5227 = vmatprep.subr.mxu1 %v9643_v53  ;;  %v5690_v58 = vpop.eup %5689  ;;  %v2833_v40 = vadd.f32 %v5688_v57, %v5686_v59  ;;  %v1641_v62 = vadd.f32 %v9900_v29, %v8394_v31 }
 0x51a   :  { %5193 = vmatpush3.msra.mxu0 %v8441_v7  ;;  %5228 = vmatpush3.msra.mxu1 %v1683_v4  ;;  %v5692_v21 = vpop.eup %5691 }
 0x51b   :  { %5194 = vmatprep.subr.mxu0 %v9643_v53  ;;  %5229 = vmatprep.subr.mxu1 %v9643_v53  ;;  %v5694_v63 = vpop.eup %5693  ;;  %v2834_v48 = vadd.f32 %v5692_v21, %v2833_v40 }
 0x51c   :  { %5195 = vmatpush3.msra.mxu0 %v8448_v52  ;;  %5230 = vmatpush3.msra.mxu1 %v1677_v8  ;;  %v5696_v32 = vpop.eup %5695  ;;  %v1635_v8 = vadd.f32 %v9901_v55, %v8394_v31 }
 0x51d   :  { %5196 = vmatprep.subr.mxu0 %v9643_v53  ;;  %5231 = vmatprep.subr.mxu1 %v9643_v53  ;;  %v5698_v61 = vpop.eup %5697  ;;  %v2835_v12 = vadd.f32 %v5696_v32, %v2834_v48 }
 0x51e   :  { %5197 = vmatpush3.msra.mxu0 %v5684_v44  ;;  %5232 = vmatpush3.msra.mxu1 %v1671_v43  ;;  %v5700_v45 = vpop.eup %5699  ;;  %v9902_v43 = vld [vmem:[#allocation141_spill] sm:$0xff] }
 0x51f   :  { %5198 = vmatprep.subr.mxu0 %v9643_v53  ;;  %5233 = vmatprep.subr.mxu1 %v9643_v53  ;;  %v2836_v4 = vadd.f32 %v5700_v45, %v2835_v12  ;;  %v1629_v24 = vadd.f32 %v9902_v43, %v8394_v31 }
 0x520   :  { %5199 = vmatpush3.msra.mxu0 %v5690_v58  ;;  %5234 = vmatpush3.msra.mxu1 %v1665_v51  ;;  %v127_v51 = vrot.slane %v7986_v5, %v9883_v26 }
 0x521   :  { %5200 = vmatprep.subr.mxu0 %v9643_v53  ;;  %5235 = vmatprep.subr.mxu1 %v9643_v53  ;;  %v2837_v60 = vadd.f32 %v5698_v61, %v2836_v4 }
 0x522   :  { %5201 = vmatpush3.msra.mxu0 %v5694_v63  ;;  %5236 = vmatpush3.msra.mxu1 %v1659_v30  ;;  %v9903_v30 = vld [vmem:[#allocation139_spill] sm:$0xff] }
 0x523   :  { %5202 = vmatprep.subr.mxu0 %v9643_v53  ;;  %5237 = vmatprep.subr.mxu1 %v9643_v53  ;;  %v2838_v39 = vadd.f32 %v5694_v63, %v2837_v60  ;;  %v1623_v40 = vadd.f32 %v9903_v30, %v8394_v31 }
 0x524   :  { %5203 = vmatpush3.msra.mxu0 %v5698_v61  ;;  %5238 = vmatpush3.msra.mxu1 %v1653_v56  ;;  %v9904_v56 = vld [vmem:[#allocation61_spill] sm:$0xff] }
 0x525   :  { %5204 = vmatprep.subr.mxu0 %v9643_v53  ;;  %5239 = vmatprep.subr.mxu1 %v9643_v53  ;;  %v2839_v46 = vadd.f32 %v5690_v58, %v2838_v39  ;;  %v296_v48 = vadd.f32 %v9904_v56, %v127_v51 }
 0x526   :  { %5205 = vmatpush3.msra.mxu0 %v5700_v45  ;;  %5240 = vmatpush3.msra.mxu1 %v1647_v6 }
 0x527   :  { %5206 = vmatprep.subr.mxu0 %v9643_v53  ;;  %5241 = vmatprep.subr.mxu1 %v9643_v53  ;;  %v2840_v5 = vadd.f32 %v5684_v44, %v2839_v46 }
 0x528   :  { %5207 = vmatpush3.msra.mxu0 %v5696_v32  ;;  %5242 = vmatpush3.msra.mxu1 %v1641_v62 }
 0x529   :  { %5208 = vmatprep.subr.mxu0 %v9643_v53  ;;  %5243 = vmatprep.subr.mxu1 %v9643_v53  ;;  %v2841_v26 = vadd.f32 %v8448_v52, %v2840_v5 }
 0x52a   :  { %5209 = vmatpush3.msra.mxu0 %v5692_v21  ;;  %5244 = vmatpush3.msra.mxu1 %v1635_v8  ;;  %v3017_v21 = vpop.xlane.xlu0 %3016 }
 0x52b   :  { %5210 = vmatprep.subr.mxu0 %v9643_v53  ;;  %5245 = vmatprep.subr.mxu1 %v9643_v53  ;;  %v2842_v31 = vadd.f32 %v8441_v7, %v2841_v26  ;;  %v3018_v63 = vrot.slane %v3017_v21, 4 }
 0x52c   :  { %5211 = vmatpush3.msra.mxu0 %v5686_v59  ;;  %5246 = vmatpush3.msra.mxu1 %v1629_v24 }
 0x52d   :  { %5212 = vmatprep.subr.mxu0 %v9643_v53  ;;  %5247 = vmatprep.subr.mxu1 %v9643_v53  ;;  %v2843_v44 = vadd.f32 %v8434_v42, %v2842_v31  ;;  %v3019_v32 = vmax.f32 %v3017_v21, %v3018_v63 }
 0x52e   :  { %5213 = vmatpush3.msra.mxu0 %v5688_v57  ;;  %5248 = vmatpush3.msra.mxu1 %v1623_v40 }
 0x52f   :  { %5215 = vmatmul.mubr.f32.vlgmr.msra.gmra.mxu0 %v296_v48  ;;  %5249 = vmatprep.mubr.msk.f32.mxu1 %vm5903_vm2, %v9643_v53  ;;  %v2844_v59 = vadd.f32 %v8427_v47, %v2843_v44  ;;  %v3020_v35 = vrot.slane %v3019_v32, 2 }
 0x530   :  { %5252 = vmatprep.subr.mxu0 %v9643_v53  ;;  %5284 = vmatprep.mubr.msk.f32.mxu0 %vm5903_vm2, %v9643_v53 }
 0x531   :  { %5287 = vmatprep.subr.mxu1 %v9643_v53  ;;  %v2845_v57 = vadd.f32 %v8420_v18, %v2844_v59  ;;  %v3021_v12 = vmax.f32 %v3019_v32, %v3020_v35  ;;  %v9907_v32 = vld [vmem:[#allocation133_spill] sm:$0xff] }
 0x533   :  { %v2846_v52 = vadd.f32 %v8413_v3, %v2845_v57  ;;  %v3022_v42 = vrot.slane %v3021_v12, 1 }
 0x535   :  { %v2847_v58 = vadd.f32 %v8407_v34, %v2846_v52  ;;  %v3023_v3 = vmax.f32 %v3021_v12, %v3022_v42 }
 0x537   :  { %2848 = vadd.xlane.f32.xlu1 %v2847_v58 }
 0x5c0   :  { %v2849_v6 = vpop.xlane.xlu1 %2848 }
 0x5c1   :  { %v2850_v61 = vrot.slane %v2849_v6, 4 }
 0x5c3   :  { %v2851_v7 = vadd.f32 %v2850_v61, %v2849_v6 }
 0x5c5   :  { %v2852_v45 = vrot.slane %v2851_v7, 2 }
 0x5c7   :  { %v2853_v29 = vadd.f32 %v2852_v45, %v2851_v7 }
 0x5c9   :  { %v2854_v62 = vrot.slane %v2853_v29, 1 }
 0x5cb   :  { %v2855_v18 = vadd.f32 %v2854_v62, %v2853_v29  ;;  %v9909_v29 = vld [vmem:[#allocation121_spill] sm:$0xff] }
 0x5cd   :  { %5546 = vpush %v2855_v18 }
 0x5ce   :  { %5548 = vpush %v3023_v3 }
 0x5cf   :  { %v8503_v47 = vpop.f32.mrf.mxu1 }
 0x5d0   :  { %9905 = vst [vmem:[#allocation33_spill] sm:$0xff] %v8503_v47 }
 0x5d1   :  { %v5181_v4 = vpop.f32.mrf.mxu1 }
 0x5d2   :  { %v9910_v4 = vld [vmem:[#allocation115_spill] sm:$0xff] }
 0x5ef   :  { %v2926_v34 = vpop.f32.mrf.mxu0 }
 0x5f1   :  { %v5216_v55 = vpop.f32.mrf.mxu0 }
 0x5f2   :  { %v9911_v55 = vld [vmem:[#allocation111_spill] sm:$0xff] }
 0x5fe   :  { %s5547_s19 = spop %5546 }
 0x5ff   :  { %v2857_v8 = vstv %s5547_s19  ;;  %s5549_s20 = spop %5548 }
 0x600   :  { %5701 = vrcp.f32 %v2857_v8  ;;  %v3025_v60 = vstv %s5549_s20 }
 0x601   :  { %v3041_v43 = vsub.f32 %v8369_v38, %v3025_v60  ;;  %v3040_v24 = vsub.f32 %v8363_v14, %v3025_v60  ;;  %v3039_v51 = vsub.f32 %v8357_v20, %v3025_v60  ;;  %v3038_v40 = vsub.f32 %v8351_v2, %v3025_v60 }
 0x602   :  { %v3037_v56 = vsub.f32 %v8337_v36, %v3025_v60  ;;  %v3036_v5 = vsub.f32 %v8331_v49, %v3025_v60  ;;  %v3035_v38 = vsub.f32 %v8325_v13, %v3025_v60  ;;  %v3034_v14 = vsub.f32 %v8319_v9, %v3025_v60  ;;  %v9906_v9 = vld [vmem:[#allocation138_spill] sm:$0xff] }
 0x603   :  { %v3072_v39 = vmul.f32 1.442695, %v3041_v43  ;;  %v3070_v30 = vmul.f32 1.442695, %v3040_v24  ;;  %v3068_v46 = vmul.f32 1.442695, %v3039_v51  ;;  %v8515_v20 = vrot.slane %v8118_v28, %v8237_v10 }
 0x604   :  { %v3066_v48 = vmul.f32 1.442695, %v3038_v40  ;;  %v3064_v26 = vmul.f32 1.442695, %v3037_v56  ;;  %v3062_v2 = vmul.f32 1.442695, %v3036_v5  ;;  %v3027_v31 = vsub.f32 %v8261_v33, %v3025_v60 }
 0x605   :  { %5703 = vpow2.f32 %v3072_v39  ;;  %v3026_v36 = vsub.f32 %v8255_v41, %v3025_v60  ;;  %v3060_v59 = vmul.f32 1.442695, %v3035_v38  ;;  %v3033_v49 = vsub.f32 %v8297_v11, %v3025_v60  ;;  %v9912_v43 = vld [vmem:[#allocation107_spill] sm:$0xff]  ;;  %v9914_v56 = vld [vmem:[#allocation98_spill] sm:$0xff]  ;;  %v9915_v38 = vld [vmem:[#allocation92_spill] sm:$0xff] }
 0x606   :  { %5705 = vpow2.f32 %v3070_v30  ;;  %v3058_v52 = vmul.f32 1.442695, %v3034_v14  ;;  %v3028_v13 = vsub.f32 %v8267_v23, %v3025_v60  ;;  %v1872_v58 = vadd.f32 %v9906_v9, %v8515_v20  ;;  %v9913_v39 = vld [vmem:[#allocation103_spill] sm:$0xff] }
 0x607   :  { %5707 = vpow2.f32 %v3068_v46  ;;  %v3032_v28 = vsub.f32 %v8291_v22, %v3025_v60  ;;  %v3044_v21 = vmul.f32 1.442695, %v3027_v31  ;;  %v3029_v33 = vsub.f32 %v8273_v50, %v3025_v60  ;;  %v9908_v22 = vld [vmem:[#allocation127_spill] sm:$0xff] }
 0x608   :  { %5709 = vpow2.f32 %v3066_v48  ;;  %v3042_v41 = vmul.f32 1.442695, %v3026_v36  ;;  %v1866_v35 = vadd.f32 %v9907_v32, %v8515_v20  ;;  %v3056_v11 = vmul.f32 1.442695, %v3033_v49  ;;  %v9919_v32 = vld [vmem:[#allocation80_spill] sm:$0xff] }
 0x609   :  { %5711 = vpow2.f32 %v3064_v26  ;;  %v3031_v6 = vsub.f32 %v8285_v15, %v3025_v60  ;;  %v3030_v23 = vsub.f32 %v8279_v1, %v3025_v60  ;;  %v3046_v7 = vmul.f32 1.442695, %v3028_v13  ;;  %v9917_v13 = vld [vmem:[#allocation84_spill] sm:$0xff] }
 0x60a   :  { %5713 = vpow2.f32 %v3062_v2  ;;  %v1860_v12 = vadd.f32 %v9908_v22, %v8515_v20  ;;  %v3054_v50 = vmul.f32 1.442695, %v3032_v28  ;;  %v3048_v15 = vmul.f32 1.442695, %v3029_v33 }
 0x60b   :  { %5715 = vpow2.f32 %v3060_v59  ;;  %v1854_v1 = vadd.f32 %v9909_v29, %v8515_v20  ;;  %v3052_v42 = vmul.f32 1.442695, %v3031_v6  ;;  %v3050_v18 = vmul.f32 1.442695, %v3030_v23  ;;  %v9920_v6 = vld [vmem:[#allocation78_spill] sm:$0xff] }
 0x60c   :  { %5717 = vpow2.f32 %v3058_v52  ;;  %v1848_v3 = vadd.f32 %v9910_v4, %v8515_v20  ;;  %v1842_v8 = vadd.f32 %v9911_v55, %v8515_v20  ;;  %v1836_v24 = vadd.f32 %v9912_v43, %v8515_v20 }
 0x60d   :  { %v5702_v44 = vpop.eup %5701  ;;  %5719 = vpow2.f32 %v3044_v21  ;;  %v1830_v30 = vadd.f32 %v9913_v39, %v8515_v20  ;;  %v1824_v48 = vadd.f32 %v9914_v56, %v8515_v20  ;;  %v1818_v14 = vadd.f32 %v9915_v38, %v8515_v20 }
 0x60e   :  { %v2859_v57 = vmul.f32 0.0078125, %v5702_v44  ;;  %5721 = vpow2.f32 %v3042_v41  ;;  %v9916_v44 = vld [vmem:[#allocation87_spill] sm:$0xff]  ;;  %v1806_v9 = vadd.f32 %v9917_v13, %v8515_v20  ;;  %v1788_v23 = vadd.f32 %v9920_v6, %v8515_v20 }
 0x60f   :  { %5723 = vpow2.f32 %v3056_v11  ;;  %v1812_v59 = vadd.f32 %v9916_v44, %v8515_v20  ;;  %v8627_v55 = vsub.s32 6, %v9836_v27  ;;  %v9933_v44 = vld [vmem:[#allocation100_spill] sm:$0xff] }
 0x610   :  { %v2930_v63 = vmul.f32 %v2926_v34, %v2859_v57  ;;  %5725 = vpow2.f32 %v3046_v7  ;;  %v8603_v7 = vld [vmem:[%s9567_s4] sm:$0xff] }
 0x611   :  { %5727 = vpow2.f32 %v3054_v50  ;;  %v131_v22 = vrot.slane %v8603_v7, %v8237_v10  ;;  %v9921_v50 = vld [vmem:[#allocation76_spill] sm:$0xff] }
 0x612   :  { %v8528_v61 = vpop.eup %5703  ;;  %5250 = vmatmul.mubr.f32.vlgmr.msra.gmra.mxu1 %v2930_v63  ;;  %5729 = vpow2.f32 %v3048_v15  ;;  %v9918_v63 = vld [vmem:[#allocation82_spill] sm:$0xff]  ;;  %v1782_v15 = vadd.f32 %v9921_v50, %v8515_v20 }
 0x613   :  { %5253 = vmatpush3.msra.mxu0 %v8528_v61  ;;  %5288 = vmatpush3.msra.mxu1 %v1872_v58  ;;  %v8534_v45 = vpop.eup %5705  ;;  %5731 = vpow2.f32 %v3052_v42  ;;  %v1800_v33 = vadd.f32 %v9918_v63, %v8515_v20  ;;  %v9940_v63 = vld [vmem:[#allocation110_spill] sm:$0xff] }
 0x614   :  { %5254 = vmatprep.subr.mxu0 %v9643_v53  ;;  %5289 = vmatprep.subr.mxu1 %v9643_v53  ;;  %v8541_v62 = vpop.eup %5707  ;;  %5733 = vpow2.f32 %v3050_v18 }
 0x615   :  { %5255 = vmatpush3.msra.mxu0 %v8534_v45  ;;  %5290 = vmatpush3.msra.mxu1 %v1866_v35  ;;  %v8548_v34 = vpop.eup %5709  ;;  %v1794_v35 = vadd.f32 %v9919_v32, %v8515_v20 }
 0x616   :  { %5256 = vmatprep.subr.mxu0 %v9643_v53  ;;  %5291 = vmatprep.subr.mxu1 %v9643_v53  ;;  %v8555_v60 = vpop.eup %5711 }
 0x617   :  { %5257 = vmatpush3.msra.mxu0 %v8541_v62  ;;  %5292 = vmatpush3.msra.mxu1 %v1860_v12  ;;  %v8562_v51 = vpop.eup %5713 }
 0x618   :  { %5258 = vmatprep.subr.mxu0 %v9643_v53  ;;  %5293 = vmatprep.subr.mxu1 %v9643_v53  ;;  %v8569_v40 = vpop.eup %5715 }
 0x619   :  { %5259 = vmatpush3.msra.mxu0 %v8548_v34  ;;  %5294 = vmatpush3.msra.mxu1 %v1854_v1  ;;  %v5718_v46 = vpop.eup %5717  ;;  %v9922_v1 = vld [vmem:[#allocation7_spill] sm:$0xff] }
 0x61a   :  { %5260 = vmatprep.subr.mxu0 %v9643_v53  ;;  %5295 = vmatprep.subr.mxu1 %v9643_v53  ;;  %v5720_v5 = vpop.eup %5719  ;;  %v365_v42 = vadd.f32 %v9922_v1, %v131_v22 }
 0x61b   :  { %5261 = vmatpush3.msra.mxu0 %v8555_v60  ;;  %5296 = vmatpush3.msra.mxu1 %v1848_v3  ;;  %v5722_v26 = vpop.eup %5721 }
 0x61c   :  { %5262 = vmatprep.subr.mxu0 %v9643_v53  ;;  %5297 = vmatprep.subr.mxu1 %v9643_v53  ;;  %v5724_v2 = vpop.eup %5723  ;;  %v3074_v31 = vadd.f32 %v5722_v26, %v5720_v5 }
 0x61d   :  { %5263 = vmatpush3.msra.mxu0 %v8562_v51  ;;  %5298 = vmatpush3.msra.mxu1 %v1842_v8  ;;  %v5726_v36 = vpop.eup %5725  ;;  %v8630_v8 = vsub.s32 7, %v9836_v27  ;;  %v9925_v27 = vld [vmem:[#allocation90_spill] sm:$0xff] }
 0x61e   :  { %5264 = vmatprep.subr.mxu0 %v9643_v53  ;;  %5299 = vmatprep.subr.mxu1 %v9643_v53  ;;  %v5728_v49 = vpop.eup %5727  ;;  %v3075_v57 = vadd.f32 %v5726_v36, %v3074_v31  ;;  %v9932_v31 = vld [vmem:[#allocation99_spill] sm:$0xff] }
 0x61f   :  { %5265 = vmatpush3.msra.mxu0 %v8569_v40  ;;  %5300 = vmatpush3.msra.mxu1 %v1836_v24  ;;  %v5730_v52 = vpop.eup %5729  ;;  %v533_v24 = vrot.slane %v8246_v19, %v8627_v55 }
 0x620   :  { %5266 = vmatprep.subr.mxu0 %v9643_v53  ;;  %5301 = vmatprep.subr.mxu1 %v9643_v53  ;;  %v5732_v58 = vpop.eup %5731  ;;  %v3076_v28 = vadd.f32 %v5730_v52, %v3075_v57 }
 0x621   :  { %5267 = vmatpush3.msra.mxu0 %v5718_v46  ;;  %5302 = vmatpush3.msra.mxu1 %v1830_v30  ;;  %v5734_v21 = vpop.eup %5733  ;;  %v9923_v30 = vld [vmem:[#allocation86_spill] sm:$0xff]  ;;  %v8646_v56 = vadd.f32 %v9925_v27, %v533_v24 }
 0x622   :  { %5268 = vmatprep.subr.mxu0 %v9643_v53  ;;  %5303 = vmatprep.subr.mxu1 %v9643_v53  ;;  %v3077_v41 = vadd.f32 %v5734_v21, %v3076_v28  ;;  %v9939_v28 = vld [vmem:[#allocation108_spill] sm:$0xff] }
 0x623   :  { %5269 = vmatpush3.msra.mxu0 %v5724_v2  ;;  %5304 = vmatpush3.msra.mxu1 %v1824_v48 }
 0x624   :  { %5270 = vmatprep.subr.mxu0 %v9643_v53  ;;  %5305 = vmatprep.subr.mxu1 %v9643_v53  ;;  %v3078_v11 = vadd.f32 %v5732_v58, %v3077_v41  ;;  %v9941_v41 = vld [vmem:[#allocation112_spill] sm:$0xff] }
 0x625   :  { %5271 = vmatpush3.msra.mxu0 %v5728_v49  ;;  %5306 = vmatpush3.msra.mxu1 %v1818_v14  ;;  %v9930_v14 = vld [vmem:[#allocation97_spill] sm:$0xff] }
 0x626   :  { %5272 = vmatprep.subr.mxu0 %v9643_v53  ;;  %5307 = vmatprep.subr.mxu1 %v9643_v53  ;;  %v3079_v12 = vadd.f32 %v5728_v49, %v3078_v11  ;;  %v9935_v49 = vld [vmem:[#allocation102_spill] sm:$0xff] }
 0x627   :  { %5273 = vmatpush3.msra.mxu0 %v5732_v58  ;;  %5308 = vmatpush3.msra.mxu1 %v1812_v59  ;;  %v8670_v57 = vadd.f32 %v9935_v49, %v533_v24 }
 0x628   :  { %5274 = vmatprep.subr.mxu0 %v9643_v53  ;;  %5309 = vmatprep.subr.mxu1 %v9643_v53  ;;  %v3080_v29 = vadd.f32 %v5724_v2, %v3079_v12 }
 0x629   :  { %5275 = vmatpush3.msra.mxu0 %v5734_v21  ;;  %5310 = vmatpush3.msra.mxu1 %v1806_v9  ;;  %v9938_v9 = vld [vmem:[#allocation106_spill] sm:$0xff]  ;;  %v3484_v6 = vmax.f32 %v8646_v56, %v8670_v57 }
 0x62a   :  { %5276 = vmatprep.subr.mxu0 %v9643_v53  ;;  %5311 = vmatprep.subr.mxu1 %v9643_v53  ;;  %v3081_v10 = vadd.f32 %v5718_v46, %v3080_v29  ;;  %v8676_v58 = vadd.f32 %v9938_v9, %v533_v24  ;;  %v9942_v29 = vld [vmem:[#allocation114_spill] sm:$0xff] }
 0x62b   :  { %5277 = vmatpush3.msra.mxu0 %v5730_v52  ;;  %5312 = vmatpush3.msra.mxu1 %v1800_v33  ;;  %v9936_v52 = vld [vmem:[#allocation104_spill] sm:$0xff]  ;;  %v8682_v33 = vadd.f32 %v9940_v63, %v533_v24  ;;  %v8704_v1 = vadd.f32 %v9942_v29, %v533_v24 }
 0x62c   :  { %5278 = vmatprep.subr.mxu0 %v9643_v53  ;;  %5313 = vmatprep.subr.mxu1 %v9643_v53  ;;  %v3082_v20 = vadd.f32 %v8569_v40, %v3081_v10  ;;  %v9924_v40 = vld [vmem:[#allocation88_spill] sm:$0xff] }
 0x62d   :  { %5279 = vmatpush3.msra.mxu0 %v5726_v36  ;;  %5314 = vmatpush3.msra.mxu1 %v1794_v35  ;;  %v8664_v36 = vadd.f32 %v9932_v31, %v533_v24 }
 0x62e   :  { %5280 = vmatprep.subr.mxu0 %v9643_v53  ;;  %5315 = vmatprep.subr.mxu1 %v9643_v53  ;;  %v3083_v18 = vadd.f32 %v8562_v51, %v3082_v20  ;;  %v537_v51 = vrot.slane %v8246_v19, %v8630_v8  ;;  %v9928_v19 = vld [vmem:[#allocation94_spill] sm:$0xff]  ;;  %v9944_v20 = vld [vmem:[#allocation117_spill] sm:$0xff] }
 0x62f   :  { %5281 = vmatpush3.msra.mxu0 %v5720_v5  ;;  %5316 = vmatpush3.msra.mxu1 %v1788_v23  ;;  %v9927_v5 = vld [vmem:[#allocation93_spill] sm:$0xff] }
 0x630   :  { %5282 = vmatprep.subr.mxu0 %v9643_v53  ;;  %5317 = vmatprep.subr.mxu1 %v9643_v53  ;;  %v3084_v4 = vadd.f32 %v8555_v60, %v3083_v18  ;;  %v8643_v46 = vadd.f32 %v9924_v40, %v537_v51  ;;  %v8661_v2 = vadd.f32 %v9930_v14, %v537_v51  ;;  %v9948_v40 = vld [vmem:[#allocation123_spill] sm:$0xff] }
 0x631   :  { %5283 = vmatpush3.msra.mxu0 %v5722_v26  ;;  %5318 = vmatpush3.msra.mxu1 %v1782_v15  ;;  %v8652_v26 = vadd.f32 %v9927_v5, %v533_v24  ;;  %v8667_v59 = vadd.f32 %v9933_v44, %v537_v51  ;;  %v8673_v13 = vadd.f32 %v9936_v52, %v537_v51 }
 0x632   :  { %5285 = vmatmul.mubr.f32.vlgmr.msra.gmra.mxu0 %v365_v42  ;;  %5319 = vmatprep.mubr.msk.f32.mxu1 %vm5903_vm2, %v9643_v53  ;;  %v3085_v3 = vadd.f32 %v8548_v34, %v3084_v4  ;;  %v8640_v34 = vadd.f32 %v9923_v30, %v533_v24  ;;  %9931 = vst [vmem:[#allocation34_spill] sm:$0xff] %v8661_v2  ;;  %v9943_v42 = vld [vmem:[#allocation116_spill] sm:$0xff]  ;;  %v9945_v4 = vld [vmem:[#allocation119_spill] sm:$0xff] }
 0x633   :  { %5322 = vmatprep.subr.mxu0 %v9643_v53  ;;  %5354 = vmatprep.mubr.msk.f32.mxu0 %vm5903_vm2, %v9643_v53  ;;  %9934 = vst [vmem:[#allocation35_spill] sm:$0xff] %v8667_v59  ;;  %9937 = vst [vmem:[#allocation36_spill] sm:$0xff] %v8673_v13  ;;  %v8679_v21 = vadd.f32 %v9939_v28, %v537_v51  ;;  %v8685_v32 = vadd.f32 %v9941_v41, %v537_v51  ;;  %v9950_v28 = vld [vmem:[#allocation126_spill] sm:$0xff]  ;;  %v9951_v41 = vld [vmem:[#allocation128_spill] sm:$0xff] }
 0x634   :  { %5357 = vmatprep.subr.mxu1 %v9643_v53  ;;  %v3086_v43 = vadd.f32 %v8541_v62, %v3085_v3  ;;  %v9926_v62 = vld [vmem:[#allocation91_spill] sm:$0xff]  ;;  %v3483_v35 = vmax.f32 %v8640_v34, %v8664_v36  ;;  %v3724_v11 = vmax.f32 %v8643_v46, %v8667_v59  ;;  %v3485_v22 = vmax.f32 %v8652_v26, %v8676_v58 }
 0x635   :  { %v8649_v48 = vadd.f32 %v9926_v62, %v537_v51  ;;  %v3727_v15 = vmax.f32 %v8661_v2, %v8685_v32  ;;  %v8707_v10 = vadd.f32 %v9943_v42, %v537_v51  ;;  %v8710_v18 = vadd.f32 %v9944_v20, %v533_v24  ;;  %v9949_v62 = vld [vmem:[#allocation125_spill] sm:$0xff] }
 0x636   :  { %v3087_v39 = vadd.f32 %v8534_v45, %v3086_v43  ;;  %v8655_v45 = vadd.f32 %v9928_v19, %v537_v51  ;;  %v8713_v3 = vadd.f32 %v9945_v4, %v537_v51  ;;  %v9946_v43 = vld [vmem:[#allocation120_spill] sm:$0xff]  ;;  %v8722_v27 = vadd.f32 %v9948_v40, %v533_v24  ;;  %v9957_v4 = vld [vmem:[#allocation137_spill] sm:$0xff] }
 0x637   :  { %v3725_v23 = vmax.f32 %v8649_v48, %v8673_v13  ;;  %v8725_v5 = vadd.f32 %v9949_v62, %v537_v51  ;;  %v3487_v19 = vmax.f32 %v3483_v35, %v8704_v1  ;;  %v3488_v14 = vmax.f32 %v3484_v6, %v8710_v18  ;;  %v9952_v35 = vld [vmem:[#allocation129_spill] sm:$0xff]  ;;  %v9953_v6 = vld [vmem:[#allocation131_spill] sm:$0xff] }
 0x638   :  { %v3088_v60 = vadd.f32 %v8528_v61, %v3087_v39  ;;  %v9929_v61 = vld [vmem:[#allocation96_spill] sm:$0xff]  ;;  %v3726_v12 = vmax.f32 %v8655_v45, %v8679_v21  ;;  %v8716_v39 = vadd.f32 %v9946_v43, %v533_v24  ;;  %v8736_v63 = vadd.f32 %v9950_v28, %v533_v24 }
 0x639   :  { %v8658_v38 = vadd.f32 %v9929_v61, %v533_v24  ;;  %v3728_v61 = vmax.f32 %v3724_v11, %v8707_v10  ;;  %v3729_v31 = vmax.f32 %v3725_v23, %v8713_v3  ;;  %v3731_v9 = vmax.f32 %v3727_v15, %v8725_v5  ;;  %v9954_v23 = vld [vmem:[#allocation132_spill] sm:$0xff] }
 0x63a   :  { %3089 = vadd.xlane.f32.xlu1 %v3088_v60  ;;  %v9947_v60 = vld [vmem:[#allocation122_spill] sm:$0xff]  ;;  %v3489_v44 = vmax.f32 %v3485_v22, %v8716_v39  ;;  %v8739_v29 = vadd.f32 %v9951_v41, %v537_v51  ;;  %v8742_v11 = vadd.f32 %v9952_v35, %v533_v24  ;;  %v8745_v42 = vadd.f32 %v9953_v6, %v537_v51 }
 0x63b   :  { %v3486_v50 = vmax.f32 %v8658_v38, %v8682_v33  ;;  %v8719_v30 = vadd.f32 %v9947_v60, %v537_v51  ;;  %v8748_v22 = vadd.f32 %v9954_v23, %v533_v24  ;;  %v8757_v43 = vadd.f32 %v9957_v4, %v537_v51 }
 0x63c   :  { %v3491_v60 = vmax.f32 %v3487_v19, %v8736_v63  ;;  %v3732_v40 = vmax.f32 %v3728_v61, %v8739_v29  ;;  %v3492_v62 = vmax.f32 %v3488_v14, %v8742_v11  ;;  %v3733_v28 = vmax.f32 %v3729_v31, %v8745_v42  ;;  %v3258_v61 = vpop.xlane.xlu0 %3257 }
 0x63d   :  { %v3730_v49 = vmax.f32 %v3726_v12, %v8719_v30  ;;  %v3490_v52 = vmax.f32 %v3486_v50, %v8722_v27  ;;  %v9955_v12 = vld [vmem:[#allocation134_spill] sm:$0xff]  ;;  %v9956_v50 = vld [vmem:[#allocation135_spill] sm:$0xff]  ;;  %v3493_v41 = vmax.f32 %v3489_v44, %v8748_v22  ;;  %v3259_v14 = vrot.slane %v3258_v61, 4 }
 0x63e   :  { %v8751_v20 = vadd.f32 %v9955_v12, %v537_v51  ;;  %v8754_v15 = vadd.f32 %v9956_v50, %v533_v24  ;;  %v3735_v24 = vmax.f32 %v3731_v9, %v8757_v43  ;;  %v3495_v23 = vmax.f32 %v3491_v60, %v3492_v62 }
 0x63f   :  { %v3736_v51 = vmax.f32 %v3732_v40, %v3733_v28  ;;  %v3260_v47 = vmax.f32 %v3258_v61, %v3259_v14  ;;  %v9960_v61 = vld [vmem:[#allocation29_spill] sm:$0xff] }
 0x640   :  { %v3734_v35 = vmax.f32 %v3730_v49, %v8751_v20  ;;  %v3494_v6 = vmax.f32 %v3490_v52, %v8754_v15 }
 0x641   :  { %v3261_v31 = vrot.slane %v3260_v47, 2 }
 0x642   :  { %v3496_v12 = vmax.f32 %v3493_v41, %v3494_v6  ;;  %v3737_v50 = vmax.f32 %v3734_v35, %v3735_v24 }
 0x643   :  { %v3262_v49 = vmax.f32 %v3260_v47, %v3261_v31  ;;  %v9961_v31 = vld [vmem:[#allocation5_spill] sm:$0xff] }
 0x644   :  { %v3497_v4 = vmax.f32 %v3495_v23, %v3496_v12  ;;  %v3738_v19 = vmax.f32 %v3736_v51, %v3737_v50 }
 0x645   :  { %v3263_v2 = vrot.slane %v3262_v49, 1 }
 0x646   :  { %3498 = vmax.xlane.f32.xlu0 %v3497_v4 }
 0x647   :  { %v3264_v28 = vmax.f32 %v3262_v49, %v3263_v2  ;;  %v9962_v49 = vld [vmem:[#allocation9_spill] sm:$0xff] }
 0x64a   :  { %3739 = vmax.xlane.f32.xlu0 %v3738_v19  ;;  %v9959_v19 = vld [vmem:[#allocation30_spill] sm:$0xff] }
 0x6c3   :  { %v3090_v25 = vpop.xlane.xlu1 %3089 }
 0x6c4   :  { %v3091_v44 = vrot.slane %v3090_v25, 4 }
 0x6c6   :  { %v3092_v59 = vadd.f32 %v3091_v44, %v3090_v25 }
 0x6c8   :  { %v3093_v13 = vrot.slane %v3092_v59, 2 }
 0x6ca   :  { %v3094_v52 = vadd.f32 %v3093_v13, %v3092_v59 }
 0x6cc   :  { %v3095_v9 = vrot.slane %v3094_v52, 1 }
 0x6ce   :  { %v3096_v40 = vadd.f32 %v3095_v9, %v3094_v52  ;;  %v9963_v9 = vld [vmem:[#allocation59_spill] sm:$0xff] }
 0x6d0   :  { %5550 = vpush %v3096_v40 }
 0x6d1   :  { %5552 = vpush %v3264_v28 }
 0x6d2   :  { %v8767_v60 = vpop.f32.mrf.mxu1 }
 0x6d4   :  { %v5251_v62 = vpop.f32.mrf.mxu1 }
 0x6f2   :  { %v3167_v41 = vpop.f32.mrf.mxu0 }
 0x6f4   :  { %v5286_v35 = vpop.f32.mrf.mxu0 }
 0x6f5   :  { %v9964_v35 = vld [vmem:[#allocation28_spill] sm:$0xff] }
 0x701   :  { %s5551_s7 = spop %5550 }
 0x702   :  { %v3098_v6 = vstv %s5551_s7  ;;  %s5553_s23 = spop %5552 }
 0x703   :  { %5735 = vrcp.f32 %v3098_v6  ;;  %v8769_v24 = vstv %s5553_s23 }
 0x704   :  { %v3282_v25 = vsub.f32 %v8372_v17, %v8769_v24  ;;  %v3281_v47 = vsub.f32 %v8366_v37, %v8769_v24  ;;  %v3280_v59 = vsub.f32 %v8360_v54, %v8769_v24  ;;  %v3279_v23 = vsub.f32 %v8354_v0, %v8769_v24  ;;  %v9958_v17 = vld [vmem:[#allocation31_spill] sm:$0xff]  ;;  %v8790_v0 = vld [vmem:[%s9571_s8] sm:$0xff] }
 0x705   :  { %v3278_v51 = vsub.f32 %v8340_v16, %v8769_v24  ;;  %v3277_v4 = vsub.f32 %v9958_v17, %v8769_v24  ;;  %v3276_v54 = vsub.f32 %v9959_v19, %v8769_v24  ;;  %v3275_v14 = vsub.f32 %v9960_v61, %v8769_v24 }
 0x706   :  { %v3313_v2 = vmul.f32 1.442695, %v3282_v25  ;;  %v3311_v13 = vmul.f32 1.442695, %v3281_v47  ;;  %v3309_v12 = vmul.f32 1.442695, %v3280_v59  ;;  %v8794_v16 = vrot.slane %v8790_v0, %v9961_v31 }
 0x707   :  { %v3307_v50 = vmul.f32 1.442695, %v3279_v23  ;;  %v3305_v37 = vmul.f32 1.442695, %v3278_v51  ;;  %v3303_v44 = vmul.f32 1.442695, %v3277_v4  ;;  %v3268_v52 = vsub.f32 %v9962_v49, %v8769_v24 }
 0x708   :  { %5737 = vpow2.f32 %v3313_v2  ;;  %v3267_v40 = vsub.f32 %v9963_v9, %v8769_v24  ;;  %v3301_v28 = vmul.f32 1.442695, %v3276_v54  ;;  %v3274_v6 = vsub.f32 %v9964_v35, %v8769_v24  ;;  %v9965_v59 = vld [vmem:[#allocation23_spill] sm:$0xff]  ;;  %v9968_v4 = vld [vmem:[#allocation24_spill] sm:$0xff]  ;;  %v9970_v49 = vld [vmem:[#allocation26_spill] sm:$0xff] }
 0x709   :  { %5739 = vpow2.f32 %v3311_v13  ;;  %v3299_v47 = vmul.f32 1.442695, %v3275_v14  ;;  %v3269_v2 = vsub.f32 %v9965_v59, %v8769_v24  ;;  %v9966_v13 = vld [vmem:[#allocation140_spill] sm:$0xff]  ;;  %v3272_v9 = vsub.f32 %v9970_v49, %v8769_v24  ;;  %v9972_v35 = vld [vmem:[#allocation130_spill] sm:$0xff] }
 0x70a   :  { %5741 = vpow2.f32 %v3309_v12  ;;  %v1874_v23 = vadd.f32 %v9966_v13, %v8794_v16  ;;  %v9967_v12 = vld [vmem:[#allocation27_spill] sm:$0xff]  ;;  %v3283_v19 = vmul.f32 1.442695, %v3267_v40  ;;  %v9969_v54 = vld [vmem:[#allocation136_spill] sm:$0xff]  ;;  %v3297_v14 = vmul.f32 1.442695, %v3274_v6 }
 0x70b   :  { %5743 = vpow2.f32 %v3307_v50  ;;  %v3273_v51 = vsub.f32 %v9967_v12, %v8769_v24  ;;  %v3285_v50 = vmul.f32 1.442695, %v3268_v52  ;;  %v1868_v61 = vadd.f32 %v9969_v54, %v8794_v16 }
 0x70c   :  { %5745 = vpow2.f32 %v3305_v37  ;;  %v3270_v37 = vsub.f32 %v9968_v4, %v8769_v24  ;;  %v3293_v59 = vmul.f32 1.442695, %v3272_v9 }
 0x70d   :  { %5747 = vpow2.f32 %v3303_v44  ;;  %v9971_v44 = vld [vmem:[#allocation25_spill] sm:$0xff]  ;;  %v3295_v40 = vmul.f32 1.442695, %v3273_v51 }
 0x70e   :  { %5749 = vpow2.f32 %v3301_v28  ;;  %v3271_v52 = vsub.f32 %v9971_v44, %v8769_v24  ;;  %v3289_v6 = vmul.f32 1.442695, %v3270_v37  ;;  %v9976_v37 = vld [vmem:[#allocation109_spill] sm:$0xff] }
 0x70f   :  { %5751 = vpow2.f32 %v3299_v47  ;;  %v9973_v47 = vld [vmem:[#allocation124_spill] sm:$0xff]  ;;  %v9978_v44 = vld [vmem:[#allocation101_spill] sm:$0xff] }
 0x710   :  { %v5736_v62 = vpop.eup %5735  ;;  %5753 = vpow2.f32 %v3285_v50  ;;  %v1856_v24 = vadd.f32 %v9973_v47, %v8794_v16  ;;  %v3291_v13 = vmul.f32 1.442695, %v3271_v52  ;;  %v9975_v50 = vld [vmem:[#allocation113_spill] sm:$0xff]  ;;  %v1826_v52 = vadd.f32 %v9978_v44, %v8794_v16  ;;  %v9982_v44 = vld [vmem:[#allocation83_spill] sm:$0xff] }
 0x711   :  { %v3100_v25 = vmul.f32 0.0078125, %v5736_v62  ;;  %5755 = vpow2.f32 %v3283_v19  ;;  %v1838_v19 = vadd.f32 %v9976_v37, %v8794_v16 }
 0x712   :  { %5757 = vpow2.f32 %v3297_v14 }
 0x713   :  { %v3171_v17 = vmul.f32 %v3167_v41, %v3100_v25  ;;  %v3287_v41 = vmul.f32 1.442695, %v3269_v2  ;;  %v1862_v25 = vadd.f32 %v9972_v35, %v8794_v16 }
 0x715   :  { %v8814_v62 = vpop.eup %5737  ;;  %5320 = vmatmul.mubr.f32.vlgmr.msra.gmra.mxu1 %v3171_v17  ;;  %5759 = vpow2.f32 %v3287_v41  ;;  %v1844_v17 = vadd.f32 %v9975_v50, %v8794_v16 }
 0x716   :  { %5323 = vmatpush3.msra.mxu0 %v8814_v62  ;;  %5358 = vmatpush3.msra.mxu1 %v1874_v23  ;;  %v8821_v28 = vpop.eup %5739  ;;  %v9974_v23 = vld [vmem:[#allocation118_spill] sm:$0xff]  ;;  %5761 = vpow2.f32 %v3295_v40 }
 0x717   :  { %5324 = vmatprep.subr.mxu0 %v9643_v53  ;;  %5359 = vmatprep.subr.mxu1 %v9643_v53  ;;  %v8828_v2 = vpop.eup %5741  ;;  %v1850_v12 = vadd.f32 %v9974_v23, %v8794_v16  ;;  %5763 = vpow2.f32 %v3289_v6 }
 0x718   :  { %5325 = vmatpush3.msra.mxu0 %v8821_v28  ;;  %5360 = vmatpush3.msra.mxu1 %v1868_v61  ;;  %v8835_v51 = vpop.eup %5743  ;;  %5765 = vpow2.f32 %v3293_v59  ;;  %v9977_v61 = vld [vmem:[#allocation105_spill] sm:$0xff] }
 0x719   :  { %5326 = vmatprep.subr.mxu0 %v9643_v53  ;;  %5361 = vmatprep.subr.mxu1 %v9643_v53  ;;  %v8842_v4 = vpop.eup %5745  ;;  %5767 = vpow2.f32 %v3291_v13  ;;  %v1832_v14 = vadd.f32 %v9977_v61, %v8794_v16  ;;  %v9980_v59 = vld [vmem:[#allocation89_spill] sm:$0xff] }
 0x71a   :  { %5327 = vmatpush3.msra.mxu0 %v8828_v2  ;;  %5362 = vmatpush3.msra.mxu1 %v1862_v25  ;;  %v8849_v54 = vpop.eup %5747  ;;  %v9979_v25 = vld [vmem:[#allocation95_spill] sm:$0xff]  ;;  %v1814_v13 = vadd.f32 %v9980_v59, %v8794_v16 }
 0x71b   :  { %5328 = vmatprep.subr.mxu0 %v9643_v53  ;;  %5363 = vmatprep.subr.mxu1 %v9643_v53  ;;  %v8856_v49 = vpop.eup %5749  ;;  %v1820_v40 = vadd.f32 %v9979_v25, %v8794_v16 }
 0x71c   :  { %5329 = vmatpush3.msra.mxu0 %v8835_v51  ;;  %5364 = vmatpush3.msra.mxu1 %v1856_v24  ;;  %v5752_v9 = vpop.eup %5751 }
 0x71d   :  { %5330 = vmatprep.subr.mxu0 %v9643_v53  ;;  %5365 = vmatprep.subr.mxu1 %v9643_v53  ;;  %v5754_v41 = vpop.eup %5753 }
 0x71e   :  { %5331 = vmatpush3.msra.mxu0 %v8842_v4  ;;  %5366 = vmatpush3.msra.mxu1 %v1850_v12  ;;  %v5756_v35 = vpop.eup %5755 }
 0x71f   :  { %5332 = vmatprep.subr.mxu0 %v9643_v53  ;;  %5367 = vmatprep.subr.mxu1 %v9643_v53  ;;  %v5758_v6 = vpop.eup %5757  ;;  %v3315_v47 = vadd.f32 %v5756_v35, %v5754_v41 }
 0x720   :  { %5333 = vmatpush3.msra.mxu0 %v8849_v54  ;;  %5368 = vmatpush3.msra.mxu1 %v1844_v17  ;;  %v9981_v17 = vld [vmem:[#allocation85_spill] sm:$0xff] }
 0x721   :  { %5334 = vmatprep.subr.mxu0 %v9643_v53  ;;  %5369 = vmatprep.subr.mxu1 %v9643_v53  ;;  %v1808_v37 = vadd.f32 %v9981_v17, %v8794_v16 }
 0x722   :  { %5335 = vmatpush3.msra.mxu0 %v8856_v49  ;;  %5370 = vmatpush3.msra.mxu1 %v1838_v19  ;;  %v5760_v24 = vpop.eup %5759 }
 0x723   :  { %5336 = vmatprep.subr.mxu0 %v9643_v53  ;;  %5371 = vmatprep.subr.mxu1 %v9643_v53  ;;  %v5762_v23 = vpop.eup %5761  ;;  %v3316_v12 = vadd.f32 %v5760_v24, %v3315_v47  ;;  %v9983_v47 = vld [vmem:[#allocation81_spill] sm:$0xff] }
 0x724   :  { %5337 = vmatpush3.msra.mxu0 %v5752_v9  ;;  %5372 = vmatpush3.msra.mxu1 %v1832_v14  ;;  %v5764_v50 = vpop.eup %5763 }
 0x725   :  { %5338 = vmatprep.subr.mxu0 %v9643_v53  ;;  %5373 = vmatprep.subr.mxu1 %v9643_v53  ;;  %v5766_v19 = vpop.eup %5765  ;;  %v3317_v61 = vadd.f32 %v5764_v50, %v3316_v12  ;;  %v9984_v12 = vld [vmem:[#allocation79_spill] sm:$0xff] }
 0x726   :  { %5339 = vmatpush3.msra.mxu0 %v5758_v6  ;;  %5374 = vmatpush3.msra.mxu1 %v1826_v52  ;;  %v5768_v14 = vpop.eup %5767  ;;  %v1802_v52 = vadd.f32 %v9982_v44, %v8794_v16  ;;  %v1790_v17 = vadd.f32 %v9984_v12, %v8794_v16 }
 0x727   :  { %5340 = vmatprep.subr.mxu0 %v9643_v53  ;;  %5375 = vmatprep.subr.mxu1 %v9643_v53  ;;  %v3318_v25 = vadd.f32 %v5768_v14, %v3317_v61 }
 0x728   :  { %5341 = vmatpush3.msra.mxu0 %v5762_v23  ;;  %5376 = vmatpush3.msra.mxu1 %v1820_v40  ;;  %v1796_v40 = vadd.f32 %v9983_v47, %v8794_v16 }
 0x729   :  { %5342 = vmatprep.subr.mxu0 %v9643_v53  ;;  %5377 = vmatprep.subr.mxu1 %v9643_v53  ;;  %v3319_v59 = vadd.f32 %v5766_v19, %v3318_v25 }
 0x72a   :  { %5343 = vmatpush3.msra.mxu0 %v5766_v19  ;;  %5378 = vmatpush3.msra.mxu1 %v1814_v13  ;;  %v135_v13 = vrot.slane %v8603_v7, %v9961_v31 }
 0x72b   :  { %5344 = vmatprep.subr.mxu0 %v9643_v53  ;;  %5379 = vmatprep.subr.mxu1 %v9643_v53  ;;  %v3320_v61 = vadd.f32 %v5762_v23, %v3319_v59  ;;  %v3499_v23 = vpop.xlane.xlu0 %3498 }
 0x72c   :  { %5345 = vmatpush3.msra.mxu0 %v5768_v14  ;;  %5380 = vmatpush3.msra.mxu1 %v1808_v37  ;;  %v9985_v37 = vld [vmem:[#allocation77_spill] sm:$0xff] }
 0x72d   :  { %5346 = vmatprep.subr.mxu0 %v9643_v53  ;;  %5381 = vmatprep.subr.mxu1 %v9643_v53  ;;  %v1784_v14 = vadd.f32 %v9985_v37, %v8794_v16  ;;  %v3321_v19 = vadd.f32 %v5758_v6, %v3320_v61 }
 0x72e   :  { %5347 = vmatpush3.msra.mxu0 %v5764_v50  ;;  %5382 = vmatpush3.msra.mxu1 %v1802_v52  ;;  %v9986_v50 = vld [vmem:[#allocation8_spill] sm:$0xff]  ;;  %v3500_v52 = vrot.slane %v3499_v23, 4 }
 0x72f   :  { %5348 = vmatprep.subr.mxu0 %v9643_v53  ;;  %5383 = vmatprep.subr.mxu1 %v9643_v53  ;;  %v367_v44 = vadd.f32 %v9986_v50, %v135_v13  ;;  %v3322_v31 = vadd.f32 %v5752_v9, %v3321_v19 }
 0x730   :  { %5349 = vmatpush3.msra.mxu0 %v5760_v24  ;;  %5384 = vmatpush3.msra.mxu1 %v1796_v40  ;;  %v3501_v25 = vmax.f32 %v3499_v23, %v3500_v52 }
 0x731   :  { %5350 = vmatprep.subr.mxu0 %v9643_v53  ;;  %5385 = vmatprep.subr.mxu1 %v9643_v53  ;;  %v3323_v16 = vadd.f32 %v8856_v49, %v3322_v31 }
 0x732   :  { %5351 = vmatpush3.msra.mxu0 %v5754_v41  ;;  %5386 = vmatpush3.msra.mxu1 %v1790_v17  ;;  %v3502_v47 = vrot.slane %v3501_v25, 2 }
 0x733   :  { %5352 = vmatprep.subr.mxu0 %v9643_v53  ;;  %5387 = vmatprep.subr.mxu1 %v9643_v53  ;;  %v3324_v41 = vadd.f32 %v8849_v54, %v3323_v16 }
 0x734   :  { %5353 = vmatpush3.msra.mxu0 %v5756_v35  ;;  %5388 = vmatpush3.msra.mxu1 %v1784_v14  ;;  %v3503_v12 = vmax.f32 %v3501_v25, %v3502_v47 }
 0x735   :  { %5355 = vmatmul.mubr.f32.vlgmr.msra.gmra.mxu0 %v367_v44  ;;  %5389 = vmatprep.mubr.msk.f32.mxu1 %vm5903_vm2, %v9643_v53  ;;  %v3325_v9 = vadd.f32 %v8842_v4, %v3324_v41 }
 0x736   :  { %5392 = vmatprep.subr.mxu0 %v9643_v53  ;;  %5424 = vmatprep.mubr.msk.f32.mxu0 %vm5903_vm2, %v9643_v53  ;;  %v3504_v4 = vrot.slane %v3503_v12, 1 }
 0x737   :  { %5427 = vmatprep.subr.mxu1 %v9643_v53  ;;  %v3326_v35 = vadd.f32 %v8835_v51, %v3325_v9 }
 0x739   :  { %v3327_v6 = vadd.f32 %v8828_v2, %v3326_v35 }
 0x73b   :  { %v3328_v49 = vadd.f32 %v8821_v28, %v3327_v6  ;;  %v3505_v28 = vmax.f32 %v3503_v12, %v3504_v4 }
 0x73d   :  { %v3329_v24 = vadd.f32 %v8814_v62, %v3328_v49 }
 0x73f   :  { %3330 = vadd.xlane.f32.xlu1 %v3329_v24 }
 0x7c8   :  { %v3331_v40 = vpop.xlane.xlu1 %3330 }
 0x7c9   :  { %v3332_v59 = vrot.slane %v3331_v40, 4 }
 0x7cb   :  { %v3333_v54 = vadd.f32 %v3332_v59, %v3331_v40 }
 0x7cd   :  { %v3334_v17 = vrot.slane %v3333_v54, 2 }
 0x7cf   :  { %v3335_v13 = vadd.f32 %v3334_v17, %v3333_v54 }
 0x7d1   :  { %v3336_v61 = vrot.slane %v3335_v13, 1 }
 0x7d3   :  { %v3337_v2 = vadd.f32 %v3336_v61, %v3335_v13  ;;  %v9988_v61 = vld [vmem:[#allocation159_spill] sm:$0xff] }
 0x7d5   :  { %v8911_v51 = vpop.f32.mrf.mxu1  ;;  %5554 = vpush %v3337_v2 }
 0x7d6   :  { %5556 = vpush %v3505_v28 }
 0x7d7   :  { %v5321_v37 = vpop.f32.mrf.mxu1 }
 0x7f5   :  { %v3408_v62 = vpop.f32.mrf.mxu0 }
 0x7f7   :  { %v5356_v14 = vpop.f32.mrf.mxu0 }
 0x806   :  { %s5555_s8 = spop %5554 }
 0x807   :  { %v3339_v19 = vstv %s5555_s8  ;;  %s5557_s25 = spop %5556 }
 0x808   :  { %5769 = vrcp.f32 %v3339_v19  ;;  %v3507_v50 = vstv %s5557_s25 }
 0x809   :  { %v3523_v44 = vsub.f32 %v8754_v15, %v3507_v50  ;;  %v3522_v31 = vsub.f32 %v8748_v22, %v3507_v50  ;;  %v3521_v16 = vsub.f32 %v8742_v11, %v3507_v50  ;;  %v3520_v35 = vsub.f32 %v8736_v63, %v3507_v50 }
 0x80a   :  { %v3519_v49 = vsub.f32 %v8722_v27, %v3507_v50  ;;  %v3518_v23 = vsub.f32 %v8716_v39, %v3507_v50  ;;  %v3517_v15 = vsub.f32 %v8710_v18, %v3507_v50  ;;  %v3516_v22 = vsub.f32 %v8704_v1, %v3507_v50  ;;  %v9987_v1 = vld [vmem:[#allocation161_spill] sm:$0xff] }
 0x80b   :  { %v3554_v41 = vmul.f32 1.442695, %v3523_v44  ;;  %v3552_v9 = vmul.f32 1.442695, %v3522_v31  ;;  %v3550_v6 = vmul.f32 1.442695, %v3521_v16  ;;  %v8923_v11 = vrot.slane %v8790_v0, %v8627_v55 }
 0x80c   :  { %v3548_v24 = vmul.f32 1.442695, %v3520_v35  ;;  %v3546_v52 = vmul.f32 1.442695, %v3519_v49  ;;  %v3544_v63 = vmul.f32 1.442695, %v3518_v23  ;;  %v3509_v25 = vsub.f32 %v8646_v56, %v3507_v50 }
 0x80d   :  { %5771 = vpow2.f32 %v3554_v41  ;;  %v3508_v27 = vsub.f32 %v8640_v34, %v3507_v50  ;;  %v3542_v40 = vmul.f32 1.442695, %v3517_v15  ;;  %v3515_v39 = vsub.f32 %v8682_v33, %v3507_v50  ;;  %v9990_v44 = vld [vmem:[#allocation155_spill] sm:$0xff]  ;;  %v9991_v41 = vld [vmem:[#allocation153_spill] sm:$0xff] }
 0x80e   :  { %5773 = vpow2.f32 %v3552_v9  ;;  %v3540_v54 = vmul.f32 1.442695, %v3516_v22  ;;  %v3510_v18 = vsub.f32 %v8652_v26, %v3507_v50  ;;  %v2033_v12 = vadd.f32 %v9987_v1, %v8923_v11  ;;  %v9993_v23 = vld [vmem:[#allocation149_spill] sm:$0xff]  ;;  %v9994_v22 = vld [vmem:[#allocation147_spill] sm:$0xff] }
 0x80f   :  { %5775 = vpow2.f32 %v3550_v6  ;;  %v3514_v17 = vsub.f32 %v8676_v58, %v3507_v50  ;;  %v3526_v13 = vmul.f32 1.442695, %v3509_v25  ;;  %v3511_v56 = vsub.f32 %v8658_v38, %v3507_v50  ;;  %v9989_v58 = vld [vmem:[#allocation157_spill] sm:$0xff]  ;;  %v9992_v6 = vld [vmem:[#allocation151_spill] sm:$0xff] }
 0x810   :  { %5777 = vpow2.f32 %v3548_v24  ;;  %v3524_v34 = vmul.f32 1.442695, %v3508_v27  ;;  %v2027_v2 = vadd.f32 %v9988_v61, %v8923_v11  ;;  %v3538_v33 = vmul.f32 1.442695, %v3515_v39 }
 0x811   :  { %5779 = vpow2.f32 %v3546_v52  ;;  %v3513_v37 = vsub.f32 %v8670_v57, %v3507_v50  ;;  %v3512_v26 = vsub.f32 %v8664_v36, %v3507_v50  ;;  %v3528_v14 = vmul.f32 1.442695, %v3510_v18 }
 0x812   :  { %5781 = vpow2.f32 %v3544_v63  ;;  %v3536_v38 = vmul.f32 1.442695, %v3514_v17  ;;  %v3530_v57 = vmul.f32 1.442695, %v3511_v56  ;;  %v2015_v36 = vadd.f32 %v9990_v44, %v8923_v11 }
 0x813   :  { %5783 = vpow2.f32 %v3542_v40  ;;  %v3534_v50 = vmul.f32 1.442695, %v3513_v37  ;;  %v3532_v16 = vmul.f32 1.442695, %v3512_v26  ;;  %v2009_v9 = vadd.f32 %v9991_v41, %v8923_v11 }
 0x814   :  { %5785 = vpow2.f32 %v3540_v54  ;;  %v2003_v49 = vadd.f32 %v9992_v6, %v8923_v11  ;;  %v1997_v52 = vadd.f32 %v9993_v23, %v8923_v11  ;;  %v1991_v63 = vadd.f32 %v9994_v22, %v8923_v11  ;;  %v9996_v54 = vld [vmem:[#allocation57_spill] sm:$0xff]  ;;  %v10002_v6 = vld [vmem:[#allocation20_spill] sm:$0xff] }
 0x815   :  { %v5770_v47 = vpop.eup %5769  ;;  %5787 = vpow2.f32 %v3526_v13  ;;  %v1979_v18 = vadd.f32 %v9996_v54, %v8923_v11  ;;  %v9997_v13 = vld [vmem:[#allocation12_spill] sm:$0xff]  ;;  %v139_v41 = vrot.slane %v8603_v7, %v8627_v55 }
 0x816   :  { %v3341_v59 = vmul.f32 0.0078125, %v5770_v47  ;;  %5789 = vpow2.f32 %v3524_v34  ;;  %v9995_v47 = vld [vmem:[#allocation55_spill] sm:$0xff] }
 0x817   :  { %5791 = vpow2.f32 %v3538_v33  ;;  %v1985_v40 = vadd.f32 %v9995_v47, %v8923_v11 }
 0x818   :  { %v3412_v4 = vmul.f32 %v3408_v62, %v3341_v59  ;;  %v2021_v62 = vadd.f32 %v9989_v58, %v8923_v11  ;;  %5793 = vpow2.f32 %v3528_v14  ;;  %v9999_v58 = vld [vmem:[#allocation66_spill] sm:$0xff] }
 0x819   :  { %5795 = vpow2.f32 %v3536_v38 }
 0x81a   :  { %v8936_v28 = vpop.eup %5771  ;;  %5390 = vmatmul.mubr.f32.vlgmr.msra.gmra.mxu1 %v3412_v4  ;;  %5797 = vpow2.f32 %v3530_v57  ;;  %v1973_v4 = vadd.f32 %v9997_v13, %v8923_v11  ;;  %v10000_v57 = vld [vmem:[#allocation14_spill] sm:$0xff] }
 0x81b   :  { %5393 = vmatpush3.msra.mxu0 %v8936_v28  ;;  %5428 = vmatpush3.msra.mxu1 %v2033_v12  ;;  %v8942_v19 = vpop.eup %5773  ;;  %5799 = vpow2.f32 %v3534_v50  ;;  %v1955_v44 = vadd.f32 %v10000_v57, %v8923_v11  ;;  %v10001_v50 = vld [vmem:[#allocation18_spill] sm:$0xff] }
 0x81c   :  { %5394 = vmatprep.subr.mxu0 %v9643_v53  ;;  %5429 = vmatprep.subr.mxu1 %v9643_v53  ;;  %v8949_v31 = vpop.eup %5775  ;;  %5801 = vpow2.f32 %v3532_v16  ;;  %v1949_v16 = vadd.f32 %v10001_v50, %v8923_v11 }
 0x81d   :  { %5395 = vmatpush3.msra.mxu0 %v8942_v19  ;;  %5430 = vmatpush3.msra.mxu1 %v2027_v2  ;;  %v8956_v35 = vpop.eup %5777  ;;  %v9998_v2 = vld [vmem:[#allocation62_spill] sm:$0xff] }
 0x81e   :  { %5396 = vmatprep.subr.mxu0 %v9643_v53  ;;  %5431 = vmatprep.subr.mxu1 %v9643_v53  ;;  %v8963_v24 = vpop.eup %5779  ;;  %v1967_v33 = vadd.f32 %v9998_v2, %v8923_v11 }
 0x81f   :  { %5397 = vmatpush3.msra.mxu0 %v8949_v31  ;;  %5432 = vmatpush3.msra.mxu1 %v2021_v62  ;;  %v8970_v15 = vpop.eup %5781  ;;  %v1961_v62 = vadd.f32 %v9999_v58, %v8923_v11 }
 0x820   :  { %5398 = vmatprep.subr.mxu0 %v9643_v53  ;;  %5433 = vmatprep.subr.mxu1 %v9643_v53  ;;  %v8977_v25 = vpop.eup %5783 }
 0x821   :  { %5399 = vmatpush3.msra.mxu0 %v8956_v35  ;;  %5434 = vmatpush3.msra.mxu1 %v2015_v36  ;;  %v5786_v27 = vpop.eup %5785 }
 0x822   :  { %5400 = vmatprep.subr.mxu0 %v9643_v53  ;;  %5435 = vmatprep.subr.mxu1 %v9643_v53  ;;  %v5788_v39 = vpop.eup %5787 }
 0x823   :  { %5401 = vmatpush3.msra.mxu0 %v8963_v24  ;;  %5436 = vmatpush3.msra.mxu1 %v2009_v9  ;;  %v5790_v59 = vpop.eup %5789 }
 0x824   :  { %5402 = vmatprep.subr.mxu0 %v9643_v53  ;;  %5437 = vmatprep.subr.mxu1 %v9643_v53  ;;  %v5792_v1 = vpop.eup %5791  ;;  %v3556_v12 = vadd.f32 %v5790_v59, %v5788_v39 }
 0x825   :  { %5403 = vmatpush3.msra.mxu0 %v8970_v15  ;;  %5438 = vmatpush3.msra.mxu1 %v2003_v49  ;;  %v5794_v17 = vpop.eup %5793  ;;  %v1943_v49 = vadd.f32 %v10002_v6, %v8923_v11 }
 0x826   :  { %5404 = vmatprep.subr.mxu0 %v9643_v53  ;;  %5439 = vmatprep.subr.mxu1 %v9643_v53  ;;  %v5796_v56 = vpop.eup %5795  ;;  %v3557_v34 = vadd.f32 %v5794_v17, %v3556_v12 }
 0x827   :  { %5405 = vmatpush3.msra.mxu0 %v8977_v25  ;;  %5440 = vmatpush3.msra.mxu1 %v1997_v52  ;;  %v5798_v61 = vpop.eup %5797  ;;  %v10003_v52 = vld [vmem:[#allocation63_spill] sm:$0xff] }
 0x828   :  { %5406 = vmatprep.subr.mxu0 %v9643_v53  ;;  %5441 = vmatprep.subr.mxu1 %v9643_v53  ;;  %v5800_v37 = vpop.eup %5799  ;;  %v3558_v26 = vadd.f32 %v5798_v61, %v3557_v34  ;;  %v436_v22 = vadd.f32 %v10003_v52, %v139_v41 }
 0x829   :  { %5407 = vmatpush3.msra.mxu0 %v5786_v27  ;;  %5442 = vmatpush3.msra.mxu1 %v1991_v63  ;;  %v5802_v14 = vpop.eup %5801 }
 0x82a   :  { %5408 = vmatprep.subr.mxu0 %v9643_v53  ;;  %5443 = vmatprep.subr.mxu1 %v9643_v53  ;;  %v3559_v38 = vadd.f32 %v5802_v14, %v3558_v26 }
 0x82b   :  { %5409 = vmatpush3.msra.mxu0 %v5792_v1  ;;  %5444 = vmatpush3.msra.mxu1 %v1985_v40 }
 0x82c   :  { %5410 = vmatprep.subr.mxu0 %v9643_v53  ;;  %5445 = vmatprep.subr.mxu1 %v9643_v53  ;;  %v3560_v36 = vadd.f32 %v5800_v37, %v3559_v38 }
 0x82d   :  { %5411 = vmatpush3.msra.mxu0 %v5796_v56  ;;  %5446 = vmatpush3.msra.mxu1 %v1979_v18 }
 0x82e   :  { %5412 = vmatprep.subr.mxu0 %v9643_v53  ;;  %5447 = vmatprep.subr.mxu1 %v9643_v53  ;;  %v3561_v9 = vadd.f32 %v5796_v56, %v3560_v36 }
 0x82f   :  { %5413 = vmatpush3.msra.mxu0 %v5800_v37  ;;  %5448 = vmatpush3.msra.mxu1 %v1973_v4 }
 0x830   :  { %5414 = vmatprep.subr.mxu0 %v9643_v53  ;;  %5449 = vmatprep.subr.mxu1 %v9643_v53  ;;  %v3562_v23 = vadd.f32 %v5792_v1, %v3561_v9 }
 0x831   :  { %5415 = vmatpush3.msra.mxu0 %v5802_v14  ;;  %5450 = vmatpush3.msra.mxu1 %v1967_v33 }
 0x832   :  { %5416 = vmatprep.subr.mxu0 %v9643_v53  ;;  %5451 = vmatprep.subr.mxu1 %v9643_v53  ;;  %v3563_v7 = vadd.f32 %v5786_v27, %v3562_v23 }
 0x833   :  { %5417 = vmatpush3.msra.mxu0 %v5798_v61  ;;  %5452 = vmatpush3.msra.mxu1 %v1961_v62 }
 0x834   :  { %5418 = vmatprep.subr.mxu0 %v9643_v53  ;;  %5453 = vmatprep.subr.mxu1 %v9643_v53  ;;  %v3564_v55 = vadd.f32 %v8977_v25, %v3563_v7 }
 0x835   :  { %5419 = vmatpush3.msra.mxu0 %v5794_v17  ;;  %5454 = vmatpush3.msra.mxu1 %v1955_v44 }
 0x836   :  { %5420 = vmatprep.subr.mxu0 %v9643_v53  ;;  %5455 = vmatprep.subr.mxu1 %v9643_v53  ;;  %v3565_v11 = vadd.f32 %v8970_v15, %v3564_v55 }
 0x837   :  { %5421 = vmatpush3.msra.mxu0 %v5788_v39  ;;  %5456 = vmatpush3.msra.mxu1 %v1949_v16  ;;  %v3740_v39 = vpop.xlane.xlu0 %3739 }
 0x838   :  { %5422 = vmatprep.subr.mxu0 %v9643_v53  ;;  %5457 = vmatprep.subr.mxu1 %v9643_v53  ;;  %v3566_v63 = vadd.f32 %v8963_v24, %v3565_v11  ;;  %v10006_v11 = vld [vmem:[#allocation160_spill] sm:$0xff] }
 0x839   :  { %5423 = vmatpush3.msra.mxu0 %v5790_v59  ;;  %5458 = vmatpush3.msra.mxu1 %v1943_v49  ;;  %v3741_v59 = vrot.slane %v3740_v39, 4 }
 0x83a   :  { %5425 = vmatmul.mubr.f32.vlgmr.msra.gmra.mxu0 %v436_v22  ;;  %5459 = vmatprep.mubr.msk.f32.mxu1 %vm5903_vm2, %v9643_v53  ;;  %v3567_v27 = vadd.f32 %v8956_v35, %v3566_v63 }
 0x83b   :  { %5462 = vmatprep.subr.mxu0 %v9643_v53  ;;  %5494 = vmatprep.mubr.msk.f32.mxu0 %vm5903_vm2, %v9643_v53  ;;  %v3742_v54 = vmax.f32 %v3740_v39, %v3741_v59 }
 0x83c   :  { %5497 = vmatprep.subr.mxu1 %v9643_v53  ;;  %v3568_v47 = vadd.f32 %v8949_v31, %v3567_v27  ;;  %v10007_v27 = vld [vmem:[#allocation36_spill] sm:$0xff] }
 0x83d   :  { %v3743_v18 = vrot.slane %v3742_v54, 2 }
 0x83e   :  { %v3569_v25 = vadd.f32 %v8942_v19, %v3568_v47 }
 0x83f   :  { %v3744_v17 = vmax.f32 %v3742_v54, %v3743_v18 }
 0x840   :  { %v3570_v40 = vadd.f32 %v8936_v28, %v3569_v25 }
 0x841   :  { %v3745_v24 = vrot.slane %v3744_v17, 1 }
 0x842   :  { %3571 = vadd.xlane.f32.xlu1 %v3570_v40 }
 0x843   :  { %v3746_v19 = vmax.f32 %v3744_v17, %v3745_v24  ;;  %v10011_v24 = vld [vmem:[#allocation154_spill] sm:$0xff] }
 0x8cb   :  { %v3572_v1 = vpop.xlane.xlu1 %3571 }
 0x8cc   :  { %v3573_v12 = vrot.slane %v3572_v1, 4 }
 0x8ce   :  { %v3574_v15 = vadd.f32 %v3573_v12, %v3572_v1  ;;  %v10010_v12 = vld [vmem:[#allocation156_spill] sm:$0xff] }
 0x8d0   :  { %v3575_v13 = vrot.slane %v3574_v15, 2 }
 0x8d2   :  { %v3576_v4 = vadd.f32 %v3575_v13, %v3574_v15 }
 0x8d4   :  { %v3577_v56 = vrot.slane %v3576_v4, 1 }
 0x8d6   :  { %v3578_v31 = vadd.f32 %v3577_v56, %v3576_v4 }
 0x8d8   :  { %5558 = vpush %v3578_v31 }
 0x8d9   :  { %5560 = vpush %v3746_v19 }
 0x8da   :  { %v9032_v35 = vpop.f32.mrf.mxu1 }
 0x8dc   :  { %v5391_v34 = vpop.f32.mrf.mxu1 }
 0x8dd   :  { %v10012_v34 = vld [vmem:[#allocation152_spill] sm:$0xff] }
 0x8fa   :  { %v3649_v28 = vpop.f32.mrf.mxu0 }
 0x8fc   :  { %v5426_v61 = vpop.f32.mrf.mxu0 }
 0x8fd   :  { %v10013_v61 = vld [vmem:[#allocation150_spill] sm:$0xff] }
 0x909   :  { %s5559_s5 = spop %5558 }
 0x90a   :  { %v3580_v2 = vstv %s5559_s5  ;;  %s5561_s26 = spop %5560 }
 0x90b   :  { %5803 = vrcp.f32 %v3580_v2  ;;  %v3748_v33 = vstv %s5561_s26 }
 0x90c   :  { %v3764_v37 = vsub.f32 %v8757_v43, %v3748_v33  ;;  %v3763_v26 = vsub.f32 %v8751_v20, %v3748_v33  ;;  %v3762_v14 = vsub.f32 %v8745_v42, %v3748_v33  ;;  %v3761_v38 = vsub.f32 %v8739_v29, %v3748_v33 }
 0x90d   :  { %v3760_v44 = vsub.f32 %v8725_v5, %v3748_v33  ;;  %v3759_v50 = vsub.f32 %v8719_v30, %v3748_v33  ;;  %v3758_v43 = vsub.f32 %v8713_v3, %v3748_v33  ;;  %v3757_v20 = vsub.f32 %v8707_v10, %v3748_v33  ;;  %v10004_v10 = vld [vmem:[#allocation162_spill] sm:$0xff] }
 0x90e   :  { %v3795_v58 = vmul.f32 1.442695, %v3764_v37  ;;  %v3793_v62 = vmul.f32 1.442695, %v3763_v26  ;;  %v3791_v57 = vmul.f32 1.442695, %v3762_v14  ;;  %v9044_v42 = vrot.slane %v8790_v0, %v8630_v8 }
 0x90f   :  { %v3789_v36 = vmul.f32 1.442695, %v3761_v38  ;;  %v3787_v16 = vmul.f32 1.442695, %v3760_v44  ;;  %v3785_v29 = vmul.f32 1.442695, %v3759_v50  ;;  %v3750_v41 = vsub.f32 %v8649_v48, %v3748_v33 }
 0x910   :  { %5805 = vpow2.f32 %v3795_v58  ;;  %v3749_v5 = vsub.f32 %v8643_v46, %v3748_v33  ;;  %v3783_v6 = vmul.f32 1.442695, %v3758_v43  ;;  %v3756_v30 = vsub.f32 %v8685_v32, %v3748_v33  ;;  %v10005_v48 = vld [vmem:[#allocation34_spill] sm:$0xff]  ;;  %v10014_v37 = vld [vmem:[#allocation148_spill] sm:$0xff] }
 0x911   :  { %5807 = vpow2.f32 %v3793_v62  ;;  %v3781_v23 = vmul.f32 1.442695, %v3757_v20  ;;  %v3751_v3 = vsub.f32 %v8655_v45, %v3748_v33  ;;  %v2035_v52 = vadd.f32 %v10004_v10, %v9044_v42  ;;  %v10008_v45 = vld [vmem:[#allocation35_spill] sm:$0xff]  ;;  %v10015_v62 = vld [vmem:[#allocation6_spill] sm:$0xff] }
 0x912   :  { %5809 = vpow2.f32 %v3791_v57  ;;  %v3755_v0 = vsub.f32 %v8679_v21, %v3748_v33  ;;  %v3767_v22 = vmul.f32 1.442695, %v3750_v41  ;;  %v3752_v55 = vsub.f32 %v10005_v48, %v3748_v33  ;;  %v10009_v21 = vld [vmem:[#allocation158_spill] sm:$0xff] }
 0x913   :  { %5811 = vpow2.f32 %v3789_v36  ;;  %v3765_v46 = vmul.f32 1.442695, %v3749_v5  ;;  %v2029_v63 = vadd.f32 %v10006_v11, %v9044_v42  ;;  %v3779_v32 = vmul.f32 1.442695, %v3756_v30  ;;  %v10016_v36 = vld [vmem:[#allocation56_spill] sm:$0xff] }
 0x914   :  { %5813 = vpow2.f32 %v3787_v16  ;;  %v3754_v47 = vsub.f32 %v10007_v27, %v3748_v33  ;;  %v3753_v40 = vsub.f32 %v10008_v45, %v3748_v33  ;;  %v3769_v39 = vmul.f32 1.442695, %v3751_v3  ;;  %v10018_v30 = vld [vmem:[#allocation60_spill] sm:$0xff] }
 0x915   :  { %5815 = vpow2.f32 %v3785_v29  ;;  %v2023_v59 = vadd.f32 %v10009_v21, %v9044_v42  ;;  %v3777_v54 = vmul.f32 1.442695, %v3755_v0  ;;  %v3771_v1 = vmul.f32 1.442695, %v3752_v55  ;;  %v10017_v29 = vld [vmem:[#allocation58_spill] sm:$0xff] }
 0x916   :  { %5817 = vpow2.f32 %v3783_v6  ;;  %v2017_v15 = vadd.f32 %v10010_v12, %v9044_v42  ;;  %v3775_v17 = vmul.f32 1.442695, %v3754_v47  ;;  %v3773_v4 = vmul.f32 1.442695, %v3753_v40  ;;  %v10022_v47 = vld [vmem:[#allocation17_spill] sm:$0xff]  ;;  %v3979_v12 = vld [vmem:[%s9572_s9 + $0x70] sm:$0xff] }
 0x917   :  { %5819 = vpow2.f32 %v3781_v23  ;;  %v2011_v56 = vadd.f32 %v10011_v24, %v9044_v42  ;;  %v2005_v19 = vadd.f32 %v10012_v34, %v9044_v42  ;;  %v1999_v2 = vadd.f32 %v10013_v61, %v9044_v42  ;;  %v3978_v24 = vld [vmem:[%s9572_s9 + $0x68] sm:$0xff]  ;;  %v3992_v61 = vld [vmem:[%s9572_s9 + $0xd8] sm:$0xff] }
 0x918   :  { %v5804_v9 = vpop.eup %5803  ;;  %5821 = vpow2.f32 %v3767_v22  ;;  %v1993_v26 = vadd.f32 %v10014_v37, %v9044_v42  ;;  %v1987_v38 = vadd.f32 %v10015_v62, %v9044_v42  ;;  %v1981_v50 = vadd.f32 %v10016_v36, %v9044_v42  ;;  %v3975_v37 = vld [vmem:[%s9572_s9 + $0x50] sm:$0xff]  ;;  %v3973_v62 = vld [vmem:[%s9572_s9 + $0x40] sm:$0xff]  ;;  %v3970_v36 = vld [vmem:[%s9572_s9 + $0x28] sm:$0xff] }
 0x919   :  { %v3582_v49 = vmul.f32 0.0078125, %v5804_v9  ;;  %5823 = vpow2.f32 %v3765_v46  ;;  %v1975_v41 = vadd.f32 %v10017_v29, %v9044_v42  ;;  %v10021_v46 = vld [vmem:[#allocation19_spill] sm:$0xff]  ;;  %v1945_v45 = vadd.f32 %v10022_v47, %v9044_v42  ;;  %v3983_v29 = vld [vmem:[%s9572_s9 + $0x90] sm:$0xff]  ;;  %v4037_v47 = vld [vmem:[%s9572_s9 + $0x240] sm:$0xff] }
 0x91a   :  { %5825 = vpow2.f32 %v3779_v32  ;;  %v1951_v11 = vadd.f32 %v10021_v46, %v9044_v42  ;;  %v4055_v46 = vld [vmem:[%s9572_s9 + $0x2d0] sm:$0xff] }
 0x91b   :  { %v3653_v7 = vmul.f32 %v3649_v28, %v3582_v49  ;;  %5827 = vpow2.f32 %v3769_v39  ;;  %v1969_v49 = vadd.f32 %v10018_v30, %v9044_v42  ;;  %v10023_v39 = vld [vmem:[#allocation65_spill] sm:$0xff]  ;;  %v3965_v30 = vld [vmem:[%s9572_s9] sm:$0xff] }
 0x91c   :  { %5829 = vpow2.f32 %v3777_v54  ;;  %v3995_v54 = vld [vmem:[%s9572_s9 + $0xf0] sm:$0xff] }
 0x91d   :  { %v9057_v25 = vpop.eup %5805  ;;  %5460 = vmatmul.mubr.f32.vlgmr.msra.gmra.mxu1 %v3653_v7  ;;  %5831 = vpow2.f32 %v3771_v1  ;;  %v10020_v7 = vld [vmem:[#allocation13_spill] sm:$0xff] }
 0x91e   :  { %5463 = vmatpush3.msra.mxu0 %v9057_v25  ;;  %5498 = vmatpush3.msra.mxu1 %v2035_v52  ;;  %v9063_v18 = vpop.eup %5807  ;;  %5833 = vpow2.f32 %v3775_v17  ;;  %v10019_v52 = vld [vmem:[#allocation64_spill] sm:$0xff]  ;;  %v1957_v48 = vadd.f32 %v10020_v7, %v9044_v42  ;;  %v3994_v17 = vld [vmem:[%s9572_s9 + $0xe8] sm:$0xff] }
 0x91f   :  { %5464 = vmatprep.subr.mxu0 %v9643_v53  ;;  %5499 = vmatprep.subr.mxu1 %v9643_v53  ;;  %v9070_v13 = vpop.eup %5809  ;;  %5835 = vpow2.f32 %v3773_v4  ;;  %v1963_v0 = vadd.f32 %v10019_v52, %v9044_v42  ;;  %v3980_v42 = vld [vmem:[%s9572_s9 + $0x78] sm:$0xff]  ;;  %v4043_v52 = vld [vmem:[%s9572_s9 + $0x270] sm:$0xff]  ;;  %v4057_v7 = vld [vmem:[%s9572_s9 + $0x2e0] sm:$0xff] }
 0x920   :  { %5465 = vmatpush3.msra.mxu0 %v9063_v18  ;;  %5500 = vmatpush3.msra.mxu1 %v2029_v63  ;;  %v9077_v31 = vpop.eup %5811  ;;  %v5879_v63 = vld [vmem:[%s9567_s4] sm:$0xff]  ;;  %s5904_s4 = smov [#allocation2]  }
 0x921   :  { %5466 = vmatprep.subr.mxu0 %v9643_v53  ;;  %5501 = vmatprep.subr.mxu1 %v9643_v53  ;;  %v9084_v28 = vpop.eup %5813  ;;  %v143_v32 = vrot.slane %v5879_v63, %v8630_v8  ;;  %v3996_v8 = vld [vmem:[%s9572_s9 + $0xf8] sm:$0xff]  ;;  %v4054_v63 = vld [vmem:[%s9572_s9 + $0x2c8] sm:$0xff]  ;;  %s4417_s28 = sshll.u32 %s5904_s4, 4  ;;  %s4418_s28 = int_to_ptr.vmem [resolvable:$true] %s4417_s28 }
 0x922   :  { %5467 = vmatpush3.msra.mxu0 %v9070_v13  ;;  %5502 = vmatpush3.msra.mxu1 %v2023_v59  ;;  %v9091_v33 = vpop.eup %5815  ;;  %s5880_s29 = scalar_lea.vmem %s4418_s28, 128  ;;  %p5885_p1 = scmp.lt.s32.totalorder %s4418_s28, %s4418_s28 }
 0x923   :  { %5468 = vmatprep.subr.mxu0 %v9643_v53  ;;  %5503 = vmatprep.subr.mxu1 %v9643_v53  ;;  %v9098_v14 = vpop.eup %5817  ;;  %v438_v21 = vadd.f32 %v10023_v39, %v143_v32  ;;  %v4038_v32 = vld [vmem:[%s9572_s9 + $0x248] sm:$0xff]  ;;  %v4035_v39 = vld [vmem:[%s9572_s9 + $0x230] sm:$0xff]  ;;  %p5881_p0 = scmp.ne.s32.totalorder %s4418_s28, %s5880_s29  ;;  %p5886_p2 = scmp.lt.s32.totalorder %s5880_s29, %s5880_s29 }
 0x924   :  { %5469 = vmatpush3.msra.mxu0 %v9077_v31  ;;  %5504 = vmatpush3.msra.mxu1 %v2017_v15  ;;  %v9102_v58 = vpop.eup %5819  ;;  %v10024_v15 = vld [vmem:[#allocation32_spill] sm:$0xff] }
 0x925   :  { %5470 = vmatprep.subr.mxu0 %v9643_v53  ;;  %5505 = vmatprep.subr.mxu1 %v9643_v53  ;;  %v5822_v57 = vpop.eup %5821  ;;  %p5887_p3 = por %p5886_p2, %p5885_p1 }
 0x926   :  { %5471 = vmatpush3.msra.mxu0 %v9084_v28  ;;  %5506 = vmatpush3.msra.mxu1 %v2011_v56  ;;  %v5824_v44 = vpop.eup %5823  ;;  %v3993_v56 = vld [vmem:[%s9572_s9 + $0xe0] sm:$0xff] }
 0x927   :  { %5472 = vmatprep.subr.mxu0 %v9643_v53  ;;  %5507 = vmatprep.subr.mxu1 %v9643_v53  ;;  %v5826_v16 = vpop.eup %5825  ;;  %v3797_v43 = vadd.f32 %v5824_v44, %v5822_v57  ;;  %p5888_p4 = pnand %p5887_p3, %p5881_p0 }
 0x928   :  { %5473 = vmatpush3.msra.mxu0 %v9091_v33  ;;  %5508 = vmatpush3.msra.mxu1 %v2005_v19  ;;  %v5828_v20 = vpop.eup %5827  ;;  %v3977_v19 = vld [vmem:[%s9572_s9 + $0x60] sm:$0xff] }
 0x929   :  { %5474 = vmatprep.subr.mxu0 %v9643_v53  ;;  %5509 = vmatprep.subr.mxu1 %v9643_v53  ;;  %v5830_v5 = vpop.eup %5829  ;;  %v3798_v9 = vadd.f32 %v5828_v20, %v3797_v43  ;;  %v3984_v43 = vld [vmem:[%s9572_s9 + $0x98] sm:$0xff] }
 0x92a   :  { %5475 = vmatpush3.msra.mxu0 %v9098_v14  ;;  %5510 = vmatpush3.msra.mxu1 %v1999_v2  ;;  %v5832_v6 = vpop.eup %5831 }
 0x92b   :  { %5476 = vmatprep.subr.mxu0 %v9643_v53  ;;  %5511 = vmatprep.subr.mxu1 %v9643_v53  ;;  %v5834_v23 = vpop.eup %5833  ;;  %v3799_v3 = vadd.f32 %v5832_v6, %v3798_v9  ;;  %v3966_v9 = vld [vmem:[%s9572_s9 + $0x8] sm:$0xff] }
 0x92c   :  { %5477 = vmatpush3.msra.mxu0 %v9102_v58  ;;  %5512 = vmatpush3.msra.mxu1 %v1993_v26  ;;  %v5836_v10 = vpop.eup %5835 }
 0x92d   :  { %5478 = vmatprep.subr.mxu0 %v9643_v53  ;;  %5513 = vmatprep.subr.mxu1 %v9643_v53  ;;  %v3800_v22 = vadd.f32 %v5836_v10, %v3799_v3  ;;  %v4059_v3 = vld [vmem:[%s9572_s9 + $0x2f0] sm:$0xff] }
 0x92e   :  { %5479 = vmatpush3.msra.mxu0 %v5826_v16  ;;  %5514 = vmatpush3.msra.mxu1 %v1987_v38  ;;  %v3972_v38 = vld [vmem:[%s9572_s9 + $0x38] sm:$0xff] }
 0x92f   :  { %5480 = vmatprep.subr.mxu0 %v9643_v53  ;;  %5515 = vmatprep.subr.mxu1 %v9643_v53  ;;  %v3801_v55 = vadd.f32 %v5834_v23, %v3800_v22  ;;  %v4042_v22 = vld [vmem:[%s9572_s9 + $0x268] sm:$0xff] }
 0x930   :  { %5481 = vmatpush3.msra.mxu0 %v5830_v5  ;;  %5516 = vmatpush3.msra.mxu1 %v1981_v50  ;;  %v3985_v50 = vld [vmem:[%s9572_s9 + $0xa0] sm:$0xff] }
 0x931   :  { %5482 = vmatprep.subr.mxu0 %v9643_v53  ;;  %5517 = vmatprep.subr.mxu1 %v9643_v53  ;;  %v3802_v27 = vadd.f32 %v5830_v5, %v3801_v55  ;;  %v3982_v5 = vld [vmem:[%s9572_s9 + $0x88] sm:$0xff]  ;;  %v4040_v55 = vld [vmem:[%s9572_s9 + $0x258] sm:$0xff] }
 0x932   :  { %5483 = vmatpush3.msra.mxu0 %v5834_v23  ;;  %5518 = vmatpush3.msra.mxu1 %v1975_v41  ;;  %v3967_v41 = vld [vmem:[%s9572_s9 + $0x10] sm:$0xff]  ;;  %v4044_v23 = vld [vmem:[%s9572_s9 + $0x278] sm:$0xff] }
 0x933   :  { %5484 = vmatprep.subr.mxu0 %v9643_v53  ;;  %5519 = vmatprep.subr.mxu1 %v9643_v53  ;;  %v3803_v40 = vadd.f32 %v5826_v16, %v3802_v27  ;;  %v3969_v16 = vld [vmem:[%s9572_s9 + $0x20] sm:$0xff] }
 0x934   :  { %5485 = vmatpush3.msra.mxu0 %v5836_v10  ;;  %5520 = vmatpush3.msra.mxu1 %v1969_v49  ;;  %v4060_v49 = vld [vmem:[%s9572_s9 + $0x2f8] sm:$0xff]  ;;  %v4053_v27 = vld [vmem:[%s9572_s9 + $0x2c0] sm:$0xff] }
 0x935   :  { %5486 = vmatprep.subr.mxu0 %v9643_v53  ;;  %5521 = vmatprep.subr.mxu1 %v9643_v53  ;;  %v3804_v59 = vadd.f32 %v9102_v58, %v3803_v40  ;;  %v10025_v10 = vld [vmem:[#allocation163_spill] sm:$0xff] }
 0x936   :  { %5487 = vmatpush3.msra.mxu0 %v5832_v6  ;;  %5522 = vmatpush3.msra.mxu1 %v1963_v0  ;;  %v3981_v6 = vld [vmem:[%s9572_s9 + $0x80] sm:$0xff]  ;;  %v4058_v0 = vld [vmem:[%s9572_s9 + $0x2e8] sm:$0xff]  ;;  %v4036_v40 = vld [vmem:[%s9572_s9 + $0x238] sm:$0xff] }
 0x937   :  { %5488 = vmatprep.subr.mxu0 %v9643_v53  ;;  %5523 = vmatprep.subr.mxu1 %v9643_v53  ;;  %v3805_v1 = vadd.f32 %v9098_v14, %v3804_v59  ;;  %v3974_v14 = vld [vmem:[%s9572_s9 + $0x48] sm:$0xff] }
 0x938   :  { %5489 = vmatpush3.msra.mxu0 %v5828_v20  ;;  %5524 = vmatpush3.msra.mxu1 %v1957_v48  ;;  %v3968_v20 = vld [vmem:[%s9572_s9 + $0x18] sm:$0xff]  ;;  %v4041_v48 = vld [vmem:[%s9572_s9 + $0x260] sm:$0xff]  ;;  %v4034_v59 = vld [vmem:[%s9572_s9 + $0x228] sm:$0xff] }
 0x939   :  { %5490 = vmatprep.subr.mxu0 %v9643_v53  ;;  %5525 = vmatprep.subr.mxu1 %v9643_v53  ;;  %v3806_v4 = vadd.f32 %v9091_v33, %v3805_v1  ;;  %v4048_v1 = vld [vmem:[%s9572_s9 + $0x298] sm:$0xff] }
 0x93a   :  { %5491 = vmatpush3.msra.mxu0 %v5822_v57  ;;  %5526 = vmatpush3.msra.mxu1 %v1951_v11  ;;  %v3971_v57 = vld [vmem:[%s9572_s9 + $0x30] sm:$0xff] }
 0x93b   :  { %5492 = vmatprep.subr.mxu0 %v9643_v53  ;;  %5527 = vmatprep.subr.mxu1 %v9643_v53  ;;  %v3807_v34 = vadd.f32 %v9084_v28, %v3806_v4  ;;  %v3991_v28 = vld [vmem:[%s9572_s9 + $0xd0] sm:$0xff]  ;;  %v4046_v4 = vld [vmem:[%s9572_s9 + $0x288] sm:$0xff] }
 0x93c   :  { %5493 = vmatpush3.msra.mxu0 %v5824_v44  ;;  %5528 = vmatpush3.msra.mxu1 %v1945_v45  ;;  %v3986_v44 = vld [vmem:[%s9572_s9 + $0xa8] sm:$0xff]  ;;  %v4039_v11 = vld [vmem:[%s9572_s9 + $0x250] sm:$0xff]  ;;  %v4052_v45 = vld [vmem:[%s9572_s9 + $0x2b8] sm:$0xff] }
 0x93d   :  { %5495 = vmatmul.mubr.f32.vlgmr.msra.gmra.mxu0 %v438_v21  ;;  %4832 = vmatprep.subr.mxu0 %v3996_v8  ;;  %v3808_v2 = vadd.f32 %v9077_v31, %v3807_v34  ;;  %v3990_v31 = vld [vmem:[%s9572_s9 + $0xc8] sm:$0xff]  ;;  %v4051_v8 = vld [vmem:[%s9572_s9 + $0x2b0] sm:$0xff]  ;;  %v4029_v34 = vld [vmem:[%s9572_s9 + $0x200] sm:$0xff] }
 0x93e   :  { %4833 = vmatpush3.msra.mxu0 %v3980_v42  ;;  %4164 = vmatprep.mubr.f32.mxu0 %v10024_v15  ;;  %v4050_v21 = vld [vmem:[%s9572_s9 + $0x2a8] sm:$0xff]  ;;  %v4049_v42 = vld [vmem:[%s9572_s9 + $0x2a0] sm:$0xff]  ;;  %v4047_v15 = vld [vmem:[%s9572_s9 + $0x290] sm:$0xff] }
 0x93f   :  { %4834 = vmatprep.subr.mxu0 %v3995_v54  ;;  %5529 = vmatprep.mubr.msk.f32.mxu1 %vm5903_vm2, %v9643_v53  ;;  %v3976_v53 = vld [vmem:[%s9572_s9 + $0x58] sm:$0xff]  ;;  %v3809_v33 = vadd.f32 %v9070_v13, %v3808_v2  ;;  %v3989_v13 = vld [vmem:[%s9572_s9 + $0xc0] sm:$0xff] }
 0x940   :  { %4835 = vmatpush3.msra.mxu0 %v3979_v12  ;;  %v4033_v54 = vld [vmem:[%s9572_s9 + $0x220] sm:$0xff]  ;;  %v4032_v12 = vld [vmem:[%s9572_s9 + $0x218] sm:$0xff] }
 0x941   :  { %4836 = vmatprep.subr.mxu0 %v3994_v17  ;;  %v3810_v26 = vadd.f32 %v9063_v18, %v3809_v33  ;;  %v3988_v18 = vld [vmem:[%s9572_s9 + $0xb8] sm:$0xff]  ;;  %v4031_v17 = vld [vmem:[%s9572_s9 + $0x210] sm:$0xff] }
 0x942   :  { %4837 = vmatpush3.msra.mxu0 %v3978_v24  ;;  %v4030_v24 = vld [vmem:[%s9572_s9 + $0x208] sm:$0xff] }
 0x943   :  { %4838 = vmatprep.subr.mxu0 %v3993_v56  ;;  %v3811_v58 = vadd.f32 %v9057_v25, %v3810_v26  ;;  %v3987_v25 = vld [vmem:[%s9572_s9 + $0xb0] sm:$0xff]  ;;  %v4045_v56 = vld [vmem:[%s9572_s9 + $0x280] sm:$0xff] }
 0x944   :  { %4839 = vmatpush3.msra.mxu0 %v3977_v19  ;;  %v4028_v19 = vld [vmem:[%s9572_s9 + $0x1f8] sm:$0xff] }
 0x945   :  { %4840 = vmatprep.subr.mxu0 %v3992_v61  ;;  %3812 = vadd.xlane.f32.xlu1 %v3811_v58 }
 0x946   :  { %4841 = vmatpush3.msra.mxu0 %v3976_v53  ;;  %4867 = vmatprep.subr.mxu1 %v4028_v19  ;;  %v4084_v19 = vld [vmem:[%s9572_s9 + $0x3b8] sm:$0xff] }
 0x947   :  { %4842 = vmatprep.subr.mxu0 %v3991_v28 }
 0x948   :  { %4843 = vmatpush3.msra.mxu0 %v3975_v37 }
 0x949   :  { %4844 = vmatprep.subr.mxu0 %v3990_v31 }
 0x94a   :  { %4845 = vmatpush3.msra.mxu0 %v3974_v14 }
 0x94b   :  { %4846 = vmatprep.subr.mxu0 %v3989_v13 }
 0x94c   :  { %4847 = vmatpush3.msra.mxu0 %v3973_v62 }
 0x94d   :  { %4848 = vmatprep.subr.mxu0 %v3988_v18 }
 0x94e   :  { %4849 = vmatpush3.msra.mxu0 %v3972_v38 }
 0x94f   :  { %4850 = vmatprep.subr.mxu0 %v3987_v25  ;;  %v4012_v25 = vld [vmem:[%s9572_s9 + $0x178] sm:$0xff] }
 0x950   :  { %4851 = vmatpush3.msra.mxu0 %v3971_v57  ;;  %v4027_v57 = vld [vmem:[%s9572_s9 + $0x1f0] sm:$0xff] }
 0x951   :  { %4852 = vmatprep.subr.mxu0 %v3986_v44  ;;  %v4011_v44 = vld [vmem:[%s9572_s9 + $0x170] sm:$0xff] }
 0x952   :  { %4853 = vmatpush3.msra.mxu0 %v3970_v36  ;;  %v4026_v36 = vld [vmem:[%s9572_s9 + $0x1e8] sm:$0xff] }
 0x953   :  { %4854 = vmatprep.subr.mxu0 %v3985_v50  ;;  %v4010_v50 = vld [vmem:[%s9572_s9 + $0x168] sm:$0xff] }
 0x954   :  { %4855 = vmatpush3.msra.mxu0 %v3969_v16  ;;  %v4025_v16 = vld [vmem:[%s9572_s9 + $0x1e0] sm:$0xff] }
 0x955   :  { %4856 = vmatprep.subr.mxu0 %v3984_v43  ;;  %v4009_v43 = vld [vmem:[%s9572_s9 + $0x160] sm:$0xff] }
 0x956   :  { %4857 = vmatpush3.msra.mxu0 %v3968_v20  ;;  %v4008_v20 = vld [vmem:[%s9572_s9 + $0x158] sm:$0xff] }
 0x957   :  { %4858 = vmatprep.subr.mxu0 %v3983_v29  ;;  %v4023_v29 = vld [vmem:[%s9572_s9 + $0x1d0] sm:$0xff] }
 0x958   :  { %4859 = vmatpush3.msra.mxu0 %v3967_v41  ;;  %v4007_v41 = vld [vmem:[%s9572_s9 + $0x150] sm:$0xff] }
 0x959   :  { %4860 = vmatprep.subr.mxu0 %v3982_v5  ;;  %v4022_v5 = vld [vmem:[%s9572_s9 + $0x1c8] sm:$0xff] }
 0x95a   :  { %4861 = vmatpush3.msra.mxu0 %v3966_v9  ;;  %v4006_v9 = vld [vmem:[%s9572_s9 + $0x148] sm:$0xff] }
 0x95b   :  { %4862 = vmatprep.subr.mxu0 %v3981_v6  ;;  %v4021_v6 = vld [vmem:[%s9572_s9 + $0x1c0] sm:$0xff] }
 0x95c   :  { %4863 = vmatpush3.msra.mxu0 %v3965_v30  ;;  %v4005_v30 = vld [vmem:[%s9572_s9 + $0x140] sm:$0xff] }
 0x95d   :  { %4165 = vmatmul.mubr.f32.vlgmr.msra.gmra.mxu0 %v10025_v10  ;;  %4902 = vmatprep.subr.mxu0 %v4060_v49  ;;  %v4020_v49 = vld [vmem:[%s9572_s9 + $0x1b8] sm:$0xff]  ;;  %v4003_v10 = vld [vmem:[%s9572_s9 + $0x130] sm:$0xff] }
 0x95e   :  { %4903 = vmatpush3.msra.mxu0 %v4044_v23  ;;  %4304 = vmatprep.mubr.f32.mxu0 %v9032_v35  ;;  %v4056_v35 = vld [vmem:[%s9572_s9 + $0x2d8] sm:$0xff] }
 0x95f   :  { %4904 = vmatprep.subr.mxu0 %v4059_v3  ;;  %v4004_v23 = vld [vmem:[%s9572_s9 + $0x138] sm:$0xff]  ;;  %v4019_v3 = vld [vmem:[%s9572_s9 + $0x1b0] sm:$0xff] }
 0x960   :  { %4905 = vmatpush3.msra.mxu0 %v4043_v52  ;;  %v4018_v52 = vld [vmem:[%s9572_s9 + $0x1a8] sm:$0xff] }
 0x961   :  { %4906 = vmatprep.subr.mxu0 %v4058_v0  ;;  %v4002_v0 = vld [vmem:[%s9572_s9 + $0x128] sm:$0xff] }
 0x962   :  { %4907 = vmatpush3.msra.mxu0 %v4042_v22  ;;  %v4017_v22 = vld [vmem:[%s9572_s9 + $0x1a0] sm:$0xff] }
 0x963   :  { %4908 = vmatprep.subr.mxu0 %v4057_v7  ;;  %v4001_v7 = vld [vmem:[%s9572_s9 + $0x120] sm:$0xff] }
 0x964   :  { %4909 = vmatpush3.msra.mxu0 %v4041_v48  ;;  %v4016_v48 = vld [vmem:[%s9572_s9 + $0x198] sm:$0xff] }
 0x965   :  { %4910 = vmatprep.subr.mxu0 %v4056_v35  ;;  %v4000_v35 = vld [vmem:[%s9572_s9 + $0x118] sm:$0xff] }
 0x966   :  { %4911 = vmatpush3.msra.mxu0 %v4040_v55  ;;  %v4015_v55 = vld [vmem:[%s9572_s9 + $0x190] sm:$0xff] }
 0x967   :  { %4912 = vmatprep.subr.mxu0 %v4055_v46  ;;  %v3999_v46 = vld [vmem:[%s9572_s9 + $0x110] sm:$0xff] }
 0x968   :  { %4913 = vmatpush3.msra.mxu0 %v4039_v11  ;;  %v4014_v11 = vld [vmem:[%s9572_s9 + $0x188] sm:$0xff] }
 0x969   :  { %4914 = vmatprep.subr.mxu0 %v4054_v63  ;;  %v3998_v63 = vld [vmem:[%s9572_s9 + $0x108] sm:$0xff] }
 0x96a   :  { %4915 = vmatpush3.msra.mxu0 %v4038_v32  ;;  %v4013_v32 = vld [vmem:[%s9572_s9 + $0x180] sm:$0xff] }
 0x96b   :  { %4916 = vmatprep.subr.mxu0 %v4053_v27  ;;  %v3997_v27 = vld [vmem:[%s9572_s9 + $0x100] sm:$0xff] }
 0x96c   :  { %4917 = vmatpush3.msra.mxu0 %v4037_v47  ;;  %v4092_v47 = vld [vmem:[%s9572_s9 + $0x3f8] sm:$0xff] }
 0x96d   :  { %4918 = vmatprep.subr.mxu0 %v4052_v45  ;;  %v4076_v45 = vld [vmem:[%s9572_s9 + $0x378] sm:$0xff] }
 0x96e   :  { %4919 = vmatpush3.msra.mxu0 %v4036_v40  ;;  %v4091_v40 = vld [vmem:[%s9572_s9 + $0x3f0] sm:$0xff] }
 0x96f   :  { %4920 = vmatprep.subr.mxu0 %v4051_v8  ;;  %v10026_v8 = vld [vmem:[#allocation33_spill] sm:$0xff] }
 0x970   :  { %4921 = vmatpush3.msra.mxu0 %v4035_v39  ;;  %v4075_v39 = vld [vmem:[%s9572_s9 + $0x370] sm:$0xff] }
 0x971   :  { %4922 = vmatprep.subr.mxu0 %v4050_v21  ;;  %v4090_v21 = vld [vmem:[%s9572_s9 + $0x3e8] sm:$0xff] }
 0x972   :  { %4923 = vmatpush3.msra.mxu0 %v4034_v59  ;;  %v4074_v59 = vld [vmem:[%s9572_s9 + $0x368] sm:$0xff] }
 0x973   :  { %4924 = vmatprep.subr.mxu0 %v4049_v42  ;;  %v4089_v42 = vld [vmem:[%s9572_s9 + $0x3e0] sm:$0xff] }
 0x974   :  { %4925 = vmatpush3.msra.mxu0 %v4033_v54  ;;  %v4073_v54 = vld [vmem:[%s9572_s9 + $0x360] sm:$0xff] }
 0x975   :  { %4926 = vmatprep.subr.mxu0 %v4048_v1  ;;  %v4088_v1 = vld [vmem:[%s9572_s9 + $0x3d8] sm:$0xff] }
 0x976   :  { %4927 = vmatpush3.msra.mxu0 %v4032_v12  ;;  %v4072_v12 = vld [vmem:[%s9572_s9 + $0x358] sm:$0xff] }
 0x977   :  { %4928 = vmatprep.subr.mxu0 %v4047_v15  ;;  %v4087_v15 = vld [vmem:[%s9572_s9 + $0x3d0] sm:$0xff] }
 0x978   :  { %4929 = vmatpush3.msra.mxu0 %v4031_v17  ;;  %v4071_v17 = vld [vmem:[%s9572_s9 + $0x350] sm:$0xff] }
 0x979   :  { %4930 = vmatprep.subr.mxu0 %v4046_v4  ;;  %v4086_v4 = vld [vmem:[%s9572_s9 + $0x3c8] sm:$0xff] }
 0x97a   :  { %4931 = vmatpush3.msra.mxu0 %v4030_v24  ;;  %v4070_v24 = vld [vmem:[%s9572_s9 + $0x348] sm:$0xff] }
 0x97b   :  { %4932 = vmatprep.subr.mxu0 %v4045_v56  ;;  %v4085_v56 = vld [vmem:[%s9572_s9 + $0x3c0] sm:$0xff] }
 0x97c   :  { %4933 = vmatpush3.msra.mxu0 %v4029_v34  ;;  %v4069_v34 = vld [vmem:[%s9572_s9 + $0x340] sm:$0xff] }
 0x97d   :  { %4305 = vmatmul.mubr.f32.vlgmr.msra.gmra.mxu0 %v8911_v51 }
 0x9ce   :  { %v3813_v61 = vpop.xlane.xlu1 %3812 }
 0x9cf   :  { %v3814_v2 = vrot.slane %v3813_v61, 4 }
 0x9d1   :  { %v3815_v53 = vadd.f32 %v3814_v2, %v3813_v61  ;;  %v4068_v61 = vld [vmem:[%s9572_s9 + $0x338] sm:$0xff]  ;;  %v4083_v2 = vld [vmem:[%s9572_s9 + $0x3b0] sm:$0xff] }
 0x9d3   :  { %v3816_v28 = vrot.slane %v3815_v53, 2 }
 0x9d5   :  { %v3817_v33 = vadd.f32 %v3816_v28, %v3815_v53  ;;  %v4067_v53 = vld [vmem:[%s9572_s9 + $0x330] sm:$0xff]  ;;  %v4082_v28 = vld [vmem:[%s9572_s9 + $0x3a8] sm:$0xff] }
 0x9d7   :  { %v3818_v37 = vrot.slane %v3817_v33, 1 }
 0x9d9   :  { %v3819_v26 = vadd.f32 %v3818_v37, %v3817_v33  ;;  %v4066_v33 = vld [vmem:[%s9572_s9 + $0x328] sm:$0xff]  ;;  %v4081_v37 = vld [vmem:[%s9572_s9 + $0x3a0] sm:$0xff] }
 0x9db   :  { %5562 = vpush %v3819_v26  ;;  %v4065_v26 = vld [vmem:[%s9572_s9 + $0x320] sm:$0xff] }
 0x9dd   :  { %v9354_v31 = vpop.f32.mrf.mxu1 }
 0x9df   :  { %v5461_v14 = vpop.f32.mrf.mxu1 }
 0x9e0   :  { %v4080_v14 = vld [vmem:[%s9572_s9 + $0x398] sm:$0xff] }
 0x9fd   :  { %v3890_v13 = vpop.f32.mrf.mxu0 }
 0x9ff   :  { %v5496_v58 = vpop.f32.mrf.mxu0 }
 0xa00   :  { %v4079_v58 = vld [vmem:[%s9572_s9 + $0x390] sm:$0xff] }
 0xa0c   :  { %s5563_s3 = spop %5562 }
 0xa0d   :  { %v3821_v51 = vstv %s5563_s3 }
 0xa0e   :  { %5837 = vrcp.f32 %v3821_v51  ;;  %v4063_v51 = vld [vmem:[%s9572_s9 + $0x310] sm:$0xff] }
 0xa1b   :  { %v5838_v62 = vpop.eup %5837 }
 0xa1c   :  { %v3823_v18 = vmul.f32 0.0078125, %v5838_v62  ;;  %v4078_v62 = vld [vmem:[%s9572_s9 + $0x388] sm:$0xff] }
 0xa1e   :  { %v3894_v38 = vmul.f32 %v3890_v13, %v3823_v18  ;;  %v4064_v13 = vld [vmem:[%s9572_s9 + $0x318] sm:$0xff]  ;;  %v4062_v18 = vld [vmem:[%s9572_s9 + $0x308] sm:$0xff] }
 0xa20   :  { %5530 = vmatmul.mubr.f32.vlgmr.msra.gmra.mxu1 %v3894_v38  ;;  %v4077_v38 = vld [vmem:[%s9572_s9 + $0x380] sm:$0xff] }
 0xa21   :  { %4868 = vmatpush3.msra.mxu1 %v4012_v25  ;;  %4234 = vmatprep.mubr.f32.mxu1 %v8767_v60  ;;  %v4024_v60 = vld [vmem:[%s9572_s9 + $0x1d8] sm:$0xff]  ;;  %v4061_v25 = vld [vmem:[%s9572_s9 + $0x300] sm:$0xff] }
 0xa22   :  { %4869 = vmatprep.subr.mxu1 %v4027_v57 }
 0xa23   :  { %4870 = vmatpush3.msra.mxu1 %v4011_v44 }
 0xa24   :  { %4871 = vmatprep.subr.mxu1 %v4026_v36  ;;  %v4864_v36 = vpop.f32.mrf.mxu0 }
 0xa25   :  { %4872 = vmatpush3.msra.mxu1 %v4010_v50 }
 0xa26   :  { %4873 = vmatprep.subr.mxu1 %v4025_v16  ;;  %v4865_v16 = vpop.f32.mrf.mxu0 }
 0xa27   :  { %4874 = vmatpush3.msra.mxu1 %v4009_v43 }
 0xa28   :  { %4875 = vmatprep.subr.mxu1 %v4024_v60  ;;  %v4866_v60 = vadd.f32 %v4865_v16, %v4864_v36 }
 0xa29   :  { %4876 = vmatpush3.msra.mxu1 %v4008_v20  ;;  %v4557_v20 = vld [vmem:[%s9573_s10] ss:$0 sm:$0xff] }
 0xa2a   :  { %4877 = vmatprep.subr.mxu1 %v4023_v29 }
 0xa2b   :  { %4878 = vmatpush3.msra.mxu1 %v4007_v41 }
 0xa2c   :  { %4879 = vmatprep.subr.mxu1 %v4022_v5  ;;  %v4167_v5 = vadd.f32 %v4866_v60, %v4557_v20 }
 0xa2d   :  { %4880 = vmatpush3.msra.mxu1 %v4006_v9 }
 0xa2e   :  { %4881 = vmatprep.subr.mxu1 %v4021_v6 }
 0xa2f   :  { %4882 = vmatpush3.msra.mxu1 %v4005_v30 }
 0xa30   :  { %4883 = vmatprep.subr.mxu1 %v4020_v49 }
 0xa31   :  { %4884 = vmatpush3.msra.mxu1 %v4004_v23 }
 0xa32   :  { %4885 = vmatprep.subr.mxu1 %v4019_v3 }
 0xa33   :  { %4886 = vmatpush3.msra.mxu1 %v4003_v10 }
 0xa34   :  { %4887 = vmatprep.subr.mxu1 %v4018_v52 }
 0xa35   :  { %4888 = vmatpush3.msra.mxu1 %v4002_v0 }
 0xa36   :  { %4889 = vmatprep.subr.mxu1 %v4017_v22 }
 0xa37   :  { %4890 = vmatpush3.msra.mxu1 %v4001_v7 }
 0xa38   :  { %4891 = vmatprep.subr.mxu1 %v4016_v48 }
 0xa39   :  { %4892 = vmatpush3.msra.mxu1 %v4000_v35 }
 0xa3a   :  { %4893 = vmatprep.subr.mxu1 %v4015_v55 }
 0xa3b   :  { %4894 = vmatpush3.msra.mxu1 %v3999_v46 }
 0xa3c   :  { %4895 = vmatprep.subr.mxu1 %v4014_v11 }
 0xa3d   :  { %4896 = vmatpush3.msra.mxu1 %v3998_v63  ;;  %v4934_v29 = vpop.f32.mrf.mxu0 }
 0xa3e   :  { %4897 = vmatprep.subr.mxu1 %v4013_v32  ;;  %v4558_v32 = vld [vmem:[%s9574_s11] ss:$0 sm:$0xff] }
 0xa3f   :  { %4898 = vmatpush3.msra.mxu1 %v3997_v27  ;;  %v4935_v9 = vpop.f32.mrf.mxu0 }
 0xa40   :  { %4235 = vmatmul.mubr.f32.vlgmr.msra.gmra.mxu1 %v10026_v8  ;;  %4937 = vmatprep.subr.mxu1 %v4092_v47  ;;  %v4936_v49 = vadd.f32 %v4935_v9, %v4934_v29  ;;  %v4559_v47 = vld [vmem:[%s9575_s12] ss:$0 sm:$0xff] }
 0xa41   :  { %4938 = vmatpush3.msra.mxu1 %v4076_v45 }
 0xa42   :  { %4939 = vmatprep.subr.mxu1 %v4091_v40 }
 0xa43   :  { %4940 = vmatpush3.msra.mxu1 %v4075_v39 }
 0xa44   :  { %4941 = vmatprep.subr.mxu1 %v4090_v21 }
 0xa45   :  { %4942 = vmatpush3.msra.mxu1 %v4074_v59 }
 0xa46   :  { %4943 = vmatprep.subr.mxu1 %v4089_v42 }
 0xa47   :  { %4944 = vmatpush3.msra.mxu1 %v4073_v54 }
 0xa48   :  { %4945 = vmatprep.subr.mxu1 %v4088_v1 }
 0xa49   :  { %4946 = vmatpush3.msra.mxu1 %v4072_v12 }
 0xa4a   :  { %4947 = vmatprep.subr.mxu1 %v4087_v15 }
 0xa4b   :  { %4948 = vmatpush3.msra.mxu1 %v4071_v17 }
 0xa4c   :  { %4949 = vmatprep.subr.mxu1 %v4086_v4 }
 0xa4d   :  { %4950 = vmatpush3.msra.mxu1 %v4070_v24 }
 0xa4e   :  { %4951 = vmatprep.subr.mxu1 %v4085_v56 }
 0xa4f   :  { %4952 = vmatpush3.msra.mxu1 %v4069_v34 }
 0xa50   :  { %4953 = vmatprep.subr.mxu1 %v4084_v19 }
 0xa51   :  { %4954 = vmatpush3.msra.mxu1 %v4068_v61 }
 0xa52   :  { %4955 = vmatprep.subr.mxu1 %v4083_v2 }
 0xa53   :  { %4956 = vmatpush3.msra.mxu1 %v4067_v53 }
 0xa54   :  { %4957 = vmatprep.subr.mxu1 %v4082_v28 }
 0xa55   :  { %4958 = vmatpush3.msra.mxu1 %v4066_v33 }
 0xa56   :  { %4959 = vmatprep.subr.mxu1 %v4081_v37 }
 0xa57   :  { %4960 = vmatpush3.msra.mxu1 %v4065_v26 }
 0xa58   :  { %4961 = vmatprep.subr.mxu1 %v4080_v14 }
 0xa59   :  { %4962 = vmatpush3.msra.mxu1 %v4064_v13 }
 0xa5a   :  { %4963 = vmatprep.subr.mxu1 %v4079_v58 }
 0xa5b   :  { %4964 = vmatpush3.msra.mxu1 %v4063_v51 }
 0xa5c   :  { %4965 = vmatprep.subr.mxu1 %v4078_v62 }
 0xa5d   :  { %4966 = vmatpush3.msra.mxu1 %v4062_v18 }
 0xa5e   :  { %4967 = vmatprep.subr.mxu1 %v4077_v38 }
 0xa5f   :  { %4968 = vmatpush3.msra.mxu1 %v4061_v25 }
 0xae0   :  { %v3961_v57 = vpop.f32.mrf.mxu1 }
 0xae1   :  { %4374 = vmatprep.mubr.f32.mxu1 %v3961_v57 }
 0xae2   :  { %v5531_v44 = vpop.f32.mrf.mxu1  ;;  %4375 = vmatmul.mubr.f32.vlgmr.msra.gmra.mxu1 %v9354_v31 }
 0xb00   :  { %v4899_v50 = vpop.f32.mrf.mxu1 }
 0xb02   :  { %v4900_v43 = vpop.f32.mrf.mxu1 }
 0xb03   :  { %v4901_v41 = vadd.f32 %v4900_v43, %v4899_v50 }
 0xb05   :  { %v4237_v6 = vadd.f32 %v4901_v41, %v4167_v5 }
 0xb07   :  { %v4307_v10 = vadd.f32 %v4936_v49, %v4237_v6 }
 0xba2   :  { %v4969_v30 = vpop.f32.mrf.mxu1 }
 0xba4   :  { %v4970_v23 = vpop.f32.mrf.mxu1 }
 0xba5   :  { %v4971_v3 = vadd.f32 %v4970_v23, %v4969_v30 }
 0xba7   :  { %v4377_v31 = vadd.f32 %v4971_v3, %v4307_v10 }
 0xba9   :  { %v4380_v52 = vsel %vm152_vm0, %v4377_v31, 0.0 }
 0xbaa   :  { %4381 = vadd.xlane.f32.xlu0 %v4380_v52 }
 0xc33   :  { %v4382_v0 = vpop.xlane.xlu0 %4381 }
 0xc34   :  { %v4384_v22 = vmul.f32 0.03125, %v4382_v0 }
 0xc36   :  { %v4385_v7 = vsub.f32 %v4377_v31, %v4384_v22 }
 0xc38   :  { %v4386_v48 = vmul.f32 %v4385_v7, %v4385_v7 }
 0xc3a   :  { %v4387_v35 = vsel %vm152_vm0, %v4386_v48, 0.0 }
 0xc3b   :  { %4388 = vadd.xlane.f32.xlu1 %v4387_v35 }
 0xcc4   :  { %v4389_v55 = vpop.xlane.xlu1 %4388 }
 0xcc5   :  { %v4390_v46 = vmul.f32 0.03125, %v4389_v55 }
 0xcc7   :  { %v4391_v11 = vadd.f32 1e-05, %v4390_v46 }
 0xcc9   :  { %5839 = vrsqrt.f32 %v4391_v11 }
 0xcd6   :  { %v5840_v63 = vpop.eup %5839 }
 0xcd7   :  { %v4393_v27 = vmul.f32 %v5840_v63, %v4385_v7 }
 0xcd9   :  { %v4401_v45 = vmul.f32 %v4558_v32, %v4393_v27 }
 0xcdb   :  { %v4409_v40 = vadd.f32 %v4559_v47, %v4401_v45 }
 0xcdd   :  { %4410 = vst.msk [vmem:[#allocation2] sm:$0xff] %vm152_vm0, %v4409_v40 }
 0xcde   :  { %5891 = shalt.err (!%p5888_p4)
}
 0xcdf   :  { %4420 = dma.vmem_to_hbm [thread:$0]  %s4418_s28, 128, %s9576_s13, [#allocation3]  }
 0xce0   :  { %5900 = dma.done.wait [#allocation3], 128  }
 0xce1   :  { %5901 = vsyncadd [#allocation3], 4294967168 }
 0xce2   :  { %4424 = vsyncpa [#allocation3], 1 }

</bundles_post_ra>
